<compile_context>
chip_gen: v6e
topology: v6e:2x2x1
jax: 0.10.0
libtpu: 0.0.40
codegen_flags: <defaults>
</compile_context>

<pallas_src>
import functools

import numpy as np
import jax
import jax.numpy as jnp
from jax import lax
from jax.experimental import pallas as pl
from jax.experimental.pallas import tpu as pltpu


# ---------------------------------------------------------------------------
# Fused kernel: conv3x3+BN+ReLU (x2) + 2x2/stride-2 maxpool with argmax.
# Layouts (per grid step n = one batch element):
#   x_ref    : (1, H, W*Cin)            lane-dense input
#   w1_ref   : (3, (W+2)*Cin,  W*Cout)  block-Toeplitz weights, BN scale folded
#   t1_ref   : (1, W*Cout)              folded BN shift, tiled across W
#   w2_ref   : (3, (W+2)*Cout, W*Cout)
#   t2_ref   : (1, W*Cout)
#   y_ref    : (1, H,  W*Cout)          pre-pool activation (lane-dense, 128 lanes)
#   pool_ref : (1, Ho, Wo*Cout)         pooled values
#   idx_ref  : (1, Ho, Wo*Cout) int32   flat H*W argmax indices (PyTorch style)
#   xpad*_ref: VMEM scratch, zero-padded activations (H+2, (W+2)*C)
# ---------------------------------------------------------------------------
def encoder_kernel(x_ref, w1_ref, t1_ref, w2_ref, t2_ref,
                   y_ref, pool_ref, idx_ref, xpad1_ref, xpad2_ref,
                   *, H, W, Cin, Cout):
    Ho, Wo = H // 2, W // 2

    def conv_block(x_ld, xpad_ref, w_ref, t_ref, C):
        # Zero halo, then write the interior of the padded scratch.
        xpad_ref[...] = jnp.zeros_like(xpad_ref)
        xpad_ref[pl.ds(1, H), pl.ds(C, W * C)] = x_ld
        # 3 matmuls (one per kernel row): (H, (W+2)*C) @ ((W+2)*C, W*Cout)
        acc = jnp.zeros((H, W * Cout), jnp.float32)
        for ky in range(3):
            acc += jnp.dot(xpad_ref[pl.ds(ky, H), :], w_ref[ky],
                           preferred_element_type=jnp.float32)
        # Folded BatchNorm (scale already in weights) + ReLU.
        return jnp.maximum(acc + t_ref[0], 0.0)          # (H, W*Cout)

    y1 = conv_block(x_ref[0], xpad1_ref, w1_ref, t1_ref, Cin)   # block 1
    y = conv_block(y1, xpad2_ref, w2_ref, t2_ref, Cout)         # block 2
    y_ref[0] = y.astype(y_ref.dtype)                            # lane-dense store

    # ---- 2x2 / stride-2 maxpool with PyTorch flat H*W argmax indices ----
    y3 = y.reshape(H, W, Cout)
    yr = y3.reshape(Ho, 2, W, Cout)                  # split rows by parity p
    row = lax.broadcasted_iota(jnp.int32, (Ho, Wo, Cout), 0)
    col = lax.broadcasted_iota(jnp.int32, (Ho, Wo, Cout), 1)
    base = 2 * row * W + 2 * col                     # index of candidate (p=0,q=0)

    def pool_row(p):
        r = yr[:, p].reshape(Ho, Wo, 2, Cout)
        c0, c1 = r[:, :, 0, :], r[:, :, 1, :]        # q = 0 / q = 1 candidates
        i0 = base + p * W
        m = c1 > c0                                  # strict >: q=0 wins ties
        return jnp.where(m, c1, c0), jnp.where(m, i0 + 1, i0)

    v0, i0 = pool_row(0)                             # reduce q within p first,
    v1, i1 = pool_row(1)                             # then reduce p (keeps
    m = v1 > v0                                      # first-occurrence order)
    pool_ref[0] = jnp.where(m, v1, v0).reshape(Ho, Wo * Cout).astype(pool_ref.dtype)
    idx_ref[0] = jnp.where(m, i1, i0).reshape(Ho, Wo * Cout)


# ---------------------------------------------------------------------------
# pallas_call wrapper (lane-dense in/out) and end-to-end forward
# ---------------------------------------------------------------------------
def _encoder_pallas(x_ld, w1, t1, w2, t2, *, H, W, Cin, Cout):
    N = x_ld.shape[0]
    Ho, Wo = H // 2, W // 2
    kernel = functools.partial(encoder_kernel, H=H, W=W, Cin=Cin, Cout=Cout)
    return pl.pallas_call(
        kernel,
        out_shape=(
            jax.ShapeDtypeStruct((N, H, W * Cout), jnp.float32),
            jax.ShapeDtypeStruct((N, Ho, Wo * Cout), jnp.float32),
            jax.ShapeDtypeStruct((N, Ho, Wo * Cout), jnp.int32),
        ),
        grid=(N,),
        in_specs=[
            pl.BlockSpec((1, H, W * Cin), lambda n: (n, 0, 0)),
            pl.BlockSpec((3, (W + 2) * Cin, W * Cout), lambda n: (0, 0, 0)),
            pl.BlockSpec((1, W * Cout), lambda n: (0, 0)),
            pl.BlockSpec((3, (W + 2) * Cout, W * Cout), lambda n: (0, 0, 0)),
            pl.BlockSpec((1, W * Cout), lambda n: (0, 0)),
        ],
        out_specs=(
            pl.BlockSpec((1, H, W * Cout), lambda n: (n, 0, 0)),
            pl.BlockSpec((1, Ho, Wo * Cout), lambda n: (n, 0, 0)),
            pl.BlockSpec((1, Ho, Wo * Cout), lambda n: (n, 0, 0)),
        ),
        scratch_shapes=[
            pltpu.VMEM((H + 2, (W + 2) * Cin), jnp.float32),
            pltpu.VMEM((H + 2, (W + 2) * Cout), jnp.float32),
        ],
        compiler_params=pltpu.CompilerParams(
            dimension_semantics=("parallel",)),
    )(x_ld, w1, t1, w2, t2)


@jax.jit
def encoder_forward(x_nchw, w1, t1, w2, t2):
    N, Cin, H, W = x_nchw.shape
    Cout = w1.shape[2] // W
    Ho, Wo = H // 2, W // 2
    # NCHW -> lane-dense (N, H, W*Cin)
    x_ld = jnp.transpose(x_nchw, (0, 2, 3, 1)).reshape(N, H, W * Cin)
    y_ld, pool_ld, idx_ld = _encoder_pallas(x_ld, w1, t1, w2, t2,
                                            H=H, W=W, Cin=Cin, Cout=Cout)
    # back to NCHW (PyTorch convention)
    y = jnp.transpose(y_ld.reshape(N, H, W, Cout), (0, 3, 1, 2))
    pooled = jnp.transpose(pool_ld.reshape(N, Ho, Wo, Cout), (0, 3, 1, 2))
    idx = jnp.transpose(idx_ld.reshape(N, Ho, Wo, Cout), (0, 3, 1, 2))
    return y, pooled, idx


# ---------------------------------------------------------------------------
# Parameter construction: Conv2d(3x3)+BatchNorm2d folded for inference, then
# restructured into width-block-Toeplitz matrices (lane-dense matmul form).
# ---------------------------------------------------------------------------
def make_block_params(key, c_in, c_out, W, eps=1e-5):
    k = jax.random.split(key, 6)
    w = jax.random.normal(k[0], (c_out, c_in, 3, 3), jnp.float32) * 0.1   # OIHW
    b = jax.random.normal(k[1], (c_out,), jnp.float32) * 0.1
    gamma = 1.0 + 0.1 * jax.random.normal(k[2], (c_out,), jnp.float32)
    beta = 0.1 * jax.random.normal(k[3], (c_out,), jnp.float32)
    mean = 0.1 * jax.random.normal(k[4], (c_out,), jnp.float32)
    var = 0.5 + jnp.abs(jax.random.normal(k[5], (c_out,), jnp.float32))

    scale = gamma / jnp.sqrt(var + eps)                   # (Cout,)
    shift = (b - mean) * scale + beta                     # (Cout,)

    # Fold BN scale into the conv weights; convert to HWIO.
    w_f = np.asarray(jnp.transpose(w * scale[:, None, None, None],
                                   (2, 3, 1, 0)))         # (3, 3, Cin, Cout)

    # Block-Toeplitz over width: Wtoe[ky][(wi*Cin+ci), (wo*Cout+co)]
    #   = w_f[ky, wi-wo, ci, co]  if 0 <= wi-wo <= 2 else 0
    # (wi indexes the zero-padded width, wo the output width).
    wb = np.zeros((3, (W + 2) * c_in, W * c_out), np.float32)
    for ky in range(3):
        for kx in range(3):
            blk = w_f[ky, kx]                             # (Cin, Cout)
            for wo in range(W):
                wi = wo + kx
                wb[ky, wi * c_in:(wi + 1) * c_in,
                       wo * c_out:(wo + 1) * c_out] = blk

    shift_ld = jnp.tile(shift, W).reshape(1, W * c_out)   # per-lane shift
    return {
        "w_toe": jnp.asarray(wb),
        "shift_ld": shift_ld,
        # kept only for the pure-JAX reference check:
        "w_oihw": w, "scale_ref": scale, "shift_ref": shift,
    }


if __name__ == "__main__":
    # Small shapes consistent with the module: N=2, Cin=4, Cout=8, H=W=16.
    N, C_IN, C_OUT, H, W = 2, 4, 8, 16, 16

    root = jax.random.PRNGKey(0)
    kx_, k1, k2 = jax.random.split(root, 3)
    x_nchw = jax.random.normal(kx_, (N, C_IN, H, W), jnp.float32)
    p1 = make_block_params(k1, C_IN, C_OUT, W)
    p2 = make_block_params(k2, C_OUT, C_OUT, W)

    y, pooled, indices = encoder_forward(
        x_nchw, p1["w_toe"], p1["shift_ld"], p2["w_toe"], p2["shift_ld"])
    jax.block_until_ready((y, pooled, indices))
    out_size = tuple(y.shape)          # == output.size() in the PyTorch module

    # ------------------ pure-JAX reference check ------------------
    def ref_block(x_nhwc, p):
        w_hwio = jnp.transpose(p["w_oihw"], (2, 3, 1, 0))
        c = lax.conv_general_dilated(
            x_nhwc, w_hwio, (1, 1), "SAME",
            dimension_numbers=("NHWC", "HWIO", "NHWC"))
        return jnp.maximum(c * p["scale_ref"] + p["shift_ref"], 0.0)

    x_nhwc = jnp.transpose(x_nchw, (0, 2, 3, 1))
    y_ref = ref_block(ref_block(x_nhwc, p1), p2)
    pooled_ref = lax.reduce_window(
        y_ref, -jnp.inf, lax.max, (1, 2, 2, 1), (1, 2, 2, 1), "VALID")

    assert jnp.allclose(jnp.transpose(y, (0, 2, 3, 1)), y_ref, atol=2e-4), "conv mismatch"
    assert jnp.allclose(jnp.transpose(pooled, (0, 2, 3, 1)), pooled_ref, atol=2e-4), "pool mismatch"

    # pooling indices must gather back exactly the pooled values
    y_flat = y.reshape(N, C_OUT, H * W)
    gathered = jnp.take_along_axis(y_flat, indices.reshape(N, C_OUT, -1), axis=2)
    assert jnp.allclose(gathered.reshape(pooled.shape), pooled), "index mismatch"
    assert out_size == (N, C_OUT, H, W)

    print("KERNEL_OK")
</pallas_src>

<mosaic_0001>
module attributes {stable_mosaic.version = 11 : i64} {
  func.func @encoder_kernel(%arg0: i32, %arg1: memref<1x16x64xf32, #tpu.memory_space<vmem>>, %arg2: memref<3x72x128xf32, #tpu.memory_space<vmem>>, %arg3: memref<1x128xf32, #tpu.memory_space<vmem>>, %arg4: memref<3x144x128xf32, #tpu.memory_space<vmem>>, %arg5: memref<1x128xf32, #tpu.memory_space<vmem>>, %arg6: memref<1x16x128xf32, #tpu.memory_space<vmem>>, %arg7: memref<1x8x64xf32, #tpu.memory_space<vmem>>, %arg8: memref<1x8x64xi32, #tpu.memory_space<vmem>>, %arg9: memref<18x72xf32, #tpu.memory_space<vmem>>, %arg10: memref<18x144xf32, #tpu.memory_space<vmem>>) attributes {dimension_semantics = [#tpu.dimension_semantics<parallel>], iteration_bounds = array<i64: 2>, scalar_prefetch = 0 : i64, scratch_operands = 2 : i64, tpu.core_type = #tpu.core_type<tc>, window_params = [{transform_indices = @transform_0, window_bounds = array<i64: 1, 16, 64>}, {pipeline_mode = #tpu.pipeline_mode<synchronous>, transform_indices = @transform_1, window_bounds = array<i64: 3, 72, 128>}, {pipeline_mode = #tpu.pipeline_mode<synchronous>, transform_indices = @transform_2, window_bounds = array<i64: 1, 128>}, {pipeline_mode = #tpu.pipeline_mode<synchronous>, transform_indices = @transform_3, window_bounds = array<i64: 3, 144, 128>}, {pipeline_mode = #tpu.pipeline_mode<synchronous>, transform_indices = @transform_4, window_bounds = array<i64: 1, 128>}, {transform_indices = @transform_5, window_bounds = array<i64: 1, 16, 128>}, {transform_indices = @transform_6, window_bounds = array<i64: 1, 8, 64>}, {transform_indices = @transform_7, window_bounds = array<i64: 1, 8, 64>}]} {
    %c0 = arith.constant 0 : index
    %c0_0 = arith.constant 0 : index
    %c0_1 = arith.constant 0 : index
    %0 = vector.load %arg1[%c0, %c0_0, %c0_1] : memref<1x16x64xf32, #tpu.memory_space<vmem>>, vector<1x16x64xf32>
    %1 = vector.shape_cast %0 : vector<1x16x64xf32> to vector<16x64xf32>
    %cst = arith.constant 0.000000e+00 : f32
    %2 = vector.broadcast %cst : f32 to vector<18x72xf32>
    %c0_2 = arith.constant 0 : index
    %c0_3 = arith.constant 0 : index
    %3 = vector.load %arg9[%c0_2, %c0_3] : memref<18x72xf32, #tpu.memory_space<vmem>>, vector<18x72xf32>
    tpu.vector_store %arg9[%c0_2, %c0_3], %2 {strides = array<i32>} : memref<18x72xf32, #tpu.memory_space<vmem>>, vector<18x72xf32>,
    %c1 = arith.constant 1 : index
    %c4 = arith.constant 4 : index
    %4 = vector.load %arg9[%c1, %c4] : memref<18x72xf32, #tpu.memory_space<vmem>>, vector<16x64xf32>
    tpu.vector_store %arg9[%c1, %c4], %1 {strides = array<i32>} : memref<18x72xf32, #tpu.memory_space<vmem>>, vector<16x64xf32>,
    %cst_4 = arith.constant 0.000000e+00 : f32
    %5 = vector.broadcast %cst_4 : f32 to vector<16x128xf32>
    %c0_5 = arith.constant 0 : index
    %c0_6 = arith.constant 0 : index
    %6 = vector.load %arg9[%c0_5, %c0_6] : memref<18x72xf32, #tpu.memory_space<vmem>>, vector<16x72xf32>
    %c0_7 = arith.constant 0 : index
    %c0_8 = arith.constant 0 : index
    %c0_9 = arith.constant 0 : index
    %7 = vector.load %arg2[%c0_7, %c0_8, %c0_9] : memref<3x72x128xf32, #tpu.memory_space<vmem>>, vector<1x72x128xf32>
    %8 = vector.shape_cast %7 : vector<1x72x128xf32> to vector<72x128xf32>
    %cst_10 = arith.constant dense<0.000000e+00> : vector<16x128xf32>
    %9 = tpu.matmul %6, %8, %cst_10 {dimension_numbers = #tpu.dot_dimension_numbers<[1], [0], [0], [1], [0, 0, 1, 1], [], []>} : vector<16x72xf32>, vector<72x128xf32>, vector<16x128xf32> -> vector<16x128xf32>
    %10 = arith.addf %5, %9 : vector<16x128xf32>
    %c1_11 = arith.constant 1 : index
    %c0_12 = arith.constant 0 : index
    %11 = vector.load %arg9[%c1_11, %c0_12] : memref<18x72xf32, #tpu.memory_space<vmem>>, vector<16x72xf32>
    %c1_13 = arith.constant 1 : index
    %c0_14 = arith.constant 0 : index
    %c0_15 = arith.constant 0 : index
    %12 = vector.load %arg2[%c1_13, %c0_14, %c0_15] : memref<3x72x128xf32, #tpu.memory_space<vmem>>, vector<1x72x128xf32>
    %13 = vector.shape_cast %12 : vector<1x72x128xf32> to vector<72x128xf32>
    %cst_16 = arith.constant dense<0.000000e+00> : vector<16x128xf32>
    %14 = tpu.matmul %11, %13, %cst_16 {dimension_numbers = #tpu.dot_dimension_numbers<[1], [0], [0], [1], [0, 0, 1, 1], [], []>} : vector<16x72xf32>, vector<72x128xf32>, vector<16x128xf32> -> vector<16x128xf32>
    %15 = arith.addf %10, %14 : vector<16x128xf32>
    %c2 = arith.constant 2 : index
    %c0_17 = arith.constant 0 : index
    %16 = vector.load %arg9[%c2, %c0_17] : memref<18x72xf32, #tpu.memory_space<vmem>>, vector<16x72xf32>
    %c2_18 = arith.constant 2 : index
    %c0_19 = arith.constant 0 : index
    %c0_20 = arith.constant 0 : index
    %17 = vector.load %arg2[%c2_18, %c0_19, %c0_20] : memref<3x72x128xf32, #tpu.memory_space<vmem>>, vector<1x72x128xf32>
    %18 = vector.shape_cast %17 : vector<1x72x128xf32> to vector<72x128xf32>
    %cst_21 = arith.constant dense<0.000000e+00> : vector<16x128xf32>
    %19 = tpu.matmul %16, %18, %cst_21 {dimension_numbers = #tpu.dot_dimension_numbers<[1], [0], [0], [1], [0, 0, 1, 1], [], []>} : vector<16x72xf32>, vector<72x128xf32>, vector<16x128xf32> -> vector<16x128xf32>
    %20 = arith.addf %15, %19 : vector<16x128xf32>
    %c0_22 = arith.constant 0 : index
    %c0_23 = arith.constant 0 : index
    %21 = vector.load %arg3[%c0_22, %c0_23] : memref<1x128xf32, #tpu.memory_space<vmem>>, vector<1x128xf32>
    %22 = vector.shape_cast %21 : vector<1x128xf32> to vector<128xf32>
    %23 = vector.shape_cast %22 : vector<128xf32> to vector<1x128xf32>
    %24 = vector.broadcast %23 : vector<1x128xf32> to vector<16x128xf32>
    %25 = arith.addf %20, %24 : vector<16x128xf32>
    %cst_24 = arith.constant 0.000000e+00 : f32
    %26 = vector.broadcast %cst_24 : f32 to vector<16x128xf32>
    %27 = arith.maximumf %25, %26 : vector<16x128xf32>
    %cst_25 = arith.constant 0.000000e+00 : f32
    %28 = vector.broadcast %cst_25 : f32 to vector<18x144xf32>
    %c0_26 = arith.constant 0 : index
    %c0_27 = arith.constant 0 : index
    %29 = vector.load %arg10[%c0_26, %c0_27] : memref<18x144xf32, #tpu.memory_space<vmem>>, vector<18x144xf32>
    tpu.vector_store %arg10[%c0_26, %c0_27], %28 {strides = array<i32>} : memref<18x144xf32, #tpu.memory_space<vmem>>, vector<18x144xf32>,
    %c1_28 = arith.constant 1 : index
    %c8 = arith.constant 8 : index
    %30 = vector.load %arg10[%c1_28, %c8] : memref<18x144xf32, #tpu.memory_space<vmem>>, vector<16x128xf32>
    tpu.vector_store %arg10[%c1_28, %c8], %27 {strides = array<i32>} : memref<18x144xf32, #tpu.memory_space<vmem>>, vector<16x128xf32>,
    %cst_29 = arith.constant 0.000000e+00 : f32
    %31 = vector.broadcast %cst_29 : f32 to vector<16x128xf32>
    %c0_30 = arith.constant 0 : index
    %c0_31 = arith.constant 0 : index
    %32 = vector.load %arg10[%c0_30, %c0_31] : memref<18x144xf32, #tpu.memory_space<vmem>>, vector<16x144xf32>
    %c0_32 = arith.constant 0 : index
    %c0_33 = arith.constant 0 : index
    %c0_34 = arith.constant 0 : index
    %33 = vector.load %arg4[%c0_32, %c0_33, %c0_34] : memref<3x144x128xf32, #tpu.memory_space<vmem>>, vector<1x144x128xf32>
    %34 = vector.shape_cast %33 : vector<1x144x128xf32> to vector<144x128xf32>
    %cst_35 = arith.constant dense<0.000000e+00> : vector<16x128xf32>
    %35 = tpu.matmul %32, %34, %cst_35 {dimension_numbers = #tpu.dot_dimension_numbers<[1], [0], [0], [1], [0, 0, 1, 1], [], []>} : vector<16x144xf32>, vector<144x128xf32>, vector<16x128xf32> -> vector<16x128xf32>
    %36 = arith.addf %31, %35 : vector<16x128xf32>
    %c1_36 = arith.constant 1 : index
    %c0_37 = arith.constant 0 : index
    %37 = vector.load %arg10[%c1_36, %c0_37] : memref<18x144xf32, #tpu.memory_space<vmem>>, vector<16x144xf32>
    %c1_38 = arith.constant 1 : index
    %c0_39 = arith.constant 0 : index
    %c0_40 = arith.constant 0 : index
    %38 = vector.load %arg4[%c1_38, %c0_39, %c0_40] : memref<3x144x128xf32, #tpu.memory_space<vmem>>, vector<1x144x128xf32>
    %39 = vector.shape_cast %38 : vector<1x144x128xf32> to vector<144x128xf32>
    %cst_41 = arith.constant dense<0.000000e+00> : vector<16x128xf32>
    %40 = tpu.matmul %37, %39, %cst_41 {dimension_numbers = #tpu.dot_dimension_numbers<[1], [0], [0], [1], [0, 0, 1, 1], [], []>} : vector<16x144xf32>, vector<144x128xf32>, vector<16x128xf32> -> vector<16x128xf32>
    %41 = arith.addf %36, %40 : vector<16x128xf32>
    %c2_42 = arith.constant 2 : index
    %c0_43 = arith.constant 0 : index
    %42 = vector.load %arg10[%c2_42, %c0_43] : memref<18x144xf32, #tpu.memory_space<vmem>>, vector<16x144xf32>
    %c2_44 = arith.constant 2 : index
    %c0_45 = arith.constant 0 : index
    %c0_46 = arith.constant 0 : index
    %43 = vector.load %arg4[%c2_44, %c0_45, %c0_46] : memref<3x144x128xf32, #tpu.memory_space<vmem>>, vector<1x144x128xf32>
    %44 = vector.shape_cast %43 : vector<1x144x128xf32> to vector<144x128xf32>
    %cst_47 = arith.constant dense<0.000000e+00> : vector<16x128xf32>
    %45 = tpu.matmul %42, %44, %cst_47 {dimension_numbers = #tpu.dot_dimension_numbers<[1], [0], [0], [1], [0, 0, 1, 1], [], []>} : vector<16x144xf32>, vector<144x128xf32>, vector<16x128xf32> -> vector<16x128xf32>
    %46 = arith.addf %41, %45 : vector<16x128xf32>
    %c0_48 = arith.constant 0 : index
    %c0_49 = arith.constant 0 : index
    %47 = vector.load %arg5[%c0_48, %c0_49] : memref<1x128xf32, #tpu.memory_space<vmem>>, vector<1x128xf32>
    %48 = vector.shape_cast %47 : vector<1x128xf32> to vector<128xf32>
    %49 = vector.shape_cast %48 : vector<128xf32> to vector<1x128xf32>
    %50 = vector.broadcast %49 : vector<1x128xf32> to vector<16x128xf32>
    %51 = arith.addf %46, %50 : vector<16x128xf32>
    %cst_50 = arith.constant 0.000000e+00 : f32
    %52 = vector.broadcast %cst_50 : f32 to vector<16x128xf32>
    %53 = arith.maximumf %51, %52 : vector<16x128xf32>
    %c0_51 = arith.constant 0 : index
    %c0_52 = arith.constant 0 : index
    %c0_53 = arith.constant 0 : index
    %54 = vector.load %arg6[%c0_51, %c0_52, %c0_53] : memref<1x16x128xf32, #tpu.memory_space<vmem>>, vector<1x16x128xf32>
    %55 = vector.shape_cast %54 : vector<1x16x128xf32> to vector<16x128xf32>
    %56 = vector.shape_cast %53 : vector<16x128xf32> to vector<1x16x128xf32>
    tpu.vector_store %arg6[%c0_51, %c0_52, %c0_53], %56 {strides = array<i32>} : memref<1x16x128xf32, #tpu.memory_space<vmem>>, vector<1x16x128xf32>,
    %57 = vector.shape_cast %53 : vector<16x128xf32> to vector<16x16x8xf32>
    %58 = vector.shape_cast %57 : vector<16x16x8xf32> to vector<8x2x16x8xf32>
    %59 = tpu.iota {dimensions = array<i32: 0>} : vector<8x8x8xi32>
    %60 = tpu.iota {dimensions = array<i32: 1>} : vector<8x8x8xi32>
    %c2_i32 = arith.constant 2 : i32
    %61 = vector.broadcast %c2_i32 : i32 to vector<8x8x8xi32>
    %62 = arith.muli %61, %59 : vector<8x8x8xi32>
    %c16_i32 = arith.constant 16 : i32
    %63 = vector.broadcast %c16_i32 : i32 to vector<8x8x8xi32>
    %64 = arith.muli %62, %63 : vector<8x8x8xi32>
    %c2_i32_54 = arith.constant 2 : i32
    %65 = vector.broadcast %c2_i32_54 : i32 to vector<8x8x8xi32>
    %66 = arith.muli %65, %60 : vector<8x8x8xi32>
    %67 = arith.addi %64, %66 : vector<8x8x8xi32>
    %68 = vector.extract_strided_slice %58 {offsets = [0, 0, 0, 0], sizes = [8, 1, 16, 8], strides = [1, 1, 1, 1]} : vector<8x2x16x8xf32> to vector<8x1x16x8xf32>
    %69 = vector.shape_cast %68 : vector<8x1x16x8xf32> to vector<8x16x8xf32>
    %70 = vector.shape_cast %69 : vector<8x16x8xf32> to vector<8x8x2x8xf32>
    %71 = vector.extract_strided_slice %70 {offsets = [0, 0, 0, 0], sizes = [8, 8, 1, 8], strides = [1, 1, 1, 1]} : vector<8x8x2x8xf32> to vector<8x8x1x8xf32>
    %72 = vector.shape_cast %71 : vector<8x8x1x8xf32> to vector<8x8x8xf32>
    %73 = vector.extract_strided_slice %70 {offsets = [0, 0, 1, 0], sizes = [8, 8, 1, 8], strides = [1, 1, 1, 1]} : vector<8x8x2x8xf32> to vector<8x8x1x8xf32>
    %74 = vector.shape_cast %73 : vector<8x8x1x8xf32> to vector<8x8x8xf32>
    %c0_i32 = arith.constant 0 : i32
    %75 = vector.broadcast %c0_i32 : i32 to vector<8x8x8xi32>
    %76 = arith.addi %67, %75 : vector<8x8x8xi32>
    %77 = arith.cmpf ogt, %74, %72 : vector<8x8x8xf32>
    %78 = arith.select %77, %74, %72 : vector<8x8x8xi1>, vector<8x8x8xf32>
    %c1_i32 = arith.constant 1 : i32
    %79 = vector.broadcast %c1_i32 : i32 to vector<8x8x8xi32>
    %80 = arith.addi %76, %79 : vector<8x8x8xi32>
    %81 = arith.select %77, %80, %76 : vector<8x8x8xi1>, vector<8x8x8xi32>
    %82 = vector.extract_strided_slice %58 {offsets = [0, 1, 0, 0], sizes = [8, 1, 16, 8], strides = [1, 1, 1, 1]} : vector<8x2x16x8xf32> to vector<8x1x16x8xf32>
    %83 = vector.shape_cast %82 : vector<8x1x16x8xf32> to vector<8x16x8xf32>
    %84 = vector.shape_cast %83 : vector<8x16x8xf32> to vector<8x8x2x8xf32>
    %85 = vector.extract_strided_slice %84 {offsets = [0, 0, 0, 0], sizes = [8, 8, 1, 8], strides = [1, 1, 1, 1]} : vector<8x8x2x8xf32> to vector<8x8x1x8xf32>
    %86 = vector.shape_cast %85 : vector<8x8x1x8xf32> to vector<8x8x8xf32>
    %87 = vector.extract_strided_slice %84 {offsets = [0, 0, 1, 0], sizes = [8, 8, 1, 8], strides = [1, 1, 1, 1]} : vector<8x8x2x8xf32> to vector<8x8x1x8xf32>
    %88 = vector.shape_cast %87 : vector<8x8x1x8xf32> to vector<8x8x8xf32>
    %c16_i32_55 = arith.constant 16 : i32
    %89 = vector.broadcast %c16_i32_55 : i32 to vector<8x8x8xi32>
    %90 = arith.addi %67, %89 : vector<8x8x8xi32>
    %91 = arith.cmpf ogt, %88, %86 : vector<8x8x8xf32>
    %92 = arith.select %91, %88, %86 : vector<8x8x8xi1>, vector<8x8x8xf32>
    %c1_i32_56 = arith.constant 1 : i32
    %93 = vector.broadcast %c1_i32_56 : i32 to vector<8x8x8xi32>
    %94 = arith.addi %90, %93 : vector<8x8x8xi32>
    %95 = arith.select %91, %94, %90 : vector<8x8x8xi1>, vector<8x8x8xi32>
    %96 = arith.cmpf ogt, %92, %78 : vector<8x8x8xf32>
    %97 = arith.select %96, %92, %78 : vector<8x8x8xi1>, vector<8x8x8xf32>
    %98 = vector.shape_cast %97 : vector<8x8x8xf32> to vector<8x64xf32>
    %c0_57 = arith.constant 0 : index
    %c0_58 = arith.constant 0 : index
    %c0_59 = arith.constant 0 : index
    %99 = vector.load %arg7[%c0_57, %c0_58, %c0_59] : memref<1x8x64xf32, #tpu.memory_space<vmem>>, vector<1x8x64xf32>
    %100 = vector.shape_cast %99 : vector<1x8x64xf32> to vector<8x64xf32>
    %101 = vector.shape_cast %98 : vector<8x64xf32> to vector<1x8x64xf32>
    tpu.vector_store %arg7[%c0_57, %c0_58, %c0_59], %101 {strides = array<i32>} : memref<1x8x64xf32, #tpu.memory_space<vmem>>, vector<1x8x64xf32>,
    %102 = arith.select %96, %95, %81 : vector<8x8x8xi1>, vector<8x8x8xi32>
    %103 = vector.shape_cast %102 : vector<8x8x8xi32> to vector<8x64xi32>
    %c0_60 = arith.constant 0 : index
    %c0_61 = arith.constant 0 : index
    %c0_62 = arith.constant 0 : index
    %104 = vector.load %arg8[%c0_60, %c0_61, %c0_62] : memref<1x8x64xi32, #tpu.memory_space<vmem>>, vector<1x8x64xi32>
    %105 = vector.shape_cast %104 : vector<1x8x64xi32> to vector<8x64xi32>
    %106 = vector.shape_cast %103 : vector<8x64xi32> to vector<1x8x64xi32>
    tpu.vector_store %arg8[%c0_60, %c0_61, %c0_62], %106 {strides = array<i32>} : memref<1x8x64xi32, #tpu.memory_space<vmem>>, vector<1x8x64xi32>,
    return
  }
  func.func @transform_0(%arg0: i32) -> (i32, i32, i32) {
    %c0_i32 = arith.constant 0 : i32
    %c0_i32_0 = arith.constant 0 : i32
    %c0_i32_1 = arith.constant 0 : i32
    return %arg0, %c0_i32, %c0_i32_0 : i32, i32, i32
  }
  func.func @transform_1(%arg0: i32) -> (i32, i32, i32) {
    %c0_i32 = arith.constant 0 : i32
    %c0_i32_0 = arith.constant 0 : i32
    %c0_i32_1 = arith.constant 0 : i32
    %c0_i32_2 = arith.constant 0 : i32
    return %c0_i32, %c0_i32_0, %c0_i32_1 : i32, i32, i32
  }
  func.func @transform_2(%arg0: i32) -> (i32, i32) {
    %c0_i32 = arith.constant 0 : i32
    %c0_i32_0 = arith.constant 0 : i32
    %c0_i32_1 = arith.constant 0 : i32
    return %c0_i32, %c0_i32_0 : i32, i32
  }
  func.func @transform_3(%arg0: i32) -> (i32, i32, i32) {
    %c0_i32 = arith.constant 0 : i32
    %c0_i32_0 = arith.constant 0 : i32
    %c0_i32_1 = arith.constant 0 : i32
    %c0_i32_2 = arith.constant 0 : i32
    return %c0_i32, %c0_i32_0, %c0_i32_1 : i32, i32, i32
  }
  func.func @transform_4(%arg0: i32) -> (i32, i32) {
    %c0_i32 = arith.constant 0 : i32
    %c0_i32_0 = arith.constant 0 : i32
    %c0_i32_1 = arith.constant 0 : i32
    return %c0_i32, %c0_i32_0 : i32, i32
  }
  func.func @transform_5(%arg0: i32) -> (i32, i32, i32) {
    %c0_i32 = arith.constant 0 : i32
    %c0_i32_0 = arith.constant 0 : i32
    %c0_i32_1 = arith.constant 0 : i32
    return %arg0, %c0_i32, %c0_i32_0 : i32, i32, i32
  }
  func.func @transform_6(%arg0: i32) -> (i32, i32, i32) {
    %c0_i32 = arith.constant 0 : i32
    %c0_i32_0 = arith.constant 0 : i32
    %c0_i32_1 = arith.constant 0 : i32
    return %arg0, %c0_i32, %c0_i32_0 : i32, i32, i32
  }
  func.func @transform_7(%arg0: i32) -> (i32, i32, i32) {
    %c0_i32 = arith.constant 0 : i32
    %c0_i32_0 = arith.constant 0 : i32
    %c0_i32_1 = arith.constant 0 : i32
    return %arg0, %c0_i32, %c0_i32_0 : i32, i32, i32
  }
}

</mosaic_0001>

<bundles_post_ra>
// kernel: encoder_forward.1
= control target key start
LH: loop header
LB: loop body
LE: loop exit
PB: predicated region body
PF: predicated region fallthrough
CT: control target
= control target key end

     0   :  { %13 = vsyncpa [#allocation5], 0  ;;  %s5916_s24 = smov 0   ;;  %s10473_s0 = inlined_call_operand.vmem [shape: f32[2,16,64], index: 0, kind: input, shape index: {}]   ;;  %s10474_s1 = inlined_call_operand.vmem [shape: f32[3,72,128], index: 1, kind: input, shape index: {}]   ;;  %s10475_s2 = inlined_call_operand.vmem [shape: f32[1,128], index: 2, kind: input, shape index: {}]   ;;  %s10476_s3 = inlined_call_operand.hbm [shape: f32[3,144,128], index: 3, kind: input, shape index: {}]   ;;  %s10477_s4 = inlined_call_operand.vmem [shape: f32[1,128], index: 4, kind: input, shape index: {}]   ;;  %s10478_s5 = inlined_call_operand.vmem [shape: f32[2,16,128], index: 5, kind: output, shape index: {0}]   ;;  %s10479_s6 = inlined_call_operand.vmem [shape: f32[2,8,64], index: 6, kind: output, shape index: {1}]   ;;  %s10480_s7 = inlined_call_operand.vmem [shape: s32[2,8,64], index: 7, kind: output, shape index: {2}]  }
   0x1 LB: > { %s5922_s25 = sadd.s32 4294967295, %s5848_s24   ;;  %p5577_p0 = scmp.ge.s32.totalorder %s5848_s24, 1  ;;  %s5848_s24 = sphi %s5916_s24, %s19_s24  }
   0x2   : > { %p212_p1 = scmp.lt.s32.totalorder %s5848_s24, 3  ;;  %s5850_s26 = smov [#allocation4]  }
   0x3   : > { %s230_s27 = sshll.u32 %s5850_s26, 4  ;;  %p5776_p3 = scmp.eq.s32.totalorder %s5922_s25, 0  ;;  %s231_s27 = int_to_ptr.vmem [resolvable:$true] %s230_s27 }
   0x4   : > { %p5926_p2 = pnand %p5577_p0, %p212_p1  ;;  %s5823_s29 = scalar_lea.vmem %s231_s27, 6912 }
   0x5   : > { %p5824_p7 = scmp.ne.s32.totalorder %s231_s27, %s5823_s29  ;;  %p5831_p10 = scmp.lt.s32.totalorder %s231_s27, %s231_s27 }
   0x6   : > { %p5772_p4 = pneg %p5926_p2  ;;  %p5832_p11 = scmp.lt.s32.totalorder %s5823_s29, %s5823_s29 }
   0x8   : > { %p5773_p5 = pnand %p5776_p3, %p5772_p4  ;;  %p5833_p12 = por %p5832_p11, %p5831_p10 }
   0xa   : > { %p5814_p6 = pneg %p5773_p5 }
   0xc   : > { %p5826_p8 = pnand %p5824_p7, %p5814_p6 }
   0xe   : > { %p5827_p9 = pneg %p5826_p8 }
  0x10   : > { %p5834_p13 = pnand %p5833_p12, %p5827_p9 }
  0x12   : > { %5837 = shalt.err (!%p5834_p13)
}
  0x13   : > { %s5851_s30 = smov 128   ;;  %s5852_s8 = smov 8  }
  0x14   : > { %5775 = dma.hbm_to_vmem [thread:$0]  (!%p5773_p5), %s10476_s3, 6912, %s231_s27, [#allocation5], %s5851_s30, %s5851_s30, %s5852_s8  }
  0x15   : > { %257 = sbr.rel (%p5926_p2) target bundleno = 1572 (0x624), region = 40 }
  0x1a   : > { %5843 = dma.done.wait (%p5776_p3), [#allocation5], 6912  }
  0x1b   : > { %5845 = vsyncadd (%p5776_p3), [#allocation5], 4294960384  ;;  %p297_p0 = scmp.lt.s32.totalorder %s5922_s25, 1  ;;  %vm317_vm0 = vcmask 588800   ;;  %v5853_v0 = vmov 0.0   ;;  %vm320_vm1 = vcmask 582656  }
  0x1c   : > { %318 = vst.msk [vmem:[#allocation2] sm:$0xff] %vm317_vm0, %v5853_v0  ;;  %319 = vst.msk [vmem:[#allocation2 + $0x8] sm:$0xff] %vm317_vm0, %v5853_v0  ;;  %v5596_v2 = vld [vmem:[%s10474_s1 + $0x88] sm:$0xff]  ;;  %s5854_s17 = smov 4   ;;  %v343_v3 = vld [vmem:[%s10474_s1 + $0x40] sm:$0xff]  ;;  %vm330_vm2 = vcmask 556064  }
  0x1d   : > { %624 = vst [vmem:[#allocation3] sm:$0xff] %v5853_v0  ;;  %627 = vst [vmem:[#allocation3 + $0x10] sm:$0xff] %v5853_v0  ;;  %s12398_s25 = smov (!%p297_p0, %s5922_s25), 1  ;;  %5705 = vmatprep.subr.mxu0 %v5596_v2  ;;  %v5595_v4 = vld [vmem:[%s10474_s1 + $0x80] sm:$0xff]  ;;  %v342_v5 = vld [vmem:[%s10474_s1 + $0x38] sm:$0xff]  ;;  %5726 = vmatprep.subr.mxu1 %v343_v3  ;;  %vm630_vm3 = vcmask 123904  }
  0x1e   : > { %629 = vst [vmem:[#allocation3 + $0x20] sm:$0x3] %v5853_v0  ;;  %321 = vst.msk [vmem:[#allocation2 + $0x10] sm:$0x3] %vm320_vm1, %v5853_v0  ;;  %s5670_s11 = sshll.u32 %s12398_s25, 4  ;;  %5706 = vmatpush3.msra.mxu0 %v5596_v2  ;;  %v5594_v7 = vld [vmem:[%s10474_s1 + $0x78] sm:$0xff]  ;;  %5727 = vmatpush3.msra.mxu1 %v343_v3 }
  0x1f   : > { %s301_s14 = scalar_lea.vmem %s10473_s0, %s5670_s11  ;;  %5707 = vmatprep.subr.mxu0 %v5595_v4  ;;  %5728 = vmatprep.subr.mxu1 %v342_v5  ;;  %v341_v8 = vld [vmem:[%s10474_s1 + $0x30] sm:$0xff]  ;;  %v340_v10 = vld [vmem:[%s10474_s1 + $0x28] sm:$0xff]  ;;  %v339_v12 = vld [vmem:[%s10474_s1 + $0x20] sm:$0xff]  ;;  %631 = vst.msk [vmem:[#allocation3 + $0x28] sm:$0x3] %vm630_vm3, %v5853_v0  ;;  %vm10556_vm4 = vcmask 130048  }
  0x20   : > { %v315_v1 = vld [vmem:[%s301_s14] sm:$0xff]  ;;  %v316_v6 = vld [vmem:[%s301_s14 + $0x8] sm:$0xff]  ;;  %5708 = vmatpush3.msra.mxu0 %v5595_v4  ;;  %v5593_v9 = vld [vmem:[%s10474_s1 + $0x70] sm:$0xff]  ;;  %5729 = vmatpush3.msra.mxu1 %v342_v5  ;;  %626 = vst.msk [vmem:[#allocation3 + $0x8] sm:$0xff] %vm10556_vm4, %v5853_v0  ;;  %s5855_s12 = smov 8   ;;  %vm634_vm5 = vcmask 1040384  }
  0x21   : > { %324 = vrot.lane.b32.xlu0 %v315_v1, %s5854_s17  ;;  %5709 = vmatprep.subr.mxu0 %v5594_v7  ;;  %v5592_v11 = vld [vmem:[%s10474_s1 + $0x68] sm:$0xff]  ;;  %v5591_v13 = vld [vmem:[%s10474_s1 + $0x60] sm:$0xff]  ;;  %v338_v14 = vld [vmem:[%s10474_s1 + $0x18] sm:$0xff]  ;;  %628 = vst.msk [vmem:[#allocation3 + $0x18] sm:$0xff] %vm10556_vm4, %v5853_v0  ;;  %vm655_vm6 = vcmask 1040448   ;;  %vm657_vm7 = vcmask 57344  }
  0x22   : > { %5710 = vmatpush3.msra.mxu0 %v5594_v7  ;;  %5730 = vmatprep.subr.mxu1 %v341_v8  ;;  %v5590_v15 = vld [vmem:[%s10474_s1 + $0x58] sm:$0xff]  ;;  %v337_v16 = vld [vmem:[%s10474_s1 + $0x10] sm:$0xff]  ;;  %v336_v18 = vld [vmem:[%s10474_s1 + $0x8] sm:$0xff]  ;;  %vm647_vm8 = vcmask 1047617   ;;  %vm649_vm9 = vcmask 64513   ;;  %vm651_vm10 = vcmask 1047616  }
  0x23   : > { %5711 = vmatprep.subr.mxu0 %v5593_v9  ;;  %5731 = vmatpush3.msra.mxu1 %v341_v8  ;;  %v5589_v17 = vld [vmem:[%s10474_s1 + $0x50] sm:$0xff]  ;;  %v5588_v19 = vld [vmem:[%s10474_s1 + $0x48] sm:$0xff]  ;;  %v335_v20 = vld [vmem:[%s10474_s1] sm:$0xff]  ;;  %vm10559_vm11 = vcmask 64512   ;;  %vm710_vm12 = vcmask 1046528   ;;  %vm909_vm13 = vcmask 1045504  }
  0x24   : > { %5712 = vmatpush3.msra.mxu0 %v5593_v9  ;;  %5732 = vmatprep.subr.mxu1 %v340_v10  ;;  %v5609_v21 = vld [vmem:[%s10474_s1 + $0xd0] sm:$0xff]  ;;  %v5608_v26 = vld [vmem:[%s10474_s1 + $0xc8] sm:$0xff]  ;;  %v5607_v30 = vld [vmem:[%s10474_s1 + $0xc0] sm:$0xff]  ;;  %s5856_s18 = smov 120   ;;  %s5857_s19 = smov 112  }
  0x25   : > { %326 = vrot.lane.b32.xlu0 %v316_v6, %s5854_s17  ;;  %5713 = vmatprep.subr.mxu0 %v5592_v11  ;;  %v5606_v31 = vld [vmem:[%s10474_s1 + $0xb8] sm:$0xff]  ;;  %v5605_v32 = vld [vmem:[%s10474_s1 + $0xb0] sm:$0xff]  ;;  %v5604_v33 = vld [vmem:[%s10474_s1 + $0xa8] sm:$0xff]  ;;  %s306_s17 = scalar_lea.vmem %s10478_s5, %s5670_s11  ;;  %s5858_s11 = smov 104  }
  0x26   : > { %5733 = vmatpush3.msra.mxu1 %v340_v10  ;;  %5714 = vmatpush3.msra.mxu0 %v5592_v11  ;;  %v5603_v34 = vld [vmem:[%s10474_s1 + $0xa0] sm:$0xff]  ;;  %v5602_v35 = vld [vmem:[%s10474_s1 + $0x98] sm:$0xff]  ;;  %v5601_v36 = vld [vmem:[%s10474_s1 + $0x90] sm:$0xff]  ;;  %s5859_s20 = smov 96   ;;  %s5860_s21 = smov 88  }
  0x27   : > { %5734 = vmatprep.subr.mxu1 %v339_v12  ;;  %5715 = vmatprep.subr.mxu0 %v5591_v13  ;;  %v678_v38 = vld [vmem:[#allocation4 + $0x78] sm:$0xff]  ;;  %v677_v39 = vld [vmem:[#allocation4 + $0x70] sm:$0xff]  ;;  %v701_v40 = vld [vmem:[#allocation4 + $0x108] sm:$0xff]  ;;  %s5861_s22 = smov 80   ;;  %s5862_s23 = smov 72  }
  0x28   : > { %5735 = vmatpush3.msra.mxu1 %v339_v12  ;;  %5716 = vmatpush3.msra.mxu0 %v5591_v13  ;;  %v700_v41 = vld [vmem:[#allocation4 + $0x100] sm:$0xff]  ;;  %v676_v42 = vld [vmem:[#allocation4 + $0x68] sm:$0xff]  ;;  %v699_v43 = vld [vmem:[#allocation4 + $0xf8] sm:$0xff]  ;;  %s5863_s26 = smov 64   ;;  %s5864_s27 = smov 56  }
  0x29   : > { %5736 = vmatprep.subr.mxu1 %v338_v14  ;;  %5717 = vmatprep.subr.mxu0 %v5590_v15  ;;  %v675_v44 = vld [vmem:[#allocation4 + $0x60] sm:$0xff]  ;;  %v698_v45 = vld [vmem:[#allocation4 + $0xf0] sm:$0xff]  ;;  %v674_v46 = vld [vmem:[#allocation4 + $0x58] sm:$0xff]  ;;  %s5865_s28 = smov 48   ;;  %s5866_s29 = smov 40  }
  0x2a   : > { %5737 = vmatpush3.msra.mxu1 %v338_v14  ;;  %5718 = vmatpush3.msra.mxu0 %v5590_v15  ;;  %v697_v47 = vld [vmem:[#allocation4 + $0xe8] sm:$0xff]  ;;  %v673_v48 = vld [vmem:[#allocation4 + $0x50] sm:$0xff]  ;;  %v696_v49 = vld [vmem:[#allocation4 + $0xe0] sm:$0xff]  ;;  %s5867_s30 = smov 32   ;;  %s5868_s8 = smov 24  }
  0x2b   : > { %5738 = vmatprep.subr.mxu1 %v337_v16  ;;  %5719 = vmatprep.subr.mxu0 %v5589_v17  ;;  %v672_v50 = vld [vmem:[#allocation4 + $0x48] sm:$0xff]  ;;  %v695_v51 = vld [vmem:[#allocation4 + $0xd8] sm:$0xff]  ;;  %v671_v52 = vld [vmem:[#allocation4 + $0x40] sm:$0xff]  ;;  %s5869_s9 = smov 16   ;;  %s5586_s10 = sshll.u32 %s12398_s25, 3 }
  0x2c   : > { %5739 = vmatpush3.msra.mxu1 %v337_v16  ;;  %5720 = vmatpush3.msra.mxu0 %v5589_v17  ;;  %v694_v53 = vld [vmem:[#allocation4 + $0xd0] sm:$0xff]  ;;  %v670_v54 = vld [vmem:[#allocation4 + $0x38] sm:$0xff]  ;;  %v693_v55 = vld [vmem:[#allocation4 + $0xc8] sm:$0xff]  ;;  %s314_s14 = scalar_lea.vmem %s10480_s7, %s5586_s10  ;;  %s310_s16 = scalar_lea.vmem %s10479_s6, %s5586_s10 }
  0x2d   : > { %5740 = vmatprep.subr.mxu1 %v336_v18  ;;  %5721 = vmatprep.subr.mxu0 %v5588_v19  ;;  %v669_v56 = vld [vmem:[#allocation4 + $0x30] sm:$0xff]  ;;  %v668_v57 = vld [vmem:[#allocation4 + $0x28] sm:$0xff]  ;;  %v667_v58 = vld [vmem:[#allocation4 + $0x20] sm:$0xff] }
  0x2e   : > { %5741 = vmatpush3.msra.mxu1 %v336_v18  ;;  %5722 = vmatpush3.msra.mxu0 %v5588_v19  ;;  %v692_v61 = vld [vmem:[#allocation4 + $0xc0] sm:$0xff]  ;;  %v666_v62 = vld [vmem:[#allocation4 + $0x18] sm:$0xff]  ;;  %v665_v1 = vld [vmem:[#allocation4 + $0x10] sm:$0xff] }
  0x2f   : > { %5742 = vmatprep.subr.mxu1 %v335_v20  ;;  %5747 = vmatprep.subr.mxu0 %v5609_v21  ;;  %v691_v63 = vld [vmem:[#allocation4 + $0xb8] sm:$0xff]  ;;  %v690_v4 = vld [vmem:[#allocation4 + $0xb0] sm:$0xff]  ;;  %v664_v5 = vld [vmem:[#allocation4 + $0x8] sm:$0xff] }
  0x30   : > { %5743 = vmatpush3.msra.mxu1 %v335_v20  ;;  %v5612_v8 = vld [vmem:[%s10475_s2] ss:$0 sm:$0xff]  ;;  %v689_v11 = vld [vmem:[#allocation4 + $0xa8] sm:$0xff]  ;;  %v663_v12 = vld [vmem:[#allocation4] sm:$0xff] }
  0x31   : > { %727 = vmatprep.subr.mxu1 %v5853_v0  ;;  %v688_v14 = vld [vmem:[#allocation4 + $0xa0] sm:$0xff]  ;;  %v680_v15 = vld [vmem:[#allocation4 + $0x88] sm:$0xff]  ;;  %v687_v18 = vld [vmem:[#allocation4 + $0x98] sm:$0xff] }
  0x32   : > { %v679_v19 = vld [vmem:[#allocation4 + $0x80] sm:$0xff] }
  0x93   : > { %v325_v22 = vpop.permute.xlu0 %324 }
  0x94   : > { %331 = vst.msk [vmem:[#allocation2 + $0x1] sm:$0xff] %vm330_vm2, %v325_v22 }
  0x97   : > { %v327_v23 = vpop.permute.xlu0 %326 }
  0x98   : > { %332 = vst.msk [vmem:[#allocation2 + $0x9] sm:$0xff] %vm330_vm2, %v327_v23 }
  0x9b   : > { %v344_v24 = vld [vmem:[#allocation2 + $0x1] sm:$0xff] }
  0x9c   : > { %v333_v25 = vld [vmem:[#allocation2] sm:$0xff]  ;;  %5723 = vmatprep.mubr.msk.f32.mxu0 %vm317_vm0, %v344_v24  ;;  %v686_v24 = vld [vmem:[#allocation4 + $0x90] sm:$0xff] }
  0x9d   : > { %5744 = vmatprep.mubr.msk.f32.mxu1 %vm317_vm0, %v333_v25  ;;  %v703_v25 = vld [vmem:[#allocation4 + $0x118] sm:$0xff] }
  0x9f   : > { %v345_v27 = vld [vmem:[#allocation2 + $0x9] sm:$0xff] }
  0xa0   : > { %v334_v28 = vld [vmem:[#allocation2 + $0x8] sm:$0xff]  ;;  %5724 = vmatmul.mubr.msk.f32.vlgmr.msra.gmra.mxu0 %vm317_vm0, %v345_v27  ;;  %v702_v27 = vld [vmem:[#allocation4 + $0x110] sm:$0xff] }
  0xa1   : > { %v518_v29 = vld [vmem:[#allocation2 + $0x2] sm:$0xff]  ;;  %5745 = vmatmul.mubr.msk.f32.vlgmr.msra.gmra.mxu1 %vm317_vm0, %v334_v28  ;;  %5748 = vmatpush3.msra.mxu0 %v5609_v21  ;;  %v519_v37 = vld [vmem:[#allocation2 + $0xa] sm:$0xff] }
  0xa2   : > { %5765 = vmatprep.mubr.msk.f32.mxu0 %vm317_vm0, %v518_v29  ;;  %5749 = vmatprep.subr.mxu0 %v5608_v26 }
  0xa3   : > { %5750 = vmatpush3.msra.mxu0 %v5608_v26  ;;  %728 = vmatpush1.msra.mxu1 %v701_v40 }
  0xa4   : > { %5751 = vmatprep.subr.mxu0 %v5607_v30  ;;  %729 = vmatprep.subr.mxu1 %v5853_v0 }
  0xa5   : > { %5752 = vmatpush3.msra.mxu0 %v5607_v30  ;;  %730 = vmatpush1.msra.mxu1 %v700_v41 }
  0xa6   : > { %5753 = vmatprep.subr.mxu0 %v5606_v31  ;;  %731 = vmatprep.subr.mxu1 %v5853_v0 }
  0xa7   : > { %5754 = vmatpush3.msra.mxu0 %v5606_v31  ;;  %732 = vmatpush1.msra.mxu1 %v699_v43 }
  0xa8   : > { %5755 = vmatprep.subr.mxu0 %v5605_v32  ;;  %733 = vmatprep.subr.mxu1 %v5853_v0 }
  0xa9   : > { %5756 = vmatpush3.msra.mxu0 %v5605_v32  ;;  %734 = vmatpush1.msra.mxu1 %v698_v45  ;;  %v902_v45 = vld [vmem:[#allocation4 + $0x198] sm:$0xff] }
  0xaa   : > { %5757 = vmatprep.subr.mxu0 %v5604_v33  ;;  %735 = vmatprep.subr.mxu1 %v5853_v0 }
  0xab   : > { %5758 = vmatpush3.msra.mxu0 %v5604_v33  ;;  %736 = vmatpush1.msra.mxu1 %v697_v47 }
  0xac   : > { %5759 = vmatprep.subr.mxu0 %v5603_v34  ;;  %737 = vmatprep.subr.mxu1 %v5853_v0 }
  0xad   : > { %5760 = vmatpush3.msra.mxu0 %v5603_v34  ;;  %738 = vmatpush1.msra.mxu1 %v696_v49 }
  0xae   : > { %5761 = vmatprep.subr.mxu0 %v5602_v35  ;;  %739 = vmatprep.subr.mxu1 %v5853_v0 }
  0xaf   : > { %5762 = vmatpush3.msra.mxu0 %v5602_v35  ;;  %740 = vmatpush1.msra.mxu1 %v695_v51  ;;  %v901_v51 = vld [vmem:[#allocation4 + $0x190] sm:$0xff] }
  0xb0   : > { %5763 = vmatprep.subr.mxu0 %v5601_v36  ;;  %741 = vmatprep.subr.mxu1 %v5853_v0 }
  0xb1   : > { %5764 = vmatpush3.msra.mxu0 %v5601_v36  ;;  %742 = vmatpush1.msra.mxu1 %v694_v53  ;;  %v900_v53 = vld [vmem:[#allocation4 + $0x188] sm:$0xff] }
  0xb2   : > { %5766 = vmatmul.mubr.msk.f32.vlgmr.msra.gmra.mxu0 %vm317_vm0, %v519_v37  ;;  %807 = vmatprep.subr.mxu0 %v5853_v0 }
  0xb3   : > { %808 = vmatpush1.msra.mxu0 %v678_v38  ;;  %743 = vmatprep.subr.mxu1 %v5853_v0 }
  0xb4   : > { %809 = vmatprep.subr.mxu0 %v5853_v0  ;;  %744 = vmatpush1.msra.mxu1 %v693_v55 }
  0xb5   : > { %810 = vmatpush1.msra.mxu0 %v677_v39  ;;  %745 = vmatprep.subr.mxu1 %v5853_v0 }
  0xb6   : > { %811 = vmatprep.subr.mxu0 %v5853_v0  ;;  %746 = vmatpush1.msra.mxu1 %v692_v61  ;;  %v895_v61 = vld [vmem:[#allocation4 + $0x160] sm:$0xff] }
  0xb7   : > { %812 = vmatpush1.msra.mxu0 %v676_v42  ;;  %747 = vmatprep.subr.mxu1 %v5853_v0 }
  0xb8   : > { %813 = vmatprep.subr.mxu0 %v5853_v0  ;;  %748 = vmatpush1.msra.mxu1 %v691_v63  ;;  %v893_v63 = vld [vmem:[#allocation4 + $0x150] sm:$0xff] }
  0xb9   : > { %814 = vmatpush1.msra.mxu0 %v675_v44  ;;  %749 = vmatprep.subr.mxu1 %v5853_v0 }
  0xba   : > { %815 = vmatprep.subr.mxu0 %v5853_v0  ;;  %750 = vmatpush1.msra.mxu1 %v690_v4  ;;  %v889_v4 = vld [vmem:[#allocation4 + $0x130] sm:$0xff] }
  0xbb   : > { %816 = vmatpush1.msra.mxu0 %v674_v46  ;;  %751 = vmatprep.subr.mxu1 %v5853_v0 }
  0xbc   : > { %817 = vmatprep.subr.mxu0 %v5853_v0  ;;  %752 = vmatpush1.msra.mxu1 %v689_v11  ;;  %v903_v11 = vld [vmem:[#allocation4 + $0x1a0] sm:$0xff] }
  0xbd   : > { %818 = vmatpush1.msra.mxu0 %v673_v48  ;;  %753 = vmatprep.subr.mxu1 %v5853_v0 }
  0xbe   : > { %819 = vmatprep.subr.mxu0 %v5853_v0  ;;  %754 = vmatpush1.msra.mxu1 %v688_v14 }
  0xbf   : > { %820 = vmatpush1.msra.mxu0 %v672_v50  ;;  %755 = vmatprep.subr.mxu1 %v5853_v0 }
  0xc0   : > { %821 = vmatprep.subr.mxu0 %v5853_v0  ;;  %756 = vmatpush1.msra.mxu1 %v687_v18 }
  0xc1   : > { %822 = vmatpush1.msra.mxu0 %v671_v52  ;;  %757 = vmatprep.subr.mxu1 %v5853_v0 }
  0xc2   : > { %823 = vmatprep.subr.mxu0 %v5853_v0  ;;  %758 = vmatpush1.msra.mxu1 %v686_v24 }
  0xc3   : > { %824 = vmatpush1.msra.mxu0 %v670_v54  ;;  %787 = vmatprep.subr.mxu1 %v5853_v0 }
  0xc4   : > { %825 = vmatprep.subr.mxu0 %v5853_v0  ;;  %788 = vmatpush2.msra.mxu1 %v703_v25 }
  0xc5   : > { %826 = vmatpush1.msra.mxu0 %v669_v56  ;;  %789 = vmatprep.subr.mxu1 %v5853_v0 }
  0xc6   : > { %827 = vmatprep.subr.mxu0 %v5853_v0  ;;  %790 = vmatpush2.msra.mxu1 %v702_v27 }
  0xc7   : > { %828 = vmatpush1.msra.mxu0 %v668_v57  ;;  %926 = vmatprep.subr.mxu1 %v5853_v0  ;;  %v899_v57 = vld [vmem:[#allocation4 + $0x180] sm:$0xff] }
  0xc8   : > { %829 = vmatprep.subr.mxu0 %v5853_v0 }
  0xc9   : > { %830 = vmatpush1.msra.mxu0 %v667_v58  ;;  %v898_v58 = vld [vmem:[#allocation4 + $0x178] sm:$0xff] }
  0xca   : > { %831 = vmatprep.subr.mxu0 %v5853_v0 }
  0xcb   : > { %832 = vmatpush1.msra.mxu0 %v666_v62  ;;  %v894_v62 = vld [vmem:[#allocation4 + $0x158] sm:$0xff] }
  0xcc   : > { %833 = vmatprep.subr.mxu0 %v5853_v0 }
  0xcd   : > { %834 = vmatpush1.msra.mxu0 %v665_v1  ;;  %v892_v1 = vld [vmem:[#allocation4 + $0x148] sm:$0xff] }
  0xce   : > { %835 = vmatprep.subr.mxu0 %v5853_v0 }
  0xcf   : > { %836 = vmatpush1.msra.mxu0 %v664_v5  ;;  %v888_v5 = vld [vmem:[#allocation4 + $0x128] sm:$0xff] }
  0xd0   : > { %837 = vmatprep.subr.mxu0 %v5853_v0 }
  0xd1   : > { %838 = vmatpush1.msra.mxu0 %v663_v12 }
  0xd2   : > { %867 = vmatprep.subr.mxu0 %v5853_v0 }
  0xd3   : > { %868 = vmatpush2.msra.mxu0 %v680_v15 }
  0xd4   : > { %869 = vmatprep.subr.mxu0 %v5853_v0 }
  0xd5   : > { %870 = vmatpush2.msra.mxu0 %v679_v19 }
 0x160   : > { %v5725_v59 = vpop.f32.mrf.mxu0 }
 0x161   : > { %v5746_v60 = vpop.f32.mrf.mxu1 }
 0x162   : > { %v428_v2 = vpop.f32.mrf.mxu0  ;;  %v515_v6 = vadd.f32 %v5746_v60, %v5725_v59  ;;  %v897_v59 = vld [vmem:[#allocation4 + $0x170] sm:$0xff]  ;;  %v896_v60 = vld [vmem:[#allocation4 + $0x168] sm:$0xff] }
 0x163   : > { %v509_v3 = vpop.f32.mrf.mxu1 }
 0x164   : > { %v510_v9 = vadd.f32 %v509_v3, %v428_v2  ;;  %v891_v2 = vld [vmem:[#allocation4 + $0x140] sm:$0xff]  ;;  %v890_v3 = vld [vmem:[#allocation4 + $0x138] sm:$0xff] }
 0x172   : > { %v5767_v7 = vpop.f32.mrf.mxu0 }
 0x173   : > { %v612_v10 = vadd.f32 %v5767_v7, %v515_v6  ;;  %v887_v6 = vld [vmem:[#allocation4 + $0x120] sm:$0xff]  ;;  %v904_v7 = vld [vmem:[#allocation4 + $0x1a8] sm:$0xff] }
 0x174   : > { %v602_v13 = vpop.f32.mrf.mxu0 }
 0x175   : > { %v621_v16 = vadd.f32 %v5612_v8, %v612_v10  ;;  %v611_v17 = vadd.f32 %v602_v13, %v510_v9 }
 0x177   : > { %v623_v20 = vmax.f32 %v621_v16, 0.0  ;;  %v620_v21 = vadd.f32 %v5612_v8, %v611_v17 }
 0x179   : > { %v636_v22 = vrot.slane %v623_v20, 7  ;;  %v622_v23 = vmax.f32 %v620_v21, 0.0 }
 0x17b   : > { %642 = vrot.lane.b32.xlu0 %v636_v22, %s5855_s12  ;;  %v635_v26 = vrot.slane %v622_v23, 7 }
 0x17d   : > { %638 = vrot.lane.b32.xlu1 %v635_v26, %s5855_s12  ;;  %v637_v28 = vsel %vm634_vm5, %v635_v26, %v636_v22 }
 0x181   : > { %640 = vrot.lane.b32.xlu1 %v637_v28, %s5855_s12  ;;  %v5619_v28 = vld [vmem:[%s10477_s4] ss:$0 sm:$0xff] }
 0x1ed   : > { %v643_v29 = vpop.permute.xlu0 %642 }
 0x1ee   : > { %656 = vst.msk [vmem:[#allocation3 + $0x20] sm:$0x1] %vm655_vm6, %v643_v29 }
 0x1ef   : > { %658 = vst.msk [vmem:[#allocation3 + $0x28] sm:$0x1] %vm657_vm7, %v643_v29  ;;  %v639_v30 = vpop.permute.xlu1 %638 }
 0x1f0   : > { %648 = vst.msk [vmem:[#allocation3] sm:$0xfe] %vm647_vm8, %v639_v30 }
 0x1f1   : > { %650 = vst.msk [vmem:[#allocation3 + $0x8] sm:$0xfe] %vm649_vm9, %v639_v30 }
 0x1f3   : > { %v641_v31 = vpop.permute.xlu1 %640 }
 0x1f4   : > { %652 = vst.msk [vmem:[#allocation3 + $0x10] sm:$0xff] %vm651_vm10, %v641_v31 }
 0x1f5   : > { %654 = vst.msk [vmem:[#allocation3 + $0x18] sm:$0xff] %vm10559_vm11, %v641_v31  ;;  %v683_v47 = vld [vmem:[#allocation3 + $0x20] sm:$0x1] }
 0x1f6   : > { %v684_v38 = vld [vmem:[#allocation3 + $0x28] sm:$0x1]  ;;  %v717_v52 = vrot.slane %v683_v47, 1  ;;  %v884_v14 = vld [vmem:[#allocation3 + $0x20] sm:$0x3] }
 0x1f7   : > { %v659_v33 = vld [vmem:[#allocation3] sm:$0xff]  ;;  %v719_v46 = vrot.slane %v684_v38, 1  ;;  %v885_v10 = vld [vmem:[#allocation3 + $0x28] sm:$0x3]  ;;  %v916_v17 = vrot.slane %v884_v14, 2 }
 0x1f8   : > { %v660_v32 = vld [vmem:[#allocation3 + $0x8] sm:$0xff]  ;;  %v681_v35 = vld [vmem:[#allocation3] sm:$0xfe]  ;;  %v918_v13 = vrot.slane %v885_v10, 2 }
 0x1f9   : > { %5615 = vmatprep.mubr.msk.f32.mxu0 %vm10556_vm4, %v660_v32  ;;  %v682_v34 = vld [vmem:[#allocation3 + $0x8] sm:$0xfe]  ;;  %v711_v42 = vrot.slane %v681_v35, 1  ;;  %v882_v8 = vld [vmem:[#allocation3] sm:$0xfc] }
 0x1fa   : > { %872 = vmatmul.mubr.f32.vlgmr.msra.gmra.mxu0 %v659_v33  ;;  %v714_v41 = vrot.slane %v682_v34, 1  ;;  %v883_v48 = vld [vmem:[#allocation3 + $0x8] sm:$0xfc]  ;;  %v910_v12 = vrot.slane %v882_v8, 2 }
 0x1fb   : > { %v6101_v37 = vld [vmem:[#allocation3 + $0x10] sm:$0xff]  ;;  %v913_v54 = vrot.slane %v883_v48, 2  ;;  %v5873_v48 = vmov 842150450  }
 0x1fc   : > { %v6099_v36 = vld [vmem:[#allocation3 + $0x18] sm:$0xff]  ;;  %v712_v40 = vrot.slane %v6101_v37, 1  ;;  %v911_v9 = vrot.slane %v6101_v37, 2 }
 0x1fd   : > { %v715_v39 = vrot.slane %v6099_v36, 1  ;;  %5616 = vmatprep.mubr.msk.f32.mxu0 %vm10556_vm4, %v6099_v36  ;;  %v914_v49 = vrot.slane %v6099_v36, 2 }
 0x1fe   : > { %877 = vmatmul.mubr.f32.gmra.mxu0 %v6101_v37  ;;  %v713_v44 = vsel %vm710_vm12, %v711_v42, %v712_v40  ;;  %v718_v55 = vsel %vm710_vm12, %v712_v40, %v717_v52  ;;  %v912_v15 = vsel %vm909_vm13, %v910_v12, %v911_v9  ;;  %v917_v18 = vsel %vm909_vm13, %v911_v9, %v916_v17 }
 0x1ff   : > { %v716_v43 = vsel %vm710_vm12, %v714_v41, %v715_v39  ;;  %v720_v50 = vsel %vm710_vm12, %v715_v39, %v719_v46  ;;  %v915_v56 = vsel %vm909_vm13, %v913_v54, %v914_v49  ;;  %v919_v16 = vsel %vm909_vm13, %v914_v49, %v918_v13 }
 0x200   : > { %5613 = vmatprep.mubr.msk.f32.mxu1 %vm10556_vm4, %v716_v43  ;;  %v1113_v39 = vlaneseq  ;;  %v5870_v41 = vmov 1983009808   ;;  %v5871_v43 = vmov 1934713408   ;;  %v5872_v46 = vmov 269488144  }
 0x201   : > { %792 = vmatmul.mubr.f32.vlgmr.msra.gmra.mxu1 %v713_v44  ;;  %v1111_v42 = vunpack.c.l.s4 %v5870_v41  ;;  %v1175_v44 = vunpack.c.l.s4 %v5871_v43  ;;  %v2279_v47 = vunpack.c.l.s4 %v5872_v46  ;;  %v2286_v49 = vunpack.c.l.s4 %v5873_v48 }
 0x202   : > { %927 = vmatpush1.msra.mxu1 %v902_v45  ;;  %5614 = vmatprep.mubr.msk.f32.mxu1 %vm10556_vm4, %v720_v50  ;;  %v6201_v40 = vshrl.u32 %v1113_v39, 7 }
 0x203   : > { %928 = vmatprep.subr.mxu1 %v5853_v0  ;;  %v1112_v50 = vunpack.c.0.s8 %v1111_v42 }
 0x204   : > { %929 = vmatpush1.msra.mxu1 %v901_v51  ;;  %v6204_v45 = vmul.u32 2, %v6201_v40  ;;  %v1176_v51 = vunpack.c.0.s8 %v1175_v44  ;;  %v5874_v44 = vmov 1414812756  }
 0x205   : > { %930 = vmatprep.subr.mxu1 %v5853_v0  ;;  %797 = vmatmul.mubr.f32.gmra.mxu1 %v718_v55  ;;  %v2280_v55 = vunpack.c.0.s8 %v2279_v47  ;;  %v2293_v46 = vunpack.c.l.s4 %v5874_v44  ;;  %v5875_v47 = vmov 1987475062  }
 0x206   : > { %931 = vmatpush1.msra.mxu1 %v900_v53  ;;  %5617 = vmatprep.mubr.msk.f32.mxu1 %vm10556_vm4, %v915_v56  ;;  %10949 = vst [vmem:[#allocation7_spill] sm:$0xff] %v6204_v45  ;;  %v6207_v52 = vadd.s32 32, %v6204_v45  ;;  %v6210_v53 = vadd.s32 64, %v6204_v45  ;;  %v6213_v54 = vadd.s32 96, %v6204_v45  ;;  %v2287_v56 = vunpack.c.0.s8 %v2286_v49 }
 0x207   : > { %932 = vmatprep.subr.mxu1 %v5853_v0  ;;  %v2300_v48 = vunpack.c.l.s4 %v5875_v47 }
 0x208   : > { %933 = vmatpush1.msra.mxu1 %v899_v57  ;;  %10950 = vst [vmem:[#allocation8_spill] sm:$0xff] %v6207_v52  ;;  %10951 = vst [vmem:[#allocation9_spill] sm:$0xff] %v6210_v53 }
 0x209   : > { %934 = vmatprep.subr.mxu1 %v5853_v0  ;;  %10952 = vst [vmem:[#allocation10_spill] sm:$0xff] %v6213_v54 }
 0x20a   : > { %935 = vmatpush1.msra.mxu1 %v898_v58  ;;  %v6216_v58 = vadd.s32 1, %v6204_v45 }
 0x20b   : > { %936 = vmatprep.subr.mxu1 %v5853_v0 }
 0x20c   : > { %937 = vmatpush1.msra.mxu1 %v897_v59  ;;  %10953 = vst [vmem:[#allocation11_spill] sm:$0xff] %v6216_v58  ;;  %v6219_v59 = vadd.s32 1, %v6207_v52 }
 0x20d   : > { %938 = vmatprep.subr.mxu1 %v5853_v0 }
 0x20e   : > { %939 = vmatpush1.msra.mxu1 %v896_v60  ;;  %10954 = vst [vmem:[#allocation12_spill] sm:$0xff] %v6219_v59  ;;  %v6222_v60 = vadd.s32 1, %v6210_v53 }
 0x20f   : > { %940 = vmatprep.subr.mxu1 %v5853_v0 }
 0x210   : > { %941 = vmatpush1.msra.mxu1 %v895_v61  ;;  %10955 = vst [vmem:[#allocation13_spill] sm:$0xff] %v6222_v60  ;;  %v6225_v61 = vadd.s32 1, %v6213_v54 }
 0x211   : > { %942 = vmatprep.subr.mxu1 %v5853_v0 }
 0x212   : > { %943 = vmatpush1.msra.mxu1 %v894_v62  ;;  %10956 = vst [vmem:[#allocation14_spill] sm:$0xff] %v6225_v61  ;;  %v6228_v62 = vsub.s32 %v1112_v50, %v6201_v40 }
 0x213   : > { %944 = vmatprep.subr.mxu1 %v5853_v0 }
 0x214   : > { %945 = vmatpush1.msra.mxu1 %v893_v63  ;;  %10957 = vst [vmem:[#allocation15_spill] sm:$0xff] %v6228_v62  ;;  %v6231_v63 = vsub.s32 %v1176_v51, %v6201_v40 }
 0x215   : > { %946 = vmatprep.subr.mxu1 %v5853_v0 }
 0x216   : > { %947 = vmatpush1.msra.mxu1 %v892_v1  ;;  %10958 = vst [vmem:[#allocation16_spill] sm:$0xff] %v6231_v63  ;;  %v6234_v1 = vadd.s32 128, %v6204_v45 }
 0x217   : > { %948 = vmatprep.subr.mxu1 %v5853_v0 }
 0x218   : > { %949 = vmatpush1.msra.mxu1 %v891_v2  ;;  %10959 = vst [vmem:[#allocation17_spill] sm:$0xff] %v6234_v1  ;;  %v6237_v2 = vsub.s32 %v2280_v55, %v6201_v40 }
 0x219   : > { %950 = vmatprep.subr.mxu1 %v5853_v0 }
 0x21a   : > { %951 = vmatpush1.msra.mxu1 %v890_v3  ;;  %10960 = vst [vmem:[#allocation18_spill] sm:$0xff] %v6237_v2  ;;  %v6240_v3 = vadd.s32 160, %v6204_v45  ;;  %v6253_v9 = vrot.slane %v6216_v58, %v6237_v2  ;;  %v6257_v10 = vrot.slane %v6219_v59, %v6237_v2  ;;  %v6265_v12 = vrot.slane %v6225_v61, %v6237_v2 }
 0x21b   : > { %952 = vmatprep.subr.mxu1 %v5853_v0  ;;  %v6343_v44 = vrot.slane %v6210_v53, %v6237_v2 }
 0x21c   : > { %953 = vmatpush1.msra.mxu1 %v889_v4  ;;  %10961 = vst [vmem:[#allocation19_spill] sm:$0xff] %v6240_v3  ;;  %v6243_v4 = vadd.s32 192, %v6204_v45  ;;  %10965 = vst [vmem:[#allocation23_spill] sm:$0xff] %v6253_v9 }
 0x21d   : > { %954 = vmatprep.subr.mxu1 %v5853_v0  ;;  %10966 = vst [vmem:[#allocation24_spill] sm:$0xff] %v6257_v10  ;;  %10968 = vst [vmem:[#allocation26_spill] sm:$0xff] %v6265_v12 }
 0x21e   : > { %955 = vmatpush1.msra.mxu1 %v888_v5  ;;  %10962 = vst [vmem:[#allocation20_spill] sm:$0xff] %v6243_v4  ;;  %v6246_v5 = vadd.s32 224, %v6204_v45  ;;  %v6276_v17 = vadd.s32 1, %v6243_v4  ;;  %10981 = vst [vmem:[#allocation39_spill] sm:$0xff] %v6343_v44 }
 0x21f   : > { %956 = vmatprep.subr.mxu1 %v5853_v0 }
 0x220   : > { %957 = vmatpush1.msra.mxu1 %v887_v6  ;;  %10963 = vst [vmem:[#allocation21_spill] sm:$0xff] %v6246_v5  ;;  %v6249_v6 = vsub.s32 %v2287_v56, %v6201_v40  ;;  %10971 = vst [vmem:[#allocation29_spill] sm:$0xff] %v6276_v17 }
 0x221   : > { %986 = vmatprep.subr.mxu1 %v5853_v0 }
 0x222   : > { %987 = vmatpush2.msra.mxu1 %v904_v7  ;;  %10964 = vst [vmem:[#allocation22_spill] sm:$0xff] %v6249_v6 }
 0x223   : > { %988 = vmatprep.subr.mxu1 %v5853_v0 }
 0x224   : > { %989 = vmatpush2.msra.mxu1 %v903_v11  ;;  %v6261_v11 = vrot.slane %v6222_v60, %v6237_v2 }
 0x225   : > { %991 = vmatmul.mubr.f32.vlgmr.msra.gmra.mxu1 %v912_v15  ;;  %v6270_v15 = vadd.s32 1, %v6234_v1 }
 0x226   : > { %5618 = vmatprep.mubr.msk.f32.mxu1 %vm10556_vm4, %v919_v16  ;;  %10967 = vst [vmem:[#allocation25_spill] sm:$0xff] %v6261_v11  ;;  %v6273_v16 = vadd.s32 1, %v6240_v3 }
 0x227   : > { %10969 = vst [vmem:[#allocation27_spill] sm:$0xff] %v6270_v15 }
 0x228   : > { %10970 = vst [vmem:[#allocation28_spill] sm:$0xff] %v6273_v16 }
 0x229   : > { %996 = vmatmul.mubr.f32.gmra.mxu1 %v917_v18  ;;  %v6279_v18 = vadd.s32 1, %v6246_v5 }
 0x22b   : > { %10972 = vst [vmem:[#allocation30_spill] sm:$0xff] %v6279_v18 }
 0x2ba   : > { %v873_v19 = vpop.f32.mrf.mxu0 }
 0x2bc   : > { %v875_v20 = vpop.f32.mrf.mxu0 }
 0x2be   : > { %v878_v0 = vpop.f32.mrf.mxu0 }
 0x2c0   : > { %v880_v21 = vpop.f32.mrf.mxu0 }
 0x2c1   : > { %v793_v22 = vpop.f32.mrf.mxu1 }
 0x2c2   : > { %v874_v26 = vadd.f32 %v873_v19, %v793_v22  ;;  %v6287_v22 = vrot.slane %v6270_v15, %v6237_v2  ;;  %v6403_v19 = vadd.s32 16, %v6240_v3 }
 0x2c3   : > { %v795_v23 = vpop.f32.mrf.mxu1 }
 0x2c4   : > { %10973 = vst [vmem:[#allocation31_spill] sm:$0xff] %v6287_v22  ;;  %v6291_v23 = vrot.slane %v6273_v16, %v6237_v2  ;;  %10992 = vst [vmem:[#allocation50_spill] sm:$0xff] %v6403_v19  ;;  %v11179_v22 = vmov 0 }
 0x2c5   : > { %v798_v24 = vpop.f32.mrf.mxu1 }
 0x2c6   : > { %v879_v31 = vadd.f32 %v878_v0, %v798_v24  ;;  %10974 = vst [vmem:[#allocation32_spill] sm:$0xff] %v6291_v23  ;;  %v11099_v23 = vmov 0 }
 0x2c7   : > { %v800_v25 = vpop.f32.mrf.mxu1 }
 0x2e5   : > { %v992_v27 = vpop.f32.mrf.mxu1 }
 0x2e6   : > { %v1001_v29 = vadd.f32 %v992_v27, %v874_v26  ;;  %v6295_v26 = vrot.slane %v6276_v17, %v6237_v2  ;;  %v6299_v27 = vrot.slane %v6279_v18, %v6237_v2 }
 0x2e7   : > { %v994_v30 = vpop.f32.mrf.mxu1 }
 0x2e8   : > { %v1010_v32 = vadd.f32 %v5619_v28, %v1001_v29  ;;  %10975 = vst [vmem:[#allocation33_spill] sm:$0xff] %v6295_v26  ;;  %10976 = vst [vmem:[#allocation34_spill] sm:$0xff] %v6299_v27  ;;  %v11066_v27 = vmov 0 }
 0x2e9   : > { %v997_v33 = vpop.f32.mrf.mxu1 }
 0x2ea   : > { %v6151_v34 = vmax.f32 %v1010_v32, 0.0  ;;  %v1002_v35 = vadd.f32 %v997_v33, %v879_v31 }
 0x2eb   : > { %v999_v36 = vpop.f32.mrf.mxu1 }
 0x2ec   : > { %1014 = vst [vmem:[%s306_s17] sm:$0xff] %v6151_v34  ;;  %v1011_v37 = vadd.f32 %v5619_v28, %v1002_v35  ;;  %1018 = vrot.lane.b32.xlu1 %v6151_v34, %s5856_s18  ;;  %v6388_v35 = vadd.s32 16, %v6204_v45 }
 0x2ee   : > { %v6155_v38 = vmax.f32 %v1011_v37, 0.0  ;;  %10987 = vst [vmem:[#allocation45_spill] sm:$0xff] %v6388_v35 }
 0x2f0   : > { %1015 = vst [vmem:[%s306_s17 + $0x8] sm:$0xff] %v6155_v38  ;;  %1024 = vrot.lane.b32.xlu1 %v6151_v34, %s5857_s19  ;;  %1020 = vrot.lane.b32.xlu0 %v6155_v38, %s5856_s18 }
 0x2f4   : > { %1030 = vrot.lane.b32.xlu1 %v6151_v34, %s5858_s11  ;;  %1026 = vrot.lane.b32.xlu0 %v6155_v38, %s5857_s19 }
 0x2f8   : > { %1036 = vrot.lane.b32.xlu1 %v6151_v34, %s5859_s20  ;;  %1032 = vrot.lane.b32.xlu0 %v6155_v38, %s5858_s11 }
 0x2fc   : > { %1042 = vrot.lane.b32.xlu1 %v6151_v34, %s5860_s21  ;;  %1038 = vrot.lane.b32.xlu0 %v6155_v38, %s5859_s20 }
 0x300   : > { %1048 = vrot.lane.b32.xlu1 %v6151_v34, %s5861_s22  ;;  %1044 = vrot.lane.b32.xlu0 %v6155_v38, %s5860_s21 }
 0x304   : > { %1054 = vrot.lane.b32.xlu1 %v6151_v34, %s5862_s23  ;;  %1050 = vrot.lane.b32.xlu0 %v6155_v38, %s5861_s22 }
 0x308   : > { %1060 = vrot.lane.b32.xlu1 %v6151_v34, %s5863_s26  ;;  %1056 = vrot.lane.b32.xlu0 %v6155_v38, %s5862_s23 }
 0x30c   : > { %1066 = vrot.lane.b32.xlu1 %v6151_v34, %s5864_s27  ;;  %1062 = vrot.lane.b32.xlu0 %v6155_v38, %s5863_s26 }
 0x310   : > { %1072 = vrot.lane.b32.xlu1 %v6151_v34, %s5865_s28  ;;  %1068 = vrot.lane.b32.xlu0 %v6155_v38, %s5864_s27 }
 0x314   : > { %1078 = vrot.lane.b32.xlu1 %v6151_v34, %s5866_s29  ;;  %1074 = vrot.lane.b32.xlu0 %v6155_v38, %s5865_s28 }
 0x318   : > { %1084 = vrot.lane.b32.xlu1 %v6151_v34, %s5867_s30  ;;  %1080 = vrot.lane.b32.xlu0 %v6155_v38, %s5866_s29 }
 0x31c   : > { %1090 = vrot.lane.b32.xlu1 %v6151_v34, %s5868_s8  ;;  %1086 = vrot.lane.b32.xlu0 %v6155_v38, %s5867_s30 }
 0x320   : > { %1096 = vrot.lane.b32.xlu1 %v6151_v34, %s5869_s9  ;;  %1092 = vrot.lane.b32.xlu0 %v6155_v38, %s5868_s8 }
 0x324   : > { %1102 = vrot.lane.b32.xlu1 %v6151_v34, %s5855_s12  ;;  %1098 = vrot.lane.b32.xlu0 %v6155_v38, %s5869_s9 }
 0x328   : > { %1104 = vrot.lane.b32.xlu0 %v6155_v38, %s5855_s12 }
 0x35e   : > { %v1019_v57 = vpop.permute.xlu1 %1018 }
 0x362   : > { %v1025_v7 = vpop.permute.xlu1 %1024  ;;  %v1021_v8 = vpop.permute.xlu0 %1020 }
 0x363   : > { %v1108_v13 = vcombine.low %v6151_v34, %v1025_v7  ;;  %v1109_v14 = vcombine.high %v6151_v34, %v1025_v7 }
 0x365   : > { %v1116_v0 = vrot.slane %v1108_v13, %v6228_v62  ;;  %v1123_v21 = vrot.slane %v1109_v14, %v6228_v62  ;;  %v2294_v13 = vunpack.c.0.s8 %v2293_v46  ;;  %v2301_v14 = vunpack.c.0.s8 %v2300_v48 }
 0x366   : > { %v1031_v24 = vpop.permute.xlu1 %1030  ;;  %v1027_v25 = vpop.permute.xlu0 %1026  ;;  %v6347_v46 = vrot.slane %v6213_v54, %v6237_v2 }
 0x367   : > { %v1124_v30 = vcombine.low %v1019_v57, %v1031_v24  ;;  %v1125_v31 = vcombine.high %v1019_v57, %v1031_v24  ;;  %v1380_v32 = vcombine.low %v6155_v38, %v1027_v25  ;;  %v1381_v33 = vcombine.high %v6155_v38, %v1027_v25 }
 0x368   : > { %10982 = vst [vmem:[#allocation40_spill] sm:$0xff] %v6347_v46  ;;  %v6406_v38 = vadd.s32 16, %v6243_v4 }
 0x369   : > { %v1132_v36 = vrot.slane %v1124_v30, %v6228_v62  ;;  %v1139_v37 = vrot.slane %v1125_v31, %v6228_v62  ;;  %v1388_v39 = vrot.slane %v1380_v32, %v6228_v62  ;;  %v1395_v41 = vrot.slane %v1381_v33, %v6228_v62 }
 0x36a   : > { %v1037_v42 = vpop.permute.xlu1 %1036  ;;  %v1033_v43 = vpop.permute.xlu0 %1032  ;;  %v6328_v33 = vsub.s32 %v2294_v13, %v6201_v40  ;;  %10993 = vst [vmem:[#allocation51_spill] sm:$0xff] %v6406_v38 }
 0x36b   : > { %v1172_v50 = vcombine.low %v1116_v0, %v1132_v36  ;;  %v1173_v51 = vcombine.high %v1116_v0, %v1132_v36  ;;  %v1188_v55 = vcombine.low %v1123_v21, %v1139_v37  ;;  %v1189_v56 = vcombine.high %v1123_v21, %v1139_v37 }
 0x36c   : > { %v1396_v57 = vcombine.low %v1021_v8, %v1033_v43  ;;  %v1397_v7 = vcombine.high %v1021_v8, %v1033_v43  ;;  %10977 = vst [vmem:[#allocation35_spill] sm:$0xff] %v6328_v33  ;;  %v6331_v36 = vsub.s32 %v2301_v14, %v6201_v40  ;;  %v6335_v37 = vrot.slane %v6204_v45, %v6237_v2 }
 0x36d   : > { %v6314_v24 = vrot.slane %v1172_v50, %v6231_v63  ;;  %v6317_v25 = vrot.slane %v1173_v51, %v6231_v63  ;;  %v6320_v30 = vrot.slane %v1188_v55, %v6231_v63  ;;  %v6323_v31 = vrot.slane %v1189_v56, %v6231_v63 }
 0x36e   : > { %v1404_v0 = vrot.slane %v1396_v57, %v6228_v62  ;;  %v1411_v21 = vrot.slane %v1397_v7, %v6228_v62  ;;  %v1043_v32 = vpop.permute.xlu1 %1042  ;;  %v1039_v8 = vpop.permute.xlu0 %1038  ;;  %10978 = vst [vmem:[#allocation36_spill] sm:$0xff] %v6331_v36  ;;  %10979 = vst [vmem:[#allocation37_spill] sm:$0xff] %v6335_v37  ;;  %v6339_v43 = vrot.slane %v6207_v52, %v6237_v2  ;;  %v6409_v36 = vadd.s32 16, %v6246_v5 }
 0x36f   : > { %v6351_v51 = vrot.slane %v6234_v1, %v6237_v2  ;;  %v6355_v55 = vrot.slane %v6240_v3, %v6237_v2  ;;  %v6359_v56 = vrot.slane %v6243_v4, %v6237_v2  ;;  %v6363_v57 = vrot.slane %v6246_v5, %v6237_v2 }
 0x370   : > { %10980 = vst [vmem:[#allocation38_spill] sm:$0xff] %v6339_v43  ;;  %v1444_v47 = vcombine.low %v1388_v39, %v1404_v0  ;;  %v1445_v48 = vcombine.high %v1388_v39, %v1404_v0  ;;  %v1460_v40 = vcombine.low %v1395_v41, %v1411_v21  ;;  %v1461_v50 = vcombine.high %v1395_v41, %v1411_v21 }
 0x371   : > { %10983 = vst [vmem:[#allocation41_spill] sm:$0xff] %v6351_v51  ;;  %10984 = vst [vmem:[#allocation42_spill] sm:$0xff] %v6355_v55  ;;  %v6435_v45 = vadd.s32 1, %v6403_v19  ;;  %v11063_v2 = vmov 0  ;;  %v11102_v55 = vmov 0  ;;  %v11182_v51 = vmov 0 }
 0x372   : > { %10985 = vst [vmem:[#allocation43_spill] sm:$0xff] %v6359_v56  ;;  %10986 = vst [vmem:[#allocation44_spill] sm:$0xff] %v6363_v57  ;;  %v6366_v39 = vrot.slane %v1444_v47, %v6231_v63  ;;  %v6369_v41 = vrot.slane %v1445_v48, %v6231_v63  ;;  %v6372_v7 = vrot.slane %v1460_v40, %v6231_v63  ;;  %v1049_v14 = vpop.permute.xlu1 %1048  ;;  %v1045_v0 = vpop.permute.xlu0 %1044  ;;  %v6391_v47 = vadd.s32 16, %v6207_v52 }
 0x373   : > { %v6375_v13 = vrot.slane %v1461_v50, %v6231_v63  ;;  %v1140_v21 = vcombine.low %v1037_v42, %v1049_v14  ;;  %v1141_v49 = vcombine.high %v1037_v42, %v1049_v14  ;;  %v6394_v48 = vadd.s32 16, %v6210_v53  ;;  %10994 = vst [vmem:[#allocation52_spill] sm:$0xff] %v6409_v36  ;;  %11000 = vst [vmem:[#allocation58_spill] sm:$0xff] %v6435_v45 }
 0x374   : > { %10988 = vst [vmem:[#allocation46_spill] sm:$0xff] %v6391_v47  ;;  %v6397_v40 = vadd.s32 16, %v6213_v54  ;;  %v6400_v42 = vadd.s32 16, %v6234_v1  ;;  %v6423_v4 = vadd.s32 1, %v6391_v47  ;;  %v11018_v45 = vmov 0 }
 0x375   : > { %v1148_v29 = vrot.slane %v1140_v21, %v6228_v62  ;;  %v1155_v50 = vrot.slane %v1141_v49, %v6228_v62  ;;  %10989 = vst [vmem:[#allocation47_spill] sm:$0xff] %v6394_v48  ;;  %v6426_v5 = vadd.s32 1, %v6394_v48 }
 0x376   : > { %v1055_v14 = vpop.permute.xlu1 %1054  ;;  %v1051_v20 = vpop.permute.xlu0 %1050  ;;  %10990 = vst [vmem:[#allocation48_spill] sm:$0xff] %v6397_v40  ;;  %10991 = vst [vmem:[#allocation49_spill] sm:$0xff] %v6400_v42  ;;  %v6432_v52 = vadd.s32 1, %v6400_v42 }
 0x377   : > { %v1156_v21 = vcombine.low %v1043_v32, %v1055_v14  ;;  %v1157_v49 = vcombine.high %v1043_v32, %v1055_v14  ;;  %v1412_v34 = vcombine.low %v1039_v8, %v1051_v20  ;;  %v1413_v28 = vcombine.high %v1039_v8, %v1051_v20  ;;  %10996 = vst [vmem:[#allocation54_spill] sm:$0xff] %v6423_v4 }
 0x378   : > { %v6420_v14 = vadd.s32 1, %v6388_v35  ;;  %10997 = vst [vmem:[#allocation55_spill] sm:$0xff] %v6426_v5  ;;  %10999 = vst [vmem:[#allocation57_spill] sm:$0xff] %v6432_v52  ;;  %v11023_v4 = vmov 0 }
 0x379   : > { %v1164_v33 = vrot.slane %v1156_v21, %v6228_v62  ;;  %v1171_v54 = vrot.slane %v1157_v49, %v6228_v62  ;;  %v6414_v32 = vrot.slane %v1412_v34, %v6228_v62  ;;  %v6417_v20 = vrot.slane %v1413_v28, %v6228_v62 }
 0x37a   : > { %v1057_v8 = vpop.permute.xlu0 %1056  ;;  %10995 = vst [vmem:[#allocation53_spill] sm:$0xff] %v6420_v14  ;;  %v6429_v21 = vadd.s32 1, %v6397_v40  ;;  %v11026_v14 = vmov 0 }
 0x37b   : > { %v1204_v49 = vcombine.low %v1148_v29, %v1164_v33  ;;  %v1205_v3 = vcombine.high %v1148_v29, %v1164_v33  ;;  %v1220_v34 = vcombine.low %v1155_v50, %v1171_v54  ;;  %v1221_v1 = vcombine.high %v1155_v50, %v1171_v54 }
 0x37c   : > { %10998 = vst [vmem:[#allocation56_spill] sm:$0xff] %v6429_v21  ;;  %v1428_v53 = vcombine.low %v1045_v0, %v1057_v8  ;;  %v1429_v28 = vcombine.high %v1045_v0, %v1057_v8  ;;  %v6456_v0 = vadd.s32 1, %v6406_v38  ;;  %v6459_v50 = vadd.s32 1, %v6409_v36 }
 0x37d   : > { %v6438_v18 = vrot.slane %v1204_v49, %v6231_v63  ;;  %v6441_v17 = vrot.slane %v1205_v3, %v6231_v63  ;;  %v6444_v16 = vrot.slane %v1220_v34, %v6231_v63  ;;  %v6447_v29 = vrot.slane %v1221_v1, %v6231_v63  ;;  %v6469_v49 = vpop.permute.xlu1 %1060 }
 0x37e   : > { %v6450_v54 = vrot.slane %v1428_v53, %v6228_v62  ;;  %v6453_v33 = vrot.slane %v1429_v28, %v6228_v62  ;;  %11001 = vst [vmem:[#allocation59_spill] sm:$0xff] %v6456_v0  ;;  %11002 = vst [vmem:[#allocation60_spill] sm:$0xff] %v6459_v50  ;;  %v11015_v0 = vmov 0  ;;  %v6561_v5 = vpop.permute.xlu0 %1062 }
 0x37f   : > { %v1236_v3 = vcombine.low %v6314_v24, %v6438_v18  ;;  %v1237_v8 = vcombine.high %v6314_v24, %v6438_v18  ;;  %v1238_v1 = vcombine.low %v6317_v25, %v6441_v17  ;;  %v1239_v53 = vcombine.high %v6317_v25, %v6441_v17 }
 0x380   : > { %v1240_v34 = vcombine.low %v6320_v30, %v6444_v16  ;;  %v1241_v28 = vcombine.high %v6320_v30, %v6444_v16  ;;  %v1242_v15 = vcombine.low %v6323_v31, %v6447_v29  ;;  %v1243_v24 = vcombine.high %v6323_v31, %v6447_v29 }
 0x381   : > { %v5620_v61 = vcombine.low %v6438_v18, %v6438_v18  ;;  %v6482_v60 = vrot.slane %v1236_v3, %v6228_v62  ;;  %v5622_v25 = vcombine.low %v6441_v17, %v6441_v17  ;;  %v6487_v59 = vrot.slane %v1238_v1, %v6228_v62 }
 0x382   : > { %v5624_v30 = vcombine.low %v6444_v16, %v6444_v16  ;;  %v6492_v58 = vrot.slane %v1240_v34, %v6228_v62  ;;  %v5626_v31 = vcombine.low %v6447_v29, %v6447_v29  ;;  %v6497_v6 = vrot.slane %v1242_v15, %v6228_v62 }
 0x383   : > { %v6500_v3 = vrot.slane %v5620_v61, %v6228_v62  ;;  %v6503_v36 = vrot.slane %v5622_v25, %v6228_v62  ;;  %v2014_v1 = vrot.slane %v6482_v60, 7  ;;  %v2022_v38 = vrot.slane %v6487_v59, 7  ;;  %v11355_v25 = vld [vmem:[#allocation32_spill] sm:$0xff] }
 0x384   : > { %v6508_v19 = vrot.slane %v5624_v30, %v6228_v62  ;;  %v6511_v34 = vrot.slane %v5626_v31, %v6228_v62  ;;  %v2030_v42 = vrot.slane %v6492_v58, 7  ;;  %v2038_v15 = vrot.slane %v6497_v6, 7  ;;  %v6527_v31 = vpop.permute.xlu1 %1066 }
 0x385   : > { %11003 = vst [vmem:[#allocation61_spill] sm:$0xff] %v6500_v3  ;;  %11004 = vst [vmem:[#allocation62_spill] sm:$0xff] %v6503_v36  ;;  %v2016_v61 = vrot.slane %v6500_v3, 7  ;;  %v2024_v40 = vrot.slane %v6503_v36, 7  ;;  %vm6518_vm14 = vcmp.gt.f32.partialorder %v6482_v60, %v2014_v1  ;;  %vm6523_vm15 = vcmp.gt.f32.partialorder %v6487_v59, %v2022_v38 }
 0x386   : > { %11005 = vst [vmem:[#allocation63_spill] sm:$0xff] %v6508_v19  ;;  %11006 = vst [vmem:[#allocation64_spill] sm:$0xff] %v6511_v34  ;;  %v2032_v48 = vrot.slane %v6508_v19, 7  ;;  %v2040_v47 = vrot.slane %v6511_v34, 7  ;;  %vm6532_vm0 = vcmp.gt.f32.partialorder %v6492_v58, %v2030_v42  ;;  %vm6537_vm1 = vcmp.gt.f32.partialorder %v6497_v6, %v2038_v15 }
 0x387   : > { %vm6542_vm2 = vcmp.gt.f32.partialorder %v6500_v3, %v2016_v61  ;;  %vm6547_vm3 = vcmp.gt.f32.partialorder %v6503_v36, %v2024_v40  ;;  %v6554_v52 = vsel %vm6518_vm14, %v6482_v60, %v2014_v1  ;;  %v6559_v21 = vsel %vm6523_vm15, %v6487_v59, %v2022_v38 }
 0x388   : > { %v11016_v0 = vsel %vm6542_vm2, 4294967295, %v11015_v0  ;;  %v11019_v45 = vsel %vm6547_vm3, 4294967295, %v11018_v45  ;;  %11021 = vst [vmem:[#allocation67_spill] sm:$0xff] %v6554_v52  ;;  %11022 = vst [vmem:[#allocation68_spill] sm:$0xff] %v6559_v21  ;;  %vm6564_vm5 = vcmp.gt.f32.partialorder %v6508_v19, %v2032_v48  ;;  %vm6569_vm6 = vcmp.gt.f32.partialorder %v6511_v34, %v2040_v47 }
 0x389   : > { %11017 = vst [vmem:[#allocation65_spill] sm:$0xff] %v11016_v0  ;;  %11020 = vst [vmem:[#allocation66_spill] sm:$0xff] %v11019_v45  ;;  %v11024_v4 = vsel %vm6564_vm5, 4294967295, %v11023_v4  ;;  %v11027_v14 = vsel %vm6569_vm6, 4294967295, %v11026_v14  ;;  %v6576_v1 = vsel %vm6542_vm2, %v6500_v3, %v2016_v61  ;;  %v6581_v38 = vsel %vm6547_vm3, %v6503_v36, %v2024_v40 }
 0x38a   : > { %11025 = vst [vmem:[#allocation69_spill] sm:$0xff] %v11024_v4  ;;  %11028 = vst [vmem:[#allocation70_spill] sm:$0xff] %v11027_v14  ;;  %v6586_v21 = vsel %vm6532_vm0, %v6492_v58, %v2030_v42  ;;  %v6591_v52 = vsel %vm6564_vm5, %v6508_v19, %v2032_v48  ;;  %v6596_v61 = vsel %vm6537_vm1, %v6497_v6, %v2038_v15  ;;  %v6639_v4 = vpop.permute.xlu0 %1068  ;;  %v11043_v45 = vmov 0 }
 0x38b   : > { %11029 = vst [vmem:[#allocation71_spill] sm:$0xff] %v6576_v1  ;;  %11030 = vst [vmem:[#allocation72_spill] sm:$0xff] %v6581_v38  ;;  %v6601_v40 = vsel %vm6569_vm6, %v6511_v34, %v2040_v47  ;;  %v5636_v38 = vcombine.high %v6438_v18, %v6438_v18  ;;  %v6606_v42 = vrot.slane %v1237_v8, %v6228_v62  ;;  %v1073_v8 = vpop.permute.xlu1 %1072  ;;  %v11049_v34 = vmov 0 }
 0x38c   : > { %11031 = vst [vmem:[#allocation73_spill] sm:$0xff] %v6586_v21  ;;  %11032 = vst [vmem:[#allocation74_spill] sm:$0xff] %v6591_v52  ;;  %v5638_v48 = vcombine.high %v6441_v17, %v6441_v17  ;;  %v6611_v52 = vrot.slane %v1239_v53, %v6228_v62  ;;  %v5640_v15 = vcombine.high %v6444_v16, %v6444_v16  ;;  %v11052_v19 = vmov 0 }
 0x38d   : > { %11033 = vst [vmem:[#allocation75_spill] sm:$0xff] %v6596_v61  ;;  %11034 = vst [vmem:[#allocation76_spill] sm:$0xff] %v6601_v40  ;;  %v6616_v1 = vrot.slane %v1241_v28, %v6228_v62  ;;  %v5642_v47 = vcombine.high %v6447_v29, %v6447_v29  ;;  %v6621_v18 = vrot.slane %v1243_v24, %v6228_v62  ;;  %v3214_v53 = vrot.slane %v6606_v42, 7 }
 0x38e   : > { %11035 = vst [vmem:[#allocation77_spill] sm:$0xff] %v6606_v42  ;;  %11036 = vst [vmem:[#allocation78_spill] sm:$0xff] %v6611_v52  ;;  %v6624_v40 = vrot.slane %v5636_v38, %v6228_v62  ;;  %v6627_v17 = vrot.slane %v5638_v48, %v6228_v62  ;;  %v3222_v16 = vrot.slane %v6611_v52, 7  ;;  %v6632_v28 = vrot.slane %v5640_v15, %v6228_v62 }
 0x38f   : > { %11037 = vst [vmem:[#allocation79_spill] sm:$0xff] %v6616_v1  ;;  %11038 = vst [vmem:[#allocation80_spill] sm:$0xff] %v6621_v18  ;;  %v6635_v14 = vrot.slane %v5642_v47, %v6228_v62  ;;  %v3230_v29 = vrot.slane %v6616_v1, 7  ;;  %v3238_v24 = vrot.slane %v6621_v18, 7  ;;  %vm6644_vm7 = vcmp.gt.f32.partialorder %v6606_v42, %v3214_v53 }
 0x390   : > { %11039 = vst [vmem:[#allocation81_spill] sm:$0xff] %v6624_v40  ;;  %11040 = vst [vmem:[#allocation82_spill] sm:$0xff] %v6627_v17  ;;  %v3216_v38 = vrot.slane %v6624_v40, 7  ;;  %v3224_v48 = vrot.slane %v6627_v17, 7  ;;  %v11044_v45 = vsel %vm6644_vm7, 4294967295, %v11043_v45  ;;  %vm6649_vm8 = vcmp.gt.f32.partialorder %v6611_v52, %v3222_v16 }
 0x391   : > { %11041 = vst [vmem:[#allocation83_spill] sm:$0xff] %v6632_v28  ;;  %11042 = vst [vmem:[#allocation84_spill] sm:$0xff] %v6635_v14  ;;  %v11046_v15 = vmov 0  ;;  %v3232_v47 = vrot.slane %v6632_v28, 7  ;;  %v3240_v0 = vrot.slane %v6635_v14, 7  ;;  %vm6656_vm9 = vcmp.gt.f32.partialorder %v6616_v1, %v3230_v29 }
 0x392   : > { %11045 = vst [vmem:[#allocation85_spill] sm:$0xff] %v11044_v45  ;;  %v11047_v15 = vsel %vm6649_vm8, 4294967295, %v11046_v15  ;;  %v11050_v34 = vsel %vm6656_vm9, 4294967295, %v11049_v34  ;;  %vm6661_vm10 = vcmp.gt.f32.partialorder %v6621_v18, %v3238_v24  ;;  %vm6666_vm12 = vcmp.gt.f32.partialorder %v6624_v40, %v3216_v38 }
 0x393   : > { %11048 = vst [vmem:[#allocation86_spill] sm:$0xff] %v11047_v15  ;;  %11051 = vst [vmem:[#allocation87_spill] sm:$0xff] %v11050_v34  ;;  %v11053_v19 = vsel %vm6661_vm10, 4294967295, %v11052_v19  ;;  %v11055_v36 = vmov 0  ;;  %vm6671_vm13 = vcmp.gt.f32.partialorder %v6627_v17, %v3224_v48  ;;  %v11058_v3 = vmov 0 }
 0x394   : > { %11054 = vst [vmem:[#allocation88_spill] sm:$0xff] %v11053_v19  ;;  %v11056_v36 = vsel %vm6666_vm12, 4294967295, %v11055_v36  ;;  %v11059_v3 = vsel %vm6671_vm13, 4294967295, %v11058_v3  ;;  %v6678_v61 = vsel %vm6644_vm7, %v6606_v42, %v3214_v53  ;;  %v6683_v21 = vsel %vm6649_vm8, %v6611_v52, %v3222_v16 }
 0x395   : > { %11057 = vst [vmem:[#allocation89_spill] sm:$0xff] %v11056_v36  ;;  %11060 = vst [vmem:[#allocation90_spill] sm:$0xff] %v11059_v3  ;;  %vm6686_vm4 = vcmp.gt.f32.partialorder %v6632_v28, %v3232_v47  ;;  %vm6691_vm11 = vcmp.gt.f32.partialorder %v6635_v14, %v3240_v0  ;;  %v6698_v53 = vsel %vm6666_vm12, %v6624_v40, %v3216_v38  ;;  %v11091_v52 = vmov 0 }
 0x396   : > { %11061 = vst [vmem:[#allocation91_spill] sm:$0xff] %v6678_v61  ;;  %11062 = vst [vmem:[#allocation92_spill] sm:$0xff] %v6683_v21  ;;  %v11064_v2 = vsel %vm6686_vm4, 4294967295, %v11063_v2  ;;  %v11067_v27 = vsel %vm6691_vm11, 4294967295, %v11066_v27  ;;  %v6703_v16 = vsel %vm6671_vm13, %v6627_v17, %v3224_v48  ;;  %v1079_v21 = vpop.permute.xlu1 %1078  ;;  %v6708_v61 = vsel %vm6656_vm9, %v6616_v1, %v3230_v29 }
 0x397   : > { %11065 = vst [vmem:[#allocation93_spill] sm:$0xff] %v11064_v2  ;;  %11068 = vst [vmem:[#allocation94_spill] sm:$0xff] %v11067_v27  ;;  %v6713_v15 = vsel %vm6686_vm4, %v6632_v28, %v3232_v47  ;;  %v6718_v38 = vsel %vm6661_vm10, %v6621_v18, %v3238_v24  ;;  %v6723_v48 = vsel %vm6691_vm11, %v6635_v14, %v3240_v0  ;;  %v11085_v18 = vmov 0 }
 0x398   : > { %11069 = vst [vmem:[#allocation95_spill] sm:$0xff] %v6698_v53  ;;  %11070 = vst [vmem:[#allocation96_spill] sm:$0xff] %v6703_v16  ;;  %v1476_v16 = vcombine.low %v6414_v32, %v6450_v54  ;;  %v1477_v29 = vcombine.high %v6414_v32, %v6450_v54  ;;  %v1492_v47 = vcombine.low %v6417_v20, %v6453_v33  ;;  %v6733_v53 = vpop.permute.xlu0 %1074  ;;  %v11088_v1 = vmov 0 }
 0x399   : > { %11071 = vst [vmem:[#allocation97_spill] sm:$0xff] %v6708_v61  ;;  %11072 = vst [vmem:[#allocation98_spill] sm:$0xff] %v6713_v15  ;;  %v1493_v15 = vcombine.high %v6417_v20, %v6453_v33  ;;  %v1244_v24 = vcombine.low %v6469_v49, %v1073_v8  ;;  %v1245_v27 = vcombine.high %v6469_v49, %v1073_v8  ;;  %v11094_v42 = vmov 0 }
 0x39a   : > { %11073 = vst [vmem:[#allocation99_spill] sm:$0xff] %v6718_v38  ;;  %11074 = vst [vmem:[#allocation100_spill] sm:$0xff] %v6723_v48  ;;  %v1260_v0 = vcombine.low %v6527_v31, %v1079_v21  ;;  %v1261_v48 = vcombine.high %v6527_v31, %v1079_v21  ;;  %v6740_v2 = vrot.slane %v1476_v16, %v6231_v63  ;;  %v6801_v28 = vpop.permute.xlu1 %1084 }
 0x39b   : > { %v6743_v32 = vrot.slane %v1477_v29, %v6231_v63  ;;  %v6746_v54 = vrot.slane %v1492_v47, %v6231_v63  ;;  %v6749_v20 = vrot.slane %v1493_v15, %v6231_v63  ;;  %v6752_v33 = vrot.slane %v1244_v24, %v6228_v62 }
 0x39c   : > { %v6755_v49 = vrot.slane %v1245_v27, %v6228_v62  ;;  %v6758_v21 = vrot.slane %v1260_v0, %v6228_v62  ;;  %v6761_v31 = vrot.slane %v1261_v48, %v6228_v62  ;;  %v1508_v8 = vcombine.low %v6366_v39, %v6740_v2  ;;  %v6789_v36 = vpop.permute.xlu0 %1080 }
 0x39d   : > { %v1509_v16 = vcombine.high %v6366_v39, %v6740_v2  ;;  %v1510_v15 = vcombine.low %v6369_v41, %v6743_v32  ;;  %v1511_v29 = vcombine.high %v6369_v41, %v6743_v32  ;;  %v1512_v27 = vcombine.low %v6372_v7, %v6746_v54 }
 0x39e   : > { %v1513_v47 = vcombine.high %v6372_v7, %v6746_v54  ;;  %v1514_v48 = vcombine.low %v6375_v13, %v6749_v20  ;;  %v1515_v24 = vcombine.high %v6375_v13, %v6749_v20  ;;  %v5628_v39 = vcombine.low %v6740_v2, %v6740_v2 }
 0x39f   : > { %v6782_v0 = vrot.slane %v1508_v8, %v6228_v62  ;;  %v5630_v41 = vcombine.low %v6743_v32, %v6743_v32  ;;  %v6787_v3 = vrot.slane %v1510_v15, %v6228_v62  ;;  %v5632_v7 = vcombine.low %v6746_v54, %v6746_v54 }
 0x3a0   : > { %v6794_v14 = vrot.slane %v1512_v27, %v6228_v62  ;;  %v5634_v13 = vcombine.low %v6749_v20, %v6749_v20  ;;  %v6799_v8 = vrot.slane %v1514_v48, %v6228_v62  ;;  %v6804_v17 = vrot.slane %v5628_v39, %v6228_v62  ;;  %v6863_v56 = vpop.permute.xlu0 %1086 }
 0x3a1   : > { %v6807_v15 = vrot.slane %v5630_v41, %v6228_v62  ;;  %v2046_v40 = vrot.slane %v6782_v0, 7  ;;  %v2054_v38 = vrot.slane %v6787_v3, 7  ;;  %v6812_v27 = vrot.slane %v5632_v7, %v6228_v62 }
 0x3a2   : > { %11075 = vst [vmem:[#allocation101_spill] sm:$0xff] %v6804_v17  ;;  %v6815_v61 = vrot.slane %v5634_v13, %v6228_v62  ;;  %v2062_v48 = vrot.slane %v6794_v14, 7  ;;  %v2070_v19 = vrot.slane %v6799_v8, 7  ;;  %v2048_v39 = vrot.slane %v6804_v17, 7 }
 0x3a3   : > { %11076 = vst [vmem:[#allocation102_spill] sm:$0xff] %v6807_v15  ;;  %11077 = vst [vmem:[#allocation103_spill] sm:$0xff] %v6812_v27  ;;  %v2056_v34 = vrot.slane %v6807_v15, 7  ;;  %vm6822_vm11 = vcmp.gt.f32.partialorder %v6782_v0, %v2046_v40  ;;  %v11079_v41 = vmov 0  ;;  %vm6827_vm4 = vcmp.gt.f32.partialorder %v6787_v3, %v2054_v38 }
 0x3a4   : > { %11078 = vst [vmem:[#allocation104_spill] sm:$0xff] %v6815_v61  ;;  %v11080_v41 = vsel %vm6822_vm11, 4294967295, %v11079_v41  ;;  %v11082_v7 = vmov 0  ;;  %v2064_v13 = vrot.slane %v6812_v27, 7  ;;  %v2072_v45 = vrot.slane %v6815_v61, 7 }
 0x3a5   : > { %11081 = vst [vmem:[#allocation105_spill] sm:$0xff] %v11080_v41  ;;  %v11083_v7 = vsel %vm6827_vm4, 4294967295, %v11082_v7  ;;  %vm6834_vm13 = vcmp.gt.f32.partialorder %v6794_v14, %v2062_v48  ;;  %vm6839_vm12 = vcmp.gt.f32.partialorder %v6799_v8, %v2070_v19  ;;  %vm6844_vm6 = vcmp.gt.f32.partialorder %v6804_v17, %v2048_v39 }
 0x3a6   : > { %11084 = vst [vmem:[#allocation106_spill] sm:$0xff] %v11083_v7  ;;  %v11086_v18 = vsel %vm6834_vm13, 4294967295, %v11085_v18  ;;  %v11089_v1 = vsel %vm6839_vm12, 4294967295, %v11088_v1  ;;  %v11092_v52 = vsel %vm6844_vm6, 4294967295, %v11091_v52  ;;  %vm6849_vm5 = vcmp.gt.f32.partialorder %v6807_v15, %v2056_v34 }
 0x3a7   : > { %11087 = vst [vmem:[#allocation107_spill] sm:$0xff] %v11086_v18  ;;  %11090 = vst [vmem:[#allocation108_spill] sm:$0xff] %v11089_v1  ;;  %v11095_v42 = vsel %vm6849_vm5, 4294967295, %v11094_v42  ;;  %v6856_v57 = vsel %vm6822_vm11, %v6782_v0, %v2046_v40  ;;  %v6861_v26 = vsel %vm6827_vm4, %v6787_v3, %v2054_v38  ;;  %vm6866_vm3 = vcmp.gt.f32.partialorder %v6812_v27, %v2064_v13 }
 0x3a8   : > { %11093 = vst [vmem:[#allocation109_spill] sm:$0xff] %v11092_v52  ;;  %11096 = vst [vmem:[#allocation110_spill] sm:$0xff] %v11095_v42  ;;  %v11100_v23 = vsel %vm6866_vm3, 4294967295, %v11099_v23  ;;  %vm6871_vm2 = vcmp.gt.f32.partialorder %v6815_v61, %v2072_v45  ;;  %v6878_v40 = vsel %vm6844_vm6, %v6804_v17, %v2048_v39  ;;  %v6883_v38 = vsel %vm6849_vm5, %v6807_v15, %v2056_v34 }
 0x3a9   : > { %11097 = vst [vmem:[#allocation111_spill] sm:$0xff] %v6856_v57  ;;  %11098 = vst [vmem:[#allocation112_spill] sm:$0xff] %v6861_v26  ;;  %v11103_v55 = vsel %vm6871_vm2, 4294967295, %v11102_v55  ;;  %v6885_v26 = vpop.permute.xlu1 %1090  ;;  %v6890_v57 = vsel %vm6834_vm13, %v6794_v14, %v2062_v48  ;;  %v6895_v7 = vsel %vm6866_vm3, %v6812_v27, %v2064_v13  ;;  %v6900_v39 = vsel %vm6839_vm12, %v6799_v8, %v2070_v19 }
 0x3aa   : > { %11101 = vst [vmem:[#allocation113_spill] sm:$0xff] %v11100_v23  ;;  %11104 = vst [vmem:[#allocation114_spill] sm:$0xff] %v11103_v55  ;;  %v6905_v34 = vsel %vm6871_vm2, %v6815_v61, %v2072_v45  ;;  %v6910_v48 = vrot.slane %v1509_v16, %v6228_v62  ;;  %v5646_v13 = vcombine.high %v6743_v32, %v6743_v32  ;;  %v6943_v55 = vpop.permute.xlu0 %1092  ;;  %v11119_v23 = vmov 0 }
 0x3ab   : > { %11105 = vst [vmem:[#allocation115_spill] sm:$0xff] %v6878_v40  ;;  %11106 = vst [vmem:[#allocation116_spill] sm:$0xff] %v6883_v38  ;;  %v5644_v38 = vcombine.high %v6740_v2, %v6740_v2  ;;  %v5648_v19 = vcombine.high %v6746_v54, %v6746_v54  ;;  %v6920_v40 = vrot.slane %v1513_v47, %v6228_v62  ;;  %v11125_v61 = vmov 0 }
 0x3ac   : > { %11107 = vst [vmem:[#allocation117_spill] sm:$0xff] %v6890_v57  ;;  %11108 = vst [vmem:[#allocation118_spill] sm:$0xff] %v6895_v7  ;;  %v6915_v7 = vrot.slane %v1511_v29, %v6228_v62  ;;  %v5650_v45 = vcombine.high %v6749_v20, %v6749_v20  ;;  %v6925_v2 = vrot.slane %v1515_v24, %v6228_v62  ;;  %v3246_v29 = vrot.slane %v6910_v48, 7 }
 0x3ad   : > { %11109 = vst [vmem:[#allocation119_spill] sm:$0xff] %v6900_v39  ;;  %11110 = vst [vmem:[#allocation120_spill] sm:$0xff] %v6905_v34  ;;  %v6928_v16 = vrot.slane %v5644_v38, %v6228_v62  ;;  %v6931_v32 = vrot.slane %v5646_v13, %v6228_v62  ;;  %v6936_v54 = vrot.slane %v5648_v19, %v6228_v62  ;;  %v3262_v20 = vrot.slane %v6920_v40, 7 }
 0x3ae   : > { %11111 = vst [vmem:[#allocation121_spill] sm:$0xff] %v6910_v48  ;;  %11112 = vst [vmem:[#allocation122_spill] sm:$0xff] %v6915_v7  ;;  %v3254_v34 = vrot.slane %v6915_v7, 7  ;;  %v6939_v47 = vrot.slane %v5650_v45, %v6228_v62  ;;  %v3270_v24 = vrot.slane %v6925_v2, 7  ;;  %vm6948_vm2 = vcmp.gt.f32.partialorder %v6910_v48, %v3246_v29  ;;  %v1097_v45 = vpop.permute.xlu1 %1096 }
 0x3af   : > { %11113 = vst [vmem:[#allocation123_spill] sm:$0xff] %v6920_v40  ;;  %11114 = vst [vmem:[#allocation124_spill] sm:$0xff] %v6925_v2  ;;  %v3248_v38 = vrot.slane %v6928_v16, 7  ;;  %v3256_v13 = vrot.slane %v6931_v32, 7  ;;  %v11120_v23 = vsel %vm6948_vm2, 4294967295, %v11119_v23  ;;  %v11122_v19 = vmov 0 }
 0x3b0   : > { %11115 = vst [vmem:[#allocation125_spill] sm:$0xff] %v6928_v16  ;;  %11116 = vst [vmem:[#allocation126_spill] sm:$0xff] %v6931_v32  ;;  %vm6953_vm3 = vcmp.gt.f32.partialorder %v6915_v7, %v3254_v34  ;;  %v3264_v42 = vrot.slane %v6936_v54, 7  ;;  %v3272_v52 = vrot.slane %v6939_v47, 7  ;;  %vm6960_vm5 = vcmp.gt.f32.partialorder %v6920_v40, %v3262_v20 }
 0x3b1   : > { %11117 = vst [vmem:[#allocation127_spill] sm:$0xff] %v6936_v54  ;;  %11118 = vst [vmem:[#allocation128_spill] sm:$0xff] %v6939_v47  ;;  %v11123_v19 = vsel %vm6953_vm3, 4294967295, %v11122_v19  ;;  %v11126_v61 = vsel %vm6960_vm5, 4294967295, %v11125_v61  ;;  %vm6965_vm6 = vcmp.gt.f32.partialorder %v6925_v2, %v3270_v24  ;;  %v11128_v27 = vmov 0 }
 0x3b2   : > { %11121 = vst [vmem:[#allocation129_spill] sm:$0xff] %v11120_v23  ;;  %11124 = vst [vmem:[#allocation130_spill] sm:$0xff] %v11123_v19  ;;  %v11129_v27 = vsel %vm6965_vm6, 4294967295, %v11128_v27  ;;  %vm6970_vm10 = vcmp.gt.f32.partialorder %v6928_v16, %v3248_v38  ;;  %v11131_v15 = vmov 0  ;;  %vm6975_vm9 = vcmp.gt.f32.partialorder %v6931_v32, %v3256_v13 }
 0x3b3   : > { %11127 = vst [vmem:[#allocation131_spill] sm:$0xff] %v11126_v61  ;;  %11130 = vst [vmem:[#allocation132_spill] sm:$0xff] %v11129_v27  ;;  %v11132_v15 = vsel %vm6970_vm10, 4294967295, %v11131_v15  ;;  %v11134_v17 = vmov 0  ;;  %v6982_v39 = vsel %vm6948_vm2, %v6910_v48, %v3246_v29  ;;  %v6987_v57 = vsel %vm6953_vm3, %v6915_v7, %v3254_v34 }
 0x3b4   : > { %11133 = vst [vmem:[#allocation133_spill] sm:$0xff] %v11132_v15  ;;  %v11135_v17 = vsel %vm6975_vm9, 4294967295, %v11134_v17  ;;  %11137 = vst [vmem:[#allocation135_spill] sm:$0xff] %v6982_v39  ;;  %vm6990_vm8 = vcmp.gt.f32.partialorder %v6936_v54, %v3264_v42  ;;  %v11139_v1 = vmov 0  ;;  %vm6995_vm7 = vcmp.gt.f32.partialorder %v6939_v47, %v3272_v52 }
 0x3b5   : > { %11136 = vst [vmem:[#allocation134_spill] sm:$0xff] %v11135_v17  ;;  %11138 = vst [vmem:[#allocation136_spill] sm:$0xff] %v6987_v57  ;;  %v11140_v1 = vsel %vm6990_vm8, 4294967295, %v11139_v1  ;;  %v11142_v18 = vmov 0  ;;  %v7002_v29 = vsel %vm6970_vm10, %v6928_v16, %v3248_v38  ;;  %v7007_v34 = vsel %vm6975_vm9, %v6931_v32, %v3256_v13 }
 0x3b6   : > { %11141 = vst [vmem:[#allocation137_spill] sm:$0xff] %v11140_v1  ;;  %v11143_v18 = vsel %vm6995_vm7, 4294967295, %v11142_v18  ;;  %11145 = vst [vmem:[#allocation139_spill] sm:$0xff] %v7002_v29  ;;  %v7012_v57 = vsel %vm6960_vm5, %v6920_v40, %v3262_v20  ;;  %v7017_v39 = vsel %vm6990_vm8, %v6936_v54, %v3264_v42  ;;  %v7022_v38 = vsel %vm6965_vm6, %v6925_v2, %v3270_v24  ;;  %v1099_v29 = vpop.permute.xlu0 %1098 }
 0x3b7   : > { %11144 = vst [vmem:[#allocation138_spill] sm:$0xff] %v11143_v18  ;;  %11146 = vst [vmem:[#allocation140_spill] sm:$0xff] %v7007_v34  ;;  %v7027_v13 = vsel %vm6995_vm7, %v6939_v47, %v3272_v52  ;;  %v1308_v34 = vcombine.low %v6752_v33, %v6758_v21  ;;  %v1309_v20 = vcombine.high %v6752_v33, %v6758_v21  ;;  %v1103_v33 = vpop.permute.xlu1 %1102  ;;  %v11165_v23 = vmov 0 }
 0x3b8   : > { %11147 = vst [vmem:[#allocation141_spill] sm:$0xff] %v7012_v57  ;;  %11148 = vst [vmem:[#allocation142_spill] sm:$0xff] %v7017_v39  ;;  %v1324_v42 = vcombine.low %v6755_v49, %v6761_v31  ;;  %v1325_v39 = vcombine.high %v6755_v49, %v6761_v31  ;;  %v1516_v24 = vcombine.low %v6561_v5, %v6733_v53  ;;  %v11168_v2 = vmov 0 }
 0x3b9   : > { %11149 = vst [vmem:[#allocation143_spill] sm:$0xff] %v7022_v38  ;;  %11150 = vst [vmem:[#allocation144_spill] sm:$0xff] %v7027_v13  ;;  %v1517_v52 = vcombine.high %v6561_v5, %v6733_v53  ;;  %v1532_v13 = vcombine.low %v6639_v4, %v6789_v36  ;;  %v1533_v18 = vcombine.high %v6639_v4, %v6789_v36  ;;  %v11171_v40 = vmov 0 }
 0x3ba   : > { %v7046_v21 = vrot.slane %v1308_v34, %v6231_v63  ;;  %v7049_v1 = vrot.slane %v1309_v20, %v6231_v63  ;;  %v7052_v49 = vrot.slane %v1324_v42, %v6231_v63  ;;  %v7055_v31 = vrot.slane %v1325_v39, %v6231_v63  ;;  %v1105_v32 = vpop.permute.xlu0 %1104 }
 0x3bb   : > { %v1524_v5 = vrot.slane %v1516_v24, %v6228_v62  ;;  %v1531_v53 = vrot.slane %v1517_v52, %v6228_v62  ;;  %v1540_v17 = vrot.slane %v1532_v13, %v6228_v62  ;;  %v1547_v4 = vrot.slane %v1533_v18, %v6228_v62 }
 0x3bc   : > { %v1276_v36 = vcombine.low %v6801_v28, %v1097_v45  ;;  %v1277_v34 = vcombine.high %v6801_v28, %v1097_v45  ;;  %v1292_v20 = vcombine.low %v6885_v26, %v1103_v33  ;;  %v1293_v42 = vcombine.high %v6885_v26, %v1103_v33 }
 0x3bd   : > { %v1580_v15 = vcombine.low %v1524_v5, %v1540_v17  ;;  %v1581_v47 = vcombine.high %v1524_v5, %v1540_v17  ;;  %v1596_v39 = vcombine.low %v1531_v53, %v1547_v4  ;;  %v1597_v54 = vcombine.high %v1531_v53, %v1547_v4 }
 0x3be   : > { %v1284_v24 = vrot.slane %v1276_v36, %v6228_v62  ;;  %v1291_v52 = vrot.slane %v1277_v34, %v6228_v62  ;;  %v1300_v13 = vrot.slane %v1292_v20, %v6228_v62  ;;  %v1307_v18 = vrot.slane %v1293_v42, %v6228_v62 }
 0x3bf   : > { %v7070_v16 = vrot.slane %v1580_v15, %v6231_v63  ;;  %v7073_v28 = vrot.slane %v1581_v47, %v6231_v63  ;;  %v7076_v26 = vrot.slane %v1596_v39, %v6231_v63  ;;  %v7079_v17 = vrot.slane %v1597_v54, %v6231_v63 }
 0x3c0   : > { %v1340_v45 = vcombine.low %v1284_v24, %v1300_v13  ;;  %v1341_v33 = vcombine.high %v1284_v24, %v1300_v13  ;;  %v1356_v5 = vcombine.low %v1291_v52, %v1307_v18  ;;  %v1357_v53 = vcombine.high %v1291_v52, %v1307_v18 }
 0x3c1   : > { %v1548_v4 = vcombine.low %v6863_v56, %v1099_v29  ;;  %v1549_v36 = vcombine.high %v6863_v56, %v1099_v29  ;;  %v1564_v15 = vcombine.low %v6943_v55, %v1105_v32  ;;  %v1565_v34 = vcombine.high %v6943_v55, %v1105_v32 }
 0x3c2   : > { %v1348_v47 = vrot.slane %v1340_v45, %v6231_v63  ;;  %v1355_v20 = vrot.slane %v1341_v33, %v6231_v63  ;;  %v7088_v42 = vrot.slane %v1356_v5, %v6231_v63  ;;  %v7091_v54 = vrot.slane %v1357_v53, %v6231_v63 }
 0x3c3   : > { %v7094_v39 = vrot.slane %v1548_v4, %v6228_v62  ;;  %v7097_v24 = vrot.slane %v1549_v36, %v6228_v62  ;;  %v7100_v56 = vrot.slane %v1564_v15, %v6228_v62  ;;  %v7103_v55 = vrot.slane %v1565_v34, %v6228_v62 }
 0x3c4   : > { %v1372_v32 = vcombine.low %v7046_v21, %v1348_v47  ;;  %v1373_v29 = vcombine.high %v7046_v21, %v1348_v47  ;;  %v1374_v52 = vcombine.low %v7049_v1, %v1355_v20  ;;  %v1375_v13 = vcombine.high %v7049_v1, %v1355_v20 }
 0x3c5   : > { %v1376_v18 = vcombine.low %v7052_v49, %v7088_v42  ;;  %v1377_v45 = vcombine.high %v7052_v49, %v7088_v42  ;;  %v1378_v33 = vcombine.low %v7055_v31, %v7091_v54  ;;  %v1379_v5 = vcombine.high %v7055_v31, %v7091_v54 }
 0x3c6   : > { %v5621_v53 = vcombine.low %v1348_v47, %v1348_v47  ;;  %v7118_v4 = vrot.slane %v1372_v32, %v6228_v62  ;;  %v5623_v21 = vcombine.low %v1355_v20, %v1355_v20  ;;  %v7121_v36 = vrot.slane %v1374_v52, %v6228_v62 }
 0x3c7   : > { %v5625_v1 = vcombine.low %v7088_v42, %v7088_v42  ;;  %v7126_v15 = vrot.slane %v1376_v18, %v6228_v62  ;;  %v5627_v49 = vcombine.low %v7091_v54, %v7091_v54  ;;  %v7131_v34 = vrot.slane %v1378_v33, %v6228_v62 }
 0x3c8   : > { %11151 = vst [vmem:[#allocation145_spill] sm:$0xff] %v7118_v4  ;;  %11152 = vst [vmem:[#allocation146_spill] sm:$0xff] %v7121_v36  ;;  %v7134_v31 = vrot.slane %v5621_v53, %v6228_v62  ;;  %v7137_v32 = vrot.slane %v5623_v21, %v6228_v62  ;;  %v2018_v52 = vrot.slane %v7118_v4, 7  ;;  %v2026_v38 = vrot.slane %v7121_v36, 7 }
 0x3c9   : > { %11153 = vst [vmem:[#allocation147_spill] sm:$0xff] %v7126_v15  ;;  %11154 = vst [vmem:[#allocation148_spill] sm:$0xff] %v7131_v34  ;;  %v7142_v57 = vrot.slane %v5625_v1, %v6228_v62  ;;  %v7145_v18 = vrot.slane %v5627_v49, %v6228_v62  ;;  %v2034_v27 = vrot.slane %v7126_v15, 7  ;;  %v2042_v33 = vrot.slane %v7131_v34, 7 }
 0x3ca   : > { %11155 = vst [vmem:[#allocation149_spill] sm:$0xff] %v7134_v31  ;;  %11156 = vst [vmem:[#allocation150_spill] sm:$0xff] %v7137_v32  ;;  %v2020_v53 = vrot.slane %v7134_v31, 7  ;;  %v2028_v61 = vrot.slane %v7137_v32, 7  ;;  %vm7152_vm7 = vcmp.gt.f32.partialorder %v7118_v4, %v2018_v52  ;;  %v11159_v21 = vmov 0 }
 0x3cb   : > { %11157 = vst [vmem:[#allocation151_spill] sm:$0xff] %v7142_v57  ;;  %11158 = vst [vmem:[#allocation152_spill] sm:$0xff] %v7145_v18  ;;  %v11160_v21 = vsel %vm7152_vm7, 4294967295, %v11159_v21  ;;  %vm7157_vm8 = vcmp.gt.f32.partialorder %v7121_v36, %v2026_v38  ;;  %v11162_v1 = vmov 0  ;;  %v2036_v49 = vrot.slane %v7142_v57, 7 }
 0x3cc   : > { %11161 = vst [vmem:[#allocation153_spill] sm:$0xff] %v11160_v21  ;;  %v11163_v1 = vsel %vm7157_vm8, 4294967295, %v11162_v1  ;;  %v2044_v19 = vrot.slane %v7145_v18, 7  ;;  %vm7164_vm9 = vcmp.gt.f32.partialorder %v7126_v15, %v2034_v27  ;;  %vm7169_vm10 = vcmp.gt.f32.partialorder %v7131_v34, %v2042_v33  ;;  %v11377_v21 = vld [vmem:[#allocation123_spill] sm:$0xff] }
 0x3cd   : > { %11164 = vst [vmem:[#allocation154_spill] sm:$0xff] %v11163_v1  ;;  %v11166_v23 = vsel %vm7164_vm9, 4294967295, %v11165_v23  ;;  %v11169_v2 = vsel %vm7169_vm10, 4294967295, %v11168_v2  ;;  %vm7174_vm6 = vcmp.gt.f32.partialorder %v7134_v31, %v2020_v53  ;;  %vm7179_vm5 = vcmp.gt.f32.partialorder %v7137_v32, %v2028_v61 }
 0x3ce   : > { %11167 = vst [vmem:[#allocation155_spill] sm:$0xff] %v11166_v23  ;;  %11170 = vst [vmem:[#allocation156_spill] sm:$0xff] %v11169_v2  ;;  %v11172_v40 = vsel %vm7174_vm6, 4294967295, %v11171_v40  ;;  %v11174_v7 = vmov 0  ;;  %v7186_v48 = vsel %vm7152_vm7, %v7118_v4, %v2018_v52  ;;  %v7191_v41 = vsel %vm7157_vm8, %v7121_v36, %v2026_v38  ;;  %v11374_v2 = vld [vmem:[#allocation80_spill] sm:$0xff] }
 0x3cf   : > { %11173 = vst [vmem:[#allocation157_spill] sm:$0xff] %v11172_v40  ;;  %v11175_v7 = vsel %vm7179_vm5, 4294967295, %v11174_v7  ;;  %11177 = vst [vmem:[#allocation159_spill] sm:$0xff] %v7186_v48  ;;  %vm7194_vm3 = vcmp.gt.f32.partialorder %v7142_v57, %v2036_v49  ;;  %vm7199_vm2 = vcmp.gt.f32.partialorder %v7145_v18, %v2044_v19  ;;  %v7206_v52 = vsel %vm7174_vm6, %v7134_v31, %v2020_v53  ;;  %v11432_v4 = vld [vmem:[#allocation92_spill] sm:$0xff] }
 0x3d0   : > { %11176 = vst [vmem:[#allocation158_spill] sm:$0xff] %v11175_v7  ;;  %11178 = vst [vmem:[#allocation160_spill] sm:$0xff] %v7191_v41  ;;  %v11180_v22 = vsel %vm7194_vm3, 4294967295, %v11179_v22  ;;  %v11183_v51 = vsel %vm7199_vm2, 4294967295, %v11182_v51  ;;  %v7211_v38 = vsel %vm7179_vm5, %v7137_v32, %v2028_v61  ;;  %v7216_v41 = vsel %vm7164_vm9, %v7126_v15, %v2034_v27 }
 0x3d1   : > { %11181 = vst [vmem:[#allocation161_spill] sm:$0xff] %v11180_v22  ;;  %11184 = vst [vmem:[#allocation162_spill] sm:$0xff] %v11183_v51  ;;  %v7221_v48 = vsel %vm7194_vm3, %v7142_v57, %v2036_v49  ;;  %v7226_v53 = vsel %vm7169_vm10, %v7131_v34, %v2042_v33  ;;  %v7231_v61 = vsel %vm7199_vm2, %v7145_v18, %v2044_v19  ;;  %v11205_v22 = vmov 0 }
 0x3d2   : > { %11185 = vst [vmem:[#allocation163_spill] sm:$0xff] %v7206_v52  ;;  %11186 = vst [vmem:[#allocation164_spill] sm:$0xff] %v7211_v38  ;;  %v5637_v38 = vcombine.high %v1348_v47, %v1348_v47  ;;  %v7234_v52 = vrot.slane %v1373_v29, %v6228_v62  ;;  %v5639_v27 = vcombine.high %v1355_v20, %v1355_v20  ;;  %v11208_v40 = vmov 0 }
 0x3d3   : > { %11187 = vst [vmem:[#allocation165_spill] sm:$0xff] %v7216_v41  ;;  %11188 = vst [vmem:[#allocation166_spill] sm:$0xff] %v7221_v48  ;;  %v7237_v7 = vrot.slane %v1375_v13, %v6228_v62  ;;  %v5641_v49 = vcombine.high %v7088_v42, %v7088_v42  ;;  %v7242_v48 = vrot.slane %v1377_v45, %v6228_v62  ;;  %v11211_v18 = vmov 0 }
 0x3d4   : > { %11189 = vst [vmem:[#allocation167_spill] sm:$0xff] %v7226_v53  ;;  %11190 = vst [vmem:[#allocation168_spill] sm:$0xff] %v7231_v61  ;;  %v5643_v33 = vcombine.high %v7091_v54, %v7091_v54  ;;  %v7247_v19 = vrot.slane %v1379_v5, %v6228_v62  ;;  %v7250_v47 = vrot.slane %v5637_v38, %v6228_v62  ;;  %v3218_v29 = vrot.slane %v7234_v52, 7 }
 0x3d5   : > { %11191 = vst [vmem:[#allocation169_spill] sm:$0xff] %v7234_v52  ;;  %11192 = vst [vmem:[#allocation170_spill] sm:$0xff] %v7237_v7  ;;  %v7253_v20 = vrot.slane %v5639_v27, %v6228_v62  ;;  %v3226_v13 = vrot.slane %v7237_v7, 7  ;;  %v7258_v42 = vrot.slane %v5641_v49, %v6228_v62  ;;  %v3234_v54 = vrot.slane %v7242_v48, 7 }
 0x3d6   : > { %11193 = vst [vmem:[#allocation171_spill] sm:$0xff] %v7242_v48  ;;  %11194 = vst [vmem:[#allocation172_spill] sm:$0xff] %v7247_v19  ;;  %v7261_v45 = vrot.slane %v5643_v33, %v6228_v62  ;;  %v3242_v5 = vrot.slane %v7247_v19, 7  ;;  %v3220_v38 = vrot.slane %v7250_v47, 7  ;;  %vm7268_vm2 = vcmp.gt.f32.partialorder %v7234_v52, %v3218_v29 }
 0x3d7   : > { %11195 = vst [vmem:[#allocation173_spill] sm:$0xff] %v7250_v47  ;;  %11196 = vst [vmem:[#allocation174_spill] sm:$0xff] %v7253_v20  ;;  %v3228_v61 = vrot.slane %v7253_v20, 7  ;;  %v11199_v27 = vmov 0  ;;  %vm7273_vm3 = vcmp.gt.f32.partialorder %v7237_v7, %v3226_v13  ;;  %v11202_v49 = vmov 0 }
 0x3d8   : > { %11197 = vst [vmem:[#allocation175_spill] sm:$0xff] %v7258_v42  ;;  %11198 = vst [vmem:[#allocation176_spill] sm:$0xff] %v7261_v45  ;;  %v11200_v27 = vsel %vm7268_vm2, 4294967295, %v11199_v27  ;;  %v11203_v49 = vsel %vm7273_vm3, 4294967295, %v11202_v49  ;;  %v3236_v33 = vrot.slane %v7258_v42, 7  ;;  %v3244_v51 = vrot.slane %v7261_v45, 7 }
 0x3d9   : > { %11201 = vst [vmem:[#allocation177_spill] sm:$0xff] %v11200_v27  ;;  %11204 = vst [vmem:[#allocation178_spill] sm:$0xff] %v11203_v49  ;;  %vm7280_vm5 = vcmp.gt.f32.partialorder %v7242_v48, %v3234_v54  ;;  %vm7285_vm6 = vcmp.gt.f32.partialorder %v7247_v19, %v3242_v5  ;;  %vm7290_vm10 = vcmp.gt.f32.partialorder %v7250_v47, %v3220_v38  ;;  %v11214_v57 = vmov 0 }
 0x3da   : > { %v11206_v22 = vsel %vm7280_vm5, 4294967295, %v11205_v22  ;;  %v11209_v40 = vsel %vm7285_vm6, 4294967295, %v11208_v40  ;;  %v11212_v18 = vsel %vm7290_vm10, 4294967295, %v11211_v18  ;;  %vm7295_vm9 = vcmp.gt.f32.partialorder %v7253_v20, %v3228_v61 }
 0x3db   : > { %11207 = vst [vmem:[#allocation179_spill] sm:$0xff] %v11206_v22  ;;  %11210 = vst [vmem:[#allocation180_spill] sm:$0xff] %v11209_v40  ;;  %v11215_v57 = vsel %vm7295_vm9, 4294967295, %v11214_v57  ;;  %v7302_v32 = vsel %vm7268_vm2, %v7234_v52, %v3218_v29  ;;  %v7307_v31 = vsel %vm7273_vm3, %v7237_v7, %v3226_v13  ;;  %vm7310_vm8 = vcmp.gt.f32.partialorder %v7258_v42, %v3236_v33 }
 0x3dc   : > { %11213 = vst [vmem:[#allocation181_spill] sm:$0xff] %v11212_v18  ;;  %11216 = vst [vmem:[#allocation182_spill] sm:$0xff] %v11215_v57  ;;  %v11219_v53 = vmov 0  ;;  %vm7315_vm7 = vcmp.gt.f32.partialorder %v7261_v45, %v3244_v51  ;;  %v11222_v41 = vmov 0  ;;  %v7322_v29 = vsel %vm7290_vm10, %v7250_v47, %v3220_v38 }
 0x3dd   : > { %11217 = vst [vmem:[#allocation183_spill] sm:$0xff] %v7302_v32  ;;  %11218 = vst [vmem:[#allocation184_spill] sm:$0xff] %v7307_v31  ;;  %v11220_v53 = vsel %vm7310_vm8, 4294967295, %v11219_v53  ;;  %v11223_v41 = vsel %vm7315_vm7, 4294967295, %v11222_v41  ;;  %v7327_v13 = vsel %vm7295_vm9, %v7253_v20, %v3228_v61  ;;  %v7332_v31 = vsel %vm7280_vm5, %v7242_v48, %v3234_v54 }
 0x3de   : > { %11221 = vst [vmem:[#allocation185_spill] sm:$0xff] %v11220_v53  ;;  %11224 = vst [vmem:[#allocation186_spill] sm:$0xff] %v11223_v41  ;;  %v7337_v32 = vsel %vm7310_vm8, %v7258_v42, %v3236_v33  ;;  %v7342_v38 = vsel %vm7285_vm6, %v7247_v19, %v3242_v5  ;;  %v7347_v61 = vsel %vm7315_vm7, %v7261_v45, %v3244_v51  ;;  %v11245_v40 = vmov 0 }
 0x3df   : > { %11225 = vst [vmem:[#allocation187_spill] sm:$0xff] %v7322_v29  ;;  %11226 = vst [vmem:[#allocation188_spill] sm:$0xff] %v7327_v13  ;;  %v1612_v13 = vcombine.low %v7094_v39, %v7100_v56  ;;  %v1613_v54 = vcombine.high %v7094_v39, %v7100_v56  ;;  %v1628_v33 = vcombine.low %v7097_v24, %v7103_v55  ;;  %v11248_v22 = vmov 0 }
 0x3e0   : > { %11227 = vst [vmem:[#allocation189_spill] sm:$0xff] %v7332_v31  ;;  %11228 = vst [vmem:[#allocation190_spill] sm:$0xff] %v7337_v32  ;;  %v1629_v32 = vcombine.high %v7097_v24, %v7103_v55  ;;  %v7359_v5 = vcombine.high %v6482_v60, %v6482_v60  ;;  %v7363_v51 = vcombine.high %v6487_v59, %v6487_v59  ;;  %v11251_v49 = vmov 0 }
 0x3e1   : > { %11229 = vst [vmem:[#allocation191_spill] sm:$0xff] %v7342_v38  ;;  %11230 = vst [vmem:[#allocation192_spill] sm:$0xff] %v7347_v61  ;;  %v7367_v61 = vcombine.high %v6492_v58, %v6492_v58  ;;  %v7371_v39 = vcombine.high %v6497_v6, %v6497_v6  ;;  %v1620_v56 = vrot.slane %v1612_v13, %v6231_v63  ;;  %v11254_v27 = vmov 0 }
 0x3e2   : > { %v1627_v24 = vrot.slane %v1613_v54, %v6231_v63  ;;  %v7376_v55 = vrot.slane %v1628_v33, %v6231_v63  ;;  %v7379_v60 = vrot.slane %v1629_v32, %v6231_v63  ;;  %v7383_v59 = vcombine.high %v6782_v0, %v6782_v0  ;;  %v11435_v63 = vld [vmem:[#allocation75_spill] sm:$0xff] }
 0x3e3   : > { %v7387_v58 = vcombine.high %v6787_v3, %v6787_v3  ;;  %v7391_v6 = vcombine.high %v6794_v14, %v6794_v14  ;;  %v7395_v13 = vcombine.high %v6799_v8, %v6799_v8  ;;  %v1644_v54 = vcombine.low %v7070_v16, %v1620_v56 }
 0x3e4   : > { %v1645_v32 = vcombine.high %v7070_v16, %v1620_v56  ;;  %v1646_v33 = vcombine.low %v7073_v28, %v1627_v24  ;;  %v1647_v0 = vcombine.high %v7073_v28, %v1627_v24  ;;  %v1648_v3 = vcombine.low %v7076_v26, %v7376_v55 }
 0x3e5   : > { %v1649_v29 = vcombine.high %v7076_v26, %v7376_v55  ;;  %v1650_v14 = vcombine.low %v7079_v17, %v7379_v60  ;;  %v1651_v8 = vcombine.high %v7079_v17, %v7379_v60  ;;  %v5629_v41 = vcombine.low %v1620_v56, %v1620_v56 }
 0x3e6   : > { %v7410_v53 = vrot.slane %v1644_v54, %v6228_v62  ;;  %v5631_v16 = vcombine.low %v1627_v24, %v1627_v24  ;;  %v7413_v57 = vrot.slane %v1646_v33, %v6228_v62  ;;  %v5633_v28 = vcombine.low %v7376_v55, %v7376_v55 }
 0x3e7   : > { %v7418_v18 = vrot.slane %v1648_v3, %v6228_v62  ;;  %v5635_v26 = vcombine.low %v7379_v60, %v7379_v60  ;;  %v7423_v45 = vrot.slane %v1650_v14, %v6228_v62  ;;  %v7426_v17 = vrot.slane %v5629_v41, %v6228_v62 }
 0x3e8   : > { %11231 = vst [vmem:[#allocation193_spill] sm:$0xff] %v7410_v53  ;;  %11232 = vst [vmem:[#allocation194_spill] sm:$0xff] %v7413_v57  ;;  %v7429_v54 = vrot.slane %v5631_v16, %v6228_v62  ;;  %v2050_v33 = vrot.slane %v7410_v53, 7  ;;  %v2058_v42 = vrot.slane %v7413_v57, 7  ;;  %v7434_v20 = vrot.slane %v5633_v28, %v6228_v62 }
 0x3e9   : > { %11233 = vst [vmem:[#allocation195_spill] sm:$0xff] %v7418_v18  ;;  %11234 = vst [vmem:[#allocation196_spill] sm:$0xff] %v7423_v45  ;;  %v7437_v3 = vrot.slane %v5635_v26, %v6228_v62  ;;  %v2066_v47 = vrot.slane %v7418_v18, 7  ;;  %v2074_v14 = vrot.slane %v7423_v45, 7  ;;  %v2052_v41 = vrot.slane %v7426_v17, 7 }
 0x3ea   : > { %11235 = vst [vmem:[#allocation197_spill] sm:$0xff] %v7426_v17  ;;  %11236 = vst [vmem:[#allocation198_spill] sm:$0xff] %v7429_v54  ;;  %v2060_v38 = vrot.slane %v7429_v54, 7  ;;  %vm7444_vm7 = vcmp.gt.f32.partialorder %v7410_v53, %v2050_v33  ;;  %v11239_v16 = vmov 0  ;;  %vm7449_vm8 = vcmp.gt.f32.partialorder %v7413_v57, %v2058_v42 }
 0x3eb   : > { %11237 = vst [vmem:[#allocation199_spill] sm:$0xff] %v7434_v20  ;;  %11238 = vst [vmem:[#allocation200_spill] sm:$0xff] %v7437_v3  ;;  %v11240_v16 = vsel %vm7444_vm7, 4294967295, %v11239_v16  ;;  %v11242_v28 = vmov 0  ;;  %v2068_v26 = vrot.slane %v7434_v20, 7  ;;  %v2076_v31 = vrot.slane %v7437_v3, 7 }
 0x3ec   : > { %11241 = vst [vmem:[#allocation201_spill] sm:$0xff] %v11240_v16  ;;  %v11243_v28 = vsel %vm7449_vm8, 4294967295, %v11242_v28  ;;  %vm7456_vm9 = vcmp.gt.f32.partialorder %v7418_v18, %v2066_v47  ;;  %vm7461_vm10 = vcmp.gt.f32.partialorder %v7423_v45, %v2074_v14  ;;  %vm7466_vm6 = vcmp.gt.f32.partialorder %v7426_v17, %v2052_v41 }
 0x3ed   : > { %11244 = vst [vmem:[#allocation202_spill] sm:$0xff] %v11243_v28  ;;  %v11246_v40 = vsel %vm7456_vm9, 4294967295, %v11245_v40  ;;  %v11249_v22 = vsel %vm7461_vm10, 4294967295, %v11248_v22  ;;  %v11252_v49 = vsel %vm7466_vm6, 4294967295, %v11251_v49  ;;  %vm7471_vm5 = vcmp.gt.f32.partialorder %v7429_v54, %v2060_v38 }
 0x3ee   : > { %11247 = vst [vmem:[#allocation203_spill] sm:$0xff] %v11246_v40  ;;  %11250 = vst [vmem:[#allocation204_spill] sm:$0xff] %v11249_v22  ;;  %v11255_v27 = vsel %vm7471_vm5, 4294967295, %v11254_v27  ;;  %v7478_v19 = vsel %vm7444_vm7, %v7410_v53, %v2050_v33  ;;  %v7483_v48 = vsel %vm7449_vm8, %v7413_v57, %v2058_v42  ;;  %vm7486_vm3 = vcmp.gt.f32.partialorder %v7434_v20, %v2068_v26  ;;  %v11372_v40 = vld [vmem:[#allocation78_spill] sm:$0xff]  ;;  %v11375_v22 = vld [vmem:[#allocation121_spill] sm:$0xff] }
 0x3ef   : > { %11253 = vst [vmem:[#allocation205_spill] sm:$0xff] %v11252_v49  ;;  %11256 = vst [vmem:[#allocation206_spill] sm:$0xff] %v11255_v27  ;;  %v11259_v7 = vmov 0  ;;  %vm7491_vm2 = vcmp.gt.f32.partialorder %v7437_v3, %v2076_v31  ;;  %v11262_v52 = vmov 0  ;;  %v7498_v33 = vsel %vm7466_vm6, %v7426_v17, %v2052_v41 }
 0x3f0   : > { %11257 = vst [vmem:[#allocation207_spill] sm:$0xff] %v7478_v19  ;;  %11258 = vst [vmem:[#allocation208_spill] sm:$0xff] %v7483_v48  ;;  %v11260_v7 = vsel %vm7486_vm3, 4294967295, %v11259_v7  ;;  %v11263_v52 = vsel %vm7491_vm2, 4294967295, %v11262_v52  ;;  %v7503_v42 = vsel %vm7471_vm5, %v7429_v54, %v2060_v38  ;;  %v7508_v48 = vsel %vm7456_vm9, %v7418_v18, %v2066_v47 }
 0x3f1   : > { %11261 = vst [vmem:[#allocation209_spill] sm:$0xff] %v11260_v7  ;;  %11264 = vst [vmem:[#allocation210_spill] sm:$0xff] %v11263_v52  ;;  %v7513_v19 = vsel %vm7486_vm3, %v7434_v20, %v2068_v26  ;;  %v7518_v41 = vsel %vm7461_vm10, %v7423_v45, %v2074_v14  ;;  %v7523_v38 = vsel %vm7491_vm2, %v7437_v3, %v2076_v31  ;;  %v11285_v7 = vmov 0  ;;  %v11378_v45 = vld [vmem:[#allocation124_spill] sm:$0xff] }
 0x3f2   : > { %11265 = vst [vmem:[#allocation211_spill] sm:$0xff] %v7498_v33  ;;  %11266 = vst [vmem:[#allocation212_spill] sm:$0xff] %v7503_v42  ;;  %v5645_v42 = vcombine.high %v1620_v56, %v1620_v56  ;;  %v7526_v33 = vrot.slane %v1645_v32, %v6228_v62  ;;  %v5647_v47 = vcombine.high %v1627_v24, %v1627_v24  ;;  %v11288_v49 = vmov 0 }
 0x3f3   : > { %11267 = vst [vmem:[#allocation213_spill] sm:$0xff] %v7508_v48  ;;  %11268 = vst [vmem:[#allocation214_spill] sm:$0xff] %v7513_v19  ;;  %v7529_v27 = vrot.slane %v1647_v0, %v6228_v62  ;;  %v5649_v26 = vcombine.high %v7376_v55, %v7376_v55  ;;  %v7534_v19 = vrot.slane %v1649_v29, %v6228_v62  ;;  %v11291_v3 = vmov 0 }
 0x3f4   : > { %11269 = vst [vmem:[#allocation215_spill] sm:$0xff] %v7518_v41  ;;  %11270 = vst [vmem:[#allocation216_spill] sm:$0xff] %v7523_v38  ;;  %v5651_v14 = vcombine.high %v7379_v60, %v7379_v60  ;;  %v7539_v31 = vrot.slane %v1651_v8, %v6228_v62  ;;  %v7542_v56 = vrot.slane %v5645_v42, %v6228_v62  ;;  %v3250_v32 = vrot.slane %v7526_v33, 7 }
 0x3f5   : > { %11271 = vst [vmem:[#allocation217_spill] sm:$0xff] %v7526_v33  ;;  %11272 = vst [vmem:[#allocation218_spill] sm:$0xff] %v7529_v27  ;;  %v7545_v24 = vrot.slane %v5647_v47, %v6228_v62  ;;  %v3258_v0 = vrot.slane %v7529_v27, 7  ;;  %v7550_v55 = vrot.slane %v5649_v26, %v6228_v62  ;;  %v3266_v60 = vrot.slane %v7534_v19, 7 }
 0x3f6   : > { %11273 = vst [vmem:[#allocation219_spill] sm:$0xff] %v7534_v19  ;;  %11274 = vst [vmem:[#allocation220_spill] sm:$0xff] %v7539_v31  ;;  %v7553_v29 = vrot.slane %v5651_v14, %v6228_v62  ;;  %v3274_v8 = vrot.slane %v7539_v31, 7  ;;  %v3252_v42 = vrot.slane %v7542_v56, 7  ;;  %vm7560_vm2 = vcmp.gt.f32.partialorder %v7526_v33, %v3250_v32  ;;  %v11433_v62 = vld [vmem:[#allocation73_spill] sm:$0xff] }
 0x3f7   : > { %11275 = vst [vmem:[#allocation221_spill] sm:$0xff] %v7542_v56  ;;  %11276 = vst [vmem:[#allocation222_spill] sm:$0xff] %v7545_v24  ;;  %v3260_v38 = vrot.slane %v7545_v24, 7  ;;  %v11279_v47 = vmov 0  ;;  %vm7565_vm3 = vcmp.gt.f32.partialorder %v7529_v27, %v3258_v0  ;;  %v11282_v26 = vmov 0 }
 0x3f8   : > { %11277 = vst [vmem:[#allocation223_spill] sm:$0xff] %v7550_v55  ;;  %11278 = vst [vmem:[#allocation224_spill] sm:$0xff] %v7553_v29  ;;  %v11280_v47 = vsel %vm7560_vm2, 4294967295, %v11279_v47  ;;  %v11283_v26 = vsel %vm7565_vm3, 4294967295, %v11282_v26  ;;  %v3268_v14 = vrot.slane %v7550_v55, 7  ;;  %v3276_v52 = vrot.slane %v7553_v29, 7 }
 0x3f9   : > { %11281 = vst [vmem:[#allocation225_spill] sm:$0xff] %v11280_v47  ;;  %11284 = vst [vmem:[#allocation226_spill] sm:$0xff] %v11283_v26  ;;  %vm7572_vm5 = vcmp.gt.f32.partialorder %v7534_v19, %v3266_v60  ;;  %vm7577_vm6 = vcmp.gt.f32.partialorder %v7539_v31, %v3274_v8  ;;  %vm7582_vm10 = vcmp.gt.f32.partialorder %v7542_v56, %v3252_v42  ;;  %v11294_v20 = vmov 0  ;;  %v11361_v47 = vld [vmem:[#allocation33_spill] sm:$0xff]  ;;  %v11373_v26 = vld [vmem:[#allocation79_spill] sm:$0xff] }
 0x3fa   : > { %v11286_v7 = vsel %vm7572_vm5, 4294967295, %v11285_v7  ;;  %v11289_v49 = vsel %vm7577_vm6, 4294967295, %v11288_v49  ;;  %v11292_v3 = vsel %vm7582_vm10, 4294967295, %v11291_v3  ;;  %vm7587_vm9 = vcmp.gt.f32.partialorder %v7545_v24, %v3260_v38 }
 0x3fb   : > { %11287 = vst [vmem:[#allocation227_spill] sm:$0xff] %v11286_v7  ;;  %11290 = vst [vmem:[#allocation228_spill] sm:$0xff] %v11289_v49  ;;  %v11295_v20 = vsel %vm7587_vm9, 4294967295, %v11294_v20  ;;  %v7594_v54 = vsel %vm7560_vm2, %v7526_v33, %v3250_v32  ;;  %v7599_v17 = vsel %vm7565_vm3, %v7529_v27, %v3258_v0  ;;  %vm7602_vm8 = vcmp.gt.f32.partialorder %v7550_v55, %v3268_v14  ;;  %v11367_v27 = vld [vmem:[#allocation34_spill] sm:$0xff] }
 0x3fc   : > { %11293 = vst [vmem:[#allocation229_spill] sm:$0xff] %v11292_v3  ;;  %11296 = vst [vmem:[#allocation230_spill] sm:$0xff] %v11295_v20  ;;  %v11299_v41 = vmov 0  ;;  %vm7607_vm7 = vcmp.gt.f32.partialorder %v7553_v29, %v3276_v52  ;;  %v11302_v48 = vmov 0  ;;  %v7614_v32 = vsel %vm7582_vm10, %v7542_v56, %v3252_v42 }
 0x3fd   : > { %11297 = vst [vmem:[#allocation231_spill] sm:$0xff] %v7594_v54  ;;  %11298 = vst [vmem:[#allocation232_spill] sm:$0xff] %v7599_v17  ;;  %v11300_v41 = vsel %vm7602_vm8, 4294967295, %v11299_v41  ;;  %v11303_v48 = vsel %vm7607_vm7, 4294967295, %v11302_v48  ;;  %v7619_v0 = vsel %vm7587_vm9, %v7545_v24, %v3260_v38  ;;  %v7624_v17 = vsel %vm7572_vm5, %v7534_v19, %v3266_v60 }
 0x3fe   : > { %11301 = vst [vmem:[#allocation233_spill] sm:$0xff] %v11300_v41  ;;  %11304 = vst [vmem:[#allocation234_spill] sm:$0xff] %v11303_v48  ;;  %v7629_v54 = vsel %vm7602_vm8, %v7550_v55, %v3268_v14  ;;  %v7634_v42 = vsel %vm7577_vm6, %v7539_v31, %v3274_v8  ;;  %v7639_v38 = vsel %vm7607_vm7, %v7553_v29, %v3276_v52  ;;  %v2023_v60 = vrot.slane %v7363_v51, 7 }
 0x3ff   : > { %11305 = vst [vmem:[#allocation235_spill] sm:$0xff] %v7614_v32  ;;  %11306 = vst [vmem:[#allocation236_spill] sm:$0xff] %v7619_v0  ;;  %v2015_v0 = vrot.slane %v7359_v5, 7  ;;  %v2031_v32 = vrot.slane %v7367_v61, 7  ;;  %v2039_v41 = vrot.slane %v7371_v39, 7  ;;  %v2047_v14 = vrot.slane %v7383_v59, 7 }
 0x400   : > { %11307 = vst [vmem:[#allocation237_spill] sm:$0xff] %v7624_v17  ;;  %11308 = vst [vmem:[#allocation238_spill] sm:$0xff] %v7629_v54  ;;  %v2055_v54 = vrot.slane %v7387_v58, 7  ;;  %v2063_v8 = vrot.slane %v7391_v6, 7  ;;  %v2071_v20 = vrot.slane %v7395_v13, 7  ;;  %v11311_v52 = vmov 0 }
 0x401   : > { %11309 = vst [vmem:[#allocation239_spill] sm:$0xff] %v7634_v42  ;;  %11310 = vst [vmem:[#allocation240_spill] sm:$0xff] %v7639_v38  ;;  %vm7650_vm8 = vcmp.gt.f32.partialorder %v7359_v5, %v2015_v0  ;;  %vm7655_vm7 = vcmp.gt.f32.partialorder %v7363_v51, %v2023_v60  ;;  %v11314_v38 = vmov 0  ;;  %vm7660_vm9 = vcmp.gt.f32.partialorder %v7367_v61, %v2031_v32 }
 0x402   : > { %v11312_v52 = vsel %vm7650_vm8, 4294967295, %v11311_v52  ;;  %v11315_v38 = vsel %vm7655_vm7, 4294967295, %v11314_v38  ;;  %v11317_v48 = vmov 0  ;;  %vm7665_vm10 = vcmp.gt.f32.partialorder %v7371_v39, %v2039_v41 }
 0x403   : > { %11313 = vst [vmem:[#allocation241_spill] sm:$0xff] %v11312_v52  ;;  %11316 = vst [vmem:[#allocation242_spill] sm:$0xff] %v11315_v38  ;;  %v11318_v48 = vsel %vm7660_vm9, 4294967295, %v11317_v48  ;;  %v11320_v3 = vmov 0  ;;  %vm7670_vm6 = vcmp.gt.f32.partialorder %v7383_v59, %v2047_v14  ;;  %v11323_v29 = vmov 0  ;;  %v11415_v52 = vld [vmem:[#allocation86_spill] sm:$0xff] }
 0x404   : > { %11319 = vst [vmem:[#allocation243_spill] sm:$0xff] %v11318_v48  ;;  %v11321_v3 = vsel %vm7665_vm10, 4294967295, %v11320_v3  ;;  %v11324_v29 = vsel %vm7670_vm6, 4294967295, %v11323_v29  ;;  %vm7675_vm5 = vcmp.gt.f32.partialorder %v7387_v58, %v2055_v54  ;;  %v11326_v55 = vmov 0 }
 0x405   : > { %11322 = vst [vmem:[#allocation244_spill] sm:$0xff] %v11321_v3  ;;  %11325 = vst [vmem:[#allocation245_spill] sm:$0xff] %v11324_v29  ;;  %v11327_v55 = vsel %vm7675_vm5, 4294967295, %v11326_v55  ;;  %vm7680_vm3 = vcmp.gt.f32.partialorder %v7391_v6, %v2063_v8  ;;  %v11329_v24 = vmov 0  ;;  %vm7685_vm2 = vcmp.gt.f32.partialorder %v7395_v13, %v2071_v20 }
 0x406   : > { %11328 = vst [vmem:[#allocation246_spill] sm:$0xff] %v11327_v55  ;;  %v11330_v24 = vsel %vm7680_vm3, 4294967295, %v11329_v24  ;;  %v11332_v56 = vmov 0  ;;  %v7692_v42 = vsel %vm7650_vm8, %v7359_v5, %v2015_v0  ;;  %v7697_v17 = vsel %vm7655_vm7, %v7363_v51, %v2023_v60  ;;  %v11405_v55 = vld [vmem:[#allocation45_spill] sm:$0xff] }
 0x407   : > { %11331 = vst [vmem:[#allocation247_spill] sm:$0xff] %v11330_v24  ;;  %v11333_v56 = vsel %vm7685_vm2, 4294967295, %v11332_v56  ;;  %v7702_v49 = vsel %vm7660_vm9, %v7367_v61, %v2031_v32  ;;  %v7707_v7 = vsel %vm7665_vm10, %v7371_v39, %v2039_v41  ;;  %v7712_v5 = vsel %vm7670_vm6, %v7383_v59, %v2047_v14 }
 0x408   : > { %11334 = vst [vmem:[#allocation248_spill] sm:$0xff] %v11333_v56  ;;  %v7717_v51 = vsel %vm7675_vm5, %v7387_v58, %v2055_v54  ;;  %v7722_v61 = vsel %vm7680_vm3, %v7391_v6, %v2063_v8  ;;  %v7727_v39 = vsel %vm7685_vm2, %v7395_v13, %v2071_v20  ;;  %v11335_v41 = vrot.slane %v6335_v37, 7 }
 0x409   : > { %v11336_v59 = vrot.slane %v6253_v9, 7  ;;  %v11338_v6 = vrot.slane %v6339_v43, 7  ;;  %v11339_v54 = vrot.slane %v6257_v10, 7  ;;  %v11341_v13 = vrot.slane %v6343_v44, 7  ;;  %v11413_v9 = vld [vmem:[#allocation85_spill] sm:$0xff] }
 0x40a   : > { %v11342_v0 = vrot.slane %v6261_v11, 7  ;;  %v11344_v14 = vrot.slane %v6347_v46, 7  ;;  %v11345_v8 = vrot.slane %v6265_v12, 7  ;;  %v11356_v58 = vrot.slane %v11355_v25, 7  ;;  %v11409_v12 = vld [vmem:[#allocation49_spill] sm:$0xff]  ;;  %v11411_v11 = vld [vmem:[#allocation51_spill] sm:$0xff] }
 0x40b   : > { %v7735_v32 = vsel %vm6518_vm14, %v11336_v59, %v11335_v41  ;;  %v7747_v20 = vsel %vm6523_vm15, %v11339_v54, %v11338_v6  ;;  %v11347_v59 = vld [vmem:[#allocation41_spill] sm:$0xff]  ;;  %v11349_v54 = vld [vmem:[#allocation31_spill] sm:$0xff]  ;;  %v11362_v31 = vrot.slane %v11361_v47, 7  ;;  %v11368_v33 = vrot.slane %v11367_v27, 7  ;;  %v11404_v47 = vld [vmem:[#allocation60_spill] sm:$0xff] }
 0x40c   : > { %11337 = vst [vmem:[#allocation249_spill] sm:$0xff] %v7735_v32  ;;  %11340 = vst [vmem:[#allocation250_spill] sm:$0xff] %v7747_v20  ;;  %v7759_v60 = vsel %vm6532_vm0, %v11342_v0, %v11341_v13  ;;  %v7771_v41 = vsel %vm6537_vm1, %v11345_v8, %v11344_v14  ;;  %v11348_v6 = vrot.slane %v11347_v59, 7  ;;  %v11350_v13 = vrot.slane %v11349_v54, 7  ;;  %v11353_v14 = vld [vmem:[#allocation42_spill] sm:$0xff]  ;;  %v11407_v54 = vld [vmem:[#allocation47_spill] sm:$0xff] }
 0x40d   : > { %11343 = vst [vmem:[#allocation251_spill] sm:$0xff] %v7759_v60  ;;  %11346 = vst [vmem:[#allocation252_spill] sm:$0xff] %v7771_v41  ;;  %v11354_v8 = vrot.slane %v11353_v14, 7  ;;  %v2919_v28 = vcombine.high %v11372_v40, %v11372_v40  ;;  %v2953_v16 = vcombine.high %v11373_v26, %v11373_v26  ;;  %v2987_v23 = vcombine.high %v11374_v2, %v11374_v2  ;;  %v11410_v41 = vld [vmem:[#allocation50_spill] sm:$0xff] }
 0x40e   : > { %v7783_v30 = vsel %vm6822_vm11, %v11350_v13, %v11348_v6  ;;  %v11359_v6 = vld [vmem:[#allocation43_spill] sm:$0xff]  ;;  %v3089_v19 = vcombine.high %v11377_v21, %v11377_v21  ;;  %vm11414_vm2 = vnez %v11413_v9  ;;  %vm11416_vm3 = vnez %v11415_v52  ;;  %v11419_v9 = vld [vmem:[#allocation88_spill] sm:$0xff]  ;;  %v11442_v21 = vld [vmem:[#allocation141_spill] sm:$0xff] }
 0x40f   : > { %11352 = vst [vmem:[#allocation105_spill] sm:$0xff] %v7783_v30  ;;  %v7795_v35 = vsel %vm6827_vm4, %v11356_v58, %v11354_v8  ;;  %v11360_v13 = vrot.slane %v11359_v6, 7  ;;  %v11365_v58 = vld [vmem:[#allocation44_spill] sm:$0xff]  ;;  %v3223_v40 = vrot.slane %v2919_v28, 7  ;;  %v3231_v57 = vrot.slane %v2953_v16, 7 }
 0x410   : > { %11358 = vst [vmem:[#allocation106_spill] sm:$0xff] %v7795_v35  ;;  %v11366_v8 = vrot.slane %v11365_v58, 7  ;;  %v3239_v53 = vrot.slane %v2987_v23, 7  ;;  %v3263_v15 = vrot.slane %v3089_v19, 7  ;;  %v11406_v35 = vld [vmem:[#allocation46_spill] sm:$0xff]  ;;  %v11408_v30 = vld [vmem:[#allocation48_spill] sm:$0xff] }
 0x411   : > { %v7807_v50 = vsel %vm6834_vm13, %v11362_v31, %v11360_v13  ;;  %v11371_v31 = vld [vmem:[#allocation77_spill] sm:$0xff]  ;;  %vm7845_vm11 = vcmp.gt.f32.partialorder %v2919_v28, %v3223_v40  ;;  %vm7849_vm14 = vcmp.gt.f32.partialorder %v2953_v16, %v3231_v57 }
 0x412   : > { %11364 = vst [vmem:[#allocation107_spill] sm:$0xff] %v7807_v50  ;;  %v7819_v0 = vsel %vm6839_vm12, %v11368_v33, %v11366_v8  ;;  %v2885_v13 = vcombine.high %v11371_v31, %v11371_v31  ;;  %v3021_v33 = vcombine.high %v11375_v22, %v11375_v22  ;;  %v11376_v8 = vld [vmem:[#allocation122_spill] sm:$0xff]  ;;  %v3123_v31 = vcombine.high %v11378_v45, %v11378_v45  ;;  %v11441_v22 = vld [vmem:[#allocation117_spill] sm:$0xff]  ;;  %v11443_v45 = vld [vmem:[#allocation119_spill] sm:$0xff] }
 0x413   : > { %11370 = vst [vmem:[#allocation108_spill] sm:$0xff] %v7819_v0  ;;  %v3055_v1 = vcombine.high %v11376_v8, %v11376_v8  ;;  %vm7853_vm15 = vcmp.gt.f32.partialorder %v2987_v23, %v3239_v53  ;;  %vm7865_vm12 = vcmp.gt.f32.partialorder %v3089_v19, %v3263_v15  ;;  %v7879_v27 = vsel %vm7845_vm11, %v2919_v28, %v3223_v40  ;;  %v11399_v40 = vld [vmem:[#allocation55_spill] sm:$0xff] }
 0x414   : > { %v3215_v18 = vrot.slane %v2885_v13, 7  ;;  %v3247_v26 = vrot.slane %v3021_v33, 7  ;;  %v3271_v2 = vrot.slane %v3123_v31, 7  ;;  %v7883_v56 = vsel %vm7849_vm14, %v2953_v16, %v3231_v57  ;;  %v11396_v16 = vld [vmem:[#allocation18_spill] sm:$0xff]  ;;  %v11444_v8 = vld [vmem:[#allocation143_spill] sm:$0xff] }
 0x415   : > { %v3255_v34 = vrot.slane %v3055_v1, 7  ;;  %v7887_v0 = vsel %vm7853_vm15, %v2987_v23, %v3239_v53  ;;  %v7899_v28 = vsel %vm7865_vm12, %v3089_v19, %v3263_v15  ;;  %v11398_v53 = vld [vmem:[#allocation54_spill] sm:$0xff]  ;;  %v11401_v19 = vld [vmem:[#allocation57_spill] sm:$0xff]  ;;  %v3768_v59 = vrot.slane %v11406_v35, %v11396_v16 }
 0x416   : > { %vm7841_vm4 = vcmp.gt.f32.partialorder %v2885_v13, %v3215_v18  ;;  %vm7857_vm0 = vcmp.gt.f32.partialorder %v3021_v33, %v3247_v26  ;;  %vm7869_vm13 = vcmp.gt.f32.partialorder %v3123_v31, %v3271_v2  ;;  %v3796_v29 = vrot.slane %v11407_v54, %v11396_v16 }
 0x417   : > { %vm7861_vm1 = vcmp.gt.f32.partialorder %v3055_v1, %v3255_v34  ;;  %v7875_v58 = vsel %vm7841_vm4, %v2885_v13, %v3215_v18  ;;  %v7891_v6 = vsel %vm7857_vm0, %v3021_v33, %v3247_v26  ;;  %v7903_v57 = vsel %vm7869_vm13, %v3123_v31, %v3271_v2  ;;  %v11397_v13 = vld [vmem:[#allocation53_spill] sm:$0xff]  ;;  %v11402_v26 = vld [vmem:[#allocation58_spill] sm:$0xff] }
 0x418   : > { %v7895_v18 = vsel %vm7861_vm1, %v3055_v1, %v3255_v34  ;;  %11395 = vst [vmem:[#allocation77_spill] sm:$0xff] %v7903_v57  ;;  %v7907_v23 = vrot.slane %v11397_v13, %v11396_v16  ;;  %v7911_v33 = vrot.slane %v11398_v53, %v11396_v16  ;;  %v7915_v34 = vrot.slane %v11399_v40, %v11396_v16  ;;  %v11400_v1 = vld [vmem:[#allocation56_spill] sm:$0xff]  ;;  %v11403_v13 = vld [vmem:[#allocation59_spill] sm:$0xff] }
 0x419   : > { %v7919_v15 = vrot.slane %v11400_v1, %v11396_v16  ;;  %v7923_v31 = vrot.slane %v11401_v19, %v11396_v16  ;;  %v7927_v2 = vrot.slane %v11402_v26, %v11396_v16  ;;  %v7931_v53 = vrot.slane %v11403_v13, %v11396_v16 }
 0x41a   : > { %v7935_v40 = vrot.slane %v11404_v47, %v11396_v16  ;;  %v3702_v24 = vrot.slane %v7907_v23, 7  ;;  %v3706_v1 = vrot.slane %v7911_v33, 7  ;;  %v3710_v50 = vrot.slane %v7915_v34, 7 }
 0x41b   : > { %v3714_v19 = vrot.slane %v7919_v15, 7  ;;  %v3718_v14 = vrot.slane %v7923_v31, 7  ;;  %v3722_v26 = vrot.slane %v7927_v2, 7  ;;  %v3726_v25 = vrot.slane %v7931_v53, 7 }
 0x41c   : > { %v3730_v13 = vrot.slane %v7935_v40, 7  ;;  %v3740_v47 = vrot.slane %v11405_v55, %v11396_v16  ;;  %v3824_v46 = vrot.slane %v11408_v30, %v11396_v16  ;;  %v3852_v3 = vrot.slane %v11409_v12, %v11396_v16  ;;  %v11412_v55 = vld [vmem:[#allocation52_spill] sm:$0xff] }
 0x41d   : > { %v3880_v44 = vrot.slane %v11410_v41, %v11396_v16  ;;  %v3908_v48 = vrot.slane %v11411_v11, %v11396_v16  ;;  %v3936_v60 = vrot.slane %v11412_v55, %v11396_v16  ;;  %v3962_v35 = vrot.slane %v3768_v59, 7  ;;  %v11417_v55 = vld [vmem:[#allocation87_spill] sm:$0xff] }
 0x41e   : > { %v3958_v43 = vrot.slane %v3740_v47, 7  ;;  %v3966_v10 = vrot.slane %v3796_v29, 7  ;;  %v3970_v38 = vrot.slane %v3824_v46, 7  ;;  %v3974_v54 = vrot.slane %v3852_v3, 7 }
 0x41f   : > { %v3978_v20 = vrot.slane %v3880_v44, 7  ;;  %v3982_v37 = vrot.slane %v3908_v48, 7  ;;  %v3986_v30 = vrot.slane %v3936_v60, 7  ;;  %v3991_v41 = vsel %vm7841_vm4, %v7907_v23, %v3740_v47  ;;  %v11446_v23 = vld [vmem:[#allocation249_spill] sm:$0xff] }
 0x420   : > { %v3990_v12 = vsel %vm11414_vm2, %v3702_v24, %v3958_v43  ;;  %v3998_v11 = vsel %vm11416_vm3, %v3706_v1, %v3962_v35  ;;  %v3999_v16 = vsel %vm7845_vm11, %v7911_v33, %v3768_v59  ;;  %vm11418_vm5 = vnez %v11417_v55  ;;  %v11421_v24 = vld [vmem:[#allocation129_spill] sm:$0xff]  ;;  %v11423_v55 = vld [vmem:[#allocation130_spill] sm:$0xff]  ;;  %v11425_v35 = vld [vmem:[#allocation131_spill] sm:$0xff] }
 0x421   : > { %v4006_v32 = vsel %vm11418_vm5, %v3710_v50, %v3966_v10  ;;  %v4007_v57 = vsel %vm7849_vm14, %v7915_v34, %v3796_v29  ;;  %vm11420_vm2 = vnez %v11419_v9  ;;  %v4015_v36 = vsel %vm7853_vm15, %v7919_v15, %v3824_v46  ;;  %v11427_v59 = vld [vmem:[#allocation132_spill] sm:$0xff]  ;;  %v11429_v50 = vld [vmem:[#allocation67_spill] sm:$0xff]  ;;  %v11449_v34 = vld [vmem:[#allocation37_spill] sm:$0xff] }
 0x422   : > { %v4014_v43 = vsel %vm11420_vm2, %v3714_v19, %v3970_v38  ;;  %vm11422_vm3 = vnez %v11421_v24  ;;  %v4023_v52 = vsel %vm7857_vm0, %v7923_v31, %v3852_v3  ;;  %vm11424_vm5 = vnez %v11423_v55  ;;  %v11452_v19 = vld [vmem:[#allocation250_spill] sm:$0xff]  ;;  %v11459_v55 = vld [vmem:[#allocation251_spill] sm:$0xff] }
 0x423   : > { %v4022_v47 = vsel %vm11422_vm3, %v3718_v14, %v3974_v54  ;;  %v4030_v10 = vsel %vm11424_vm5, %v3722_v26, %v3978_v20  ;;  %v4031_v29 = vsel %vm7861_vm1, %v7927_v2, %v3880_v44  ;;  %vm11426_vm4 = vnez %v11425_v35  ;;  %v11430_v20 = vld [vmem:[#allocation91_spill] sm:$0xff]  ;;  %v11431_v44 = vld [vmem:[#allocation68_spill] sm:$0xff]  ;;  %v11456_v9 = vld [vmem:[#allocation38_spill] sm:$0xff] }
 0x424   : > { %v4038_v38 = vsel %vm11426_vm4, %v3726_v25, %v3982_v37  ;;  %v4039_v46 = vsel %vm7865_vm12, %v7931_v53, %v3908_v48  ;;  %vm11428_vm11 = vnez %v11427_v59  ;;  %v4047_v3 = vsel %vm7869_vm13, %v7935_v40, %v3936_v60  ;;  %v11434_v37 = vld [vmem:[#allocation97_spill] sm:$0xff]  ;;  %v11436_v48 = vld [vmem:[#allocation99_spill] sm:$0xff]  ;;  %v11440_v14 = vld [vmem:[#allocation136_spill] sm:$0xff] }
 0x425   : > { %v4046_v54 = vsel %vm11428_vm11, %v3730_v13, %v3986_v30  ;;  %vm10828_vm14 = vcmp.gt.f32.partialorder %v11430_v20, %v11429_v50  ;;  %v11437_v25 = vld [vmem:[#allocation111_spill] sm:$0xff]  ;;  %v11439_v30 = vld [vmem:[#allocation112_spill] sm:$0xff]  ;;  %vm4095_vm12 = vcmp.gt.f32.partialorder %v7895_v18, %v7717_v51  ;;  %vm4102_vm2 = vcmp.gt.f32.partialorder %v11442_v21, %v11441_v22  ;;  %v11445_v13 = vld [vmem:[#allocation77_spill] sm:$0xff] }
 0x426   : > { %v11438_v60 = vld [vmem:[#allocation135_spill] sm:$0xff]  ;;  %vm4094_vm11 = vcmp.gt.f32.partialorder %v11440_v14, %v11439_v30  ;;  %vm4103_vm13 = vcmp.gt.f32.partialorder %v7899_v28, %v7722_v61  ;;  %vm4111_vm5 = vcmp.gt.f32.partialorder %v11445_v13, %v7727_v39  ;;  %vm10841_vm1 = vcmask 1041409   ;;  %v11455_v2 = vld [vmem:[#allocation24_spill] sm:$0xff]  ;;  %v11462_v59 = vld [vmem:[#allocation25_spill] sm:$0xff] }
 0x427   : > { %vm10839_vm0 = vcmask 1045509   ;;  %vm10837_vm15 = vcmask 1047559   ;;  %v4856_v53 = vsel %vm10828_vm14, %v3990_v12, %v11446_v23  ;;  %v11448_v40 = vld [vmem:[#allocation23_spill] sm:$0xff]  ;;  %vm11451_vm3 = vcmp.gt.f32.partialorder %v7875_v58, %v7692_v42 }
 0x428   : > { %v11450_v1 = vsel %vm7650_vm8, %v11448_v40, %v11449_v34  ;;  %vm11453_vm4 = vcmp.gt.f32.partialorder %v11432_v4, %v11431_v44  ;;  %v11457_v24 = vsel %vm7655_vm7, %v11455_v2, %v11456_v9  ;;  %vm11458_vm14 = vcmp.gt.f32.partialorder %v7879_v27, %v7697_v17  ;;  %v11463_v23 = vld [vmem:[#allocation39_spill] sm:$0xff]  ;;  %v11466_v40 = vld [vmem:[#allocation252_spill] sm:$0xff]  ;;  %v11473_v2 = vld [vmem:[#allocation105_spill] sm:$0xff] }
 0x429   : > { %v4857_v15 = vsel %vm11451_vm3, %v3991_v41, %v11450_v1  ;;  %v4864_v31 = vsel %vm11453_vm4, %v3998_v11, %v11452_v19  ;;  %v4865_v12 = vsel %vm11458_vm14, %v3999_v16, %v11457_v24  ;;  %vm11460_vm8 = vcmp.gt.f32.partialorder %v11434_v37, %v11433_v62  ;;  %v11469_v1 = vld [vmem:[#allocation26_spill] sm:$0xff]  ;;  %v11470_v19 = vld [vmem:[#allocation40_spill] sm:$0xff]  ;;  %v11476_v24 = vld [vmem:[#allocation31_spill] sm:$0xff] }
 0x42a   : > { %v4872_v35 = vsel %vm11460_vm8, %v4006_v32, %v11459_v55  ;;  %v11464_v33 = vsel %vm7660_vm9, %v11462_v59, %v11463_v23  ;;  %vm11465_vm3 = vcmp.gt.f32.partialorder %v7883_v56, %v7702_v49  ;;  %vm11467_vm7 = vcmp.gt.f32.partialorder %v11436_v48, %v11435_v63  ;;  %v11477_v55 = vld [vmem:[#allocation41_spill] sm:$0xff]  ;;  %v11480_v59 = vld [vmem:[#allocation106_spill] sm:$0xff] }
 0x42b   : > { %v4873_v11 = vsel %vm11465_vm3, %v4007_v57, %v11464_v33  ;;  %v4880_v34 = vsel %vm11467_vm7, %v4014_v43, %v11466_v40  ;;  %v11471_v26 = vsel %vm7665_vm10, %v11469_v1, %v11470_v19  ;;  %vm11472_vm14 = vcmp.gt.f32.partialorder %v7887_v0, %v7707_v7  ;;  %v11483_v33 = vld [vmem:[#allocation32_spill] sm:$0xff]  ;;  %v11484_v40 = vld [vmem:[#allocation42_spill] sm:$0xff]  ;;  %v11486_v1 = vld [vmem:[#allocation107_spill] sm:$0xff] }
 0x42c   : > { %v4881_v32 = vsel %vm11472_vm14, %v4015_v36, %v11471_v26  ;;  %vm11474_vm9 = vcmp.gt.f32.partialorder %v11438_v60, %v11437_v25  ;;  %v11478_v41 = vsel %vm7670_vm6, %v11476_v24, %v11477_v55  ;;  %vm11479_vm4 = vcmp.gt.f32.partialorder %v7891_v6, %v7712_v5  ;;  %v11481_v36 = vld [vmem:[#allocation246_spill] sm:$0xff]  ;;  %v11489_v26 = vld [vmem:[#allocation33_spill] sm:$0xff]  ;;  %v11492_v24 = vld [vmem:[#allocation108_spill] sm:$0xff] }
 0x42d   : > { %v4888_v9 = vsel %vm11474_vm9, %v4022_v47, %v11473_v2  ;;  %v4889_v43 = vsel %vm11479_vm4, %v4023_v52, %v11478_v41  ;;  %v4896_v23 = vsel %vm4094_vm11, %v4030_v10, %v11480_v59  ;;  %vm11482_vm10 = vnez %v11481_v36  ;;  %v11487_v52 = vld [vmem:[#allocation247_spill] sm:$0xff]  ;;  %v11496_v41 = vld [vmem:[#allocation34_spill] sm:$0xff]  ;;  %v11497_v59 = vld [vmem:[#allocation44_spill] sm:$0xff] }
 0x42e   : > { %v11485_v16 = vsel %vm11482_vm10, %v11483_v33, %v11484_v40  ;;  %v4904_v19 = vsel %vm4102_vm2, %v4038_v38, %v11486_v1  ;;  %vm11488_vm6 = vnez %v11487_v52  ;;  %v11490_v2 = vld [vmem:[#allocation43_spill] sm:$0xff]  ;;  %vm11493_vm8 = vcmp.gt.f32.partialorder %v11444_v8, %v11443_v45 }
 0x42f   : > { %v4897_v47 = vsel %vm4095_vm12, %v4031_v29, %v11485_v16  ;;  %v11491_v57 = vsel %vm11488_vm6, %v11489_v26, %v11490_v2  ;;  %v4912_v55 = vsel %vm11493_vm8, %v4046_v54, %v11492_v24  ;;  %v11494_v29 = vld [vmem:[#allocation248_spill] sm:$0xff]  ;;  %v4920_v33 = vrot.slane %v4856_v53, 1 }
 0x430   : > { %v4905_v10 = vsel %vm4103_vm13, %v4039_v46, %v11491_v57  ;;  %vm11495_vm3 = vnez %v11494_v29  ;;  %v4948_v40 = vrot.slane %v4864_v31, 1  ;;  %v4976_v16 = vrot.slane %v4872_v35, 1 }
 0x431   : > { %v11498_v36 = vsel %vm11495_vm3, %v11496_v41, %v11497_v59  ;;  %v5004_v1 = vrot.slane %v4880_v34, 1  ;;  %v5032_v52 = vrot.slane %v4888_v9, 1  ;;  %v5060_v46 = vrot.slane %v4896_v23, 1 }
 0x432   : > { %v4913_v38 = vsel %vm4111_vm5, %v4047_v3, %v11498_v36  ;;  %v5088_v26 = vrot.slane %v4904_v19, 1  ;;  %v5116_v2 = vrot.slane %v4912_v55, 1  ;;  %v4923_v57 = vsel %vm10841_vm1, %v4857_v15, %v4920_v33 }
 0x433   : > { %v4951_v54 = vsel %vm10841_vm1, %v4865_v12, %v4948_v40  ;;  %v4979_v24 = vsel %vm10841_vm1, %v4873_v11, %v4976_v16  ;;  %v5007_v29 = vsel %vm10841_vm1, %v4881_v32, %v5004_v1  ;;  %vm11499_vm7 = vcmask 1043459  }
 0x434   : > { %v4924_v41 = vsel %vm11499_vm7, %v4857_v15, %v4923_v57  ;;  %vm11500_vm14 = vmmov %vm11499_vm7  ;;  %v5035_v33 = vsel %vm10841_vm1, %v4889_v43, %v5032_v52  ;;  %v5063_v40 = vsel %vm10841_vm1, %v4897_v47, %v5060_v46  ;;  %v5091_v16 = vsel %vm10841_vm1, %v4905_v10, %v5088_v26 }
 0x435   : > { %v4952_v3 = vsel %vm11500_vm14, %v4865_v12, %v4951_v54  ;;  %vm11501_vm9 = vmmov %vm11499_vm7  ;;  %v4925_v35 = vsel %vm10839_vm0, %v4857_v15, %v4924_v41  ;;  %v5119_v1 = vsel %vm10841_vm1, %v4913_v38, %v5116_v2  ;;  %vm11508_vm14 = vcmp.gt.f32.partialorder %v7875_v58, %v7692_v42 }
 0x436   : > { %v4980_v53 = vsel %vm11501_vm9, %v4873_v11, %v4979_v24  ;;  %vm11502_vm4 = vmmov %vm11499_vm7  ;;  %v4953_v34 = vsel %vm10839_vm0, %v4865_v12, %v4952_v3  ;;  %v4926_v19 = vsel %vm10837_vm15, %v4857_v15, %v4925_v35  ;;  %vm11507_vm7 = vcmp.gt.f32.partialorder %v11430_v20, %v11429_v50 }
 0x437   : > { %v5008_v31 = vsel %vm11502_vm4, %v4881_v32, %v5007_v29  ;;  %v4981_v9 = vsel %vm10839_vm0, %v4873_v11, %v4980_v53  ;;  %v4954_v55 = vsel %vm10837_vm15, %v4865_v12, %v4953_v34  ;;  %vm11503_vm10 = vmmov %vm11502_vm4  ;;  %v4118_v35 = vsel %vm11507_vm7, %v11430_v20, %v11429_v50 }
 0x438   : > { %v5009_v23 = vsel %vm10839_vm0, %v4881_v32, %v5008_v31  ;;  %v4982_v59 = vsel %vm10837_vm15, %v4873_v11, %v4981_v9  ;;  %v5036_v57 = vsel %vm11503_vm10, %v4889_v43, %v5035_v33  ;;  %vm11504_vm6 = vmmov %vm11502_vm4  ;;  %v5144_v41 = vcombine.low %v4926_v19, %v4954_v55 }
 0x439   : > { %v5010_v36 = vsel %vm10837_vm15, %v4881_v32, %v5009_v23  ;;  %v5064_v54 = vsel %vm11504_vm6, %v4897_v47, %v5063_v40  ;;  %vm11505_vm8 = vmmov %vm11502_vm4  ;;  %v5037_v11 = vsel %vm10839_vm0, %v4889_v43, %v5036_v57  ;;  %vm11509_vm9 = vcmp.gt.f32.partialorder %v11432_v4, %v11431_v44 }
 0x43a   : > { %v5092_v15 = vsel %vm11505_vm8, %v4905_v10, %v5091_v16  ;;  %vm11506_vm3 = vmmov %vm11502_vm4  ;;  %v5065_v32 = vsel %vm10839_vm0, %v4897_v47, %v5064_v54  ;;  %v5038_v26 = vsel %vm10837_vm15, %v4889_v43, %v5037_v11  ;;  %v5153_v3 = vcombine.low %v4982_v59, %v5010_v36 }
 0x43b   : > { %v5120_v12 = vsel %vm11506_vm3, %v4913_v38, %v5119_v1  ;;  %v5093_v52 = vsel %vm10839_vm0, %v4905_v10, %v5092_v15  ;;  %v5066_v2 = vsel %vm10837_vm15, %v4897_v47, %v5065_v32  ;;  %v4119_v43 = vsel %vm11508_vm14, %v7875_v58, %v7692_v42 }
 0x43c   : > { %v5121_v46 = vsel %vm10839_vm0, %v4913_v38, %v5120_v12  ;;  %v5094_v24 = vsel %vm10837_vm15, %v4905_v10, %v5093_v52  ;;  %v5162_v53 = vcombine.low %v5038_v26, %v5066_v2  ;;  %v4126_v47 = vsel %vm11509_vm9, %v11432_v4, %v11431_v44 }
 0x43d   : > { %v5122_v29 = vsel %vm10837_vm15, %v4913_v38, %v5121_v46  ;;  %vm11510_vm4 = vcmp.gt.f32.partialorder %v7879_v27, %v7697_v17  ;;  %v11511_v38 = vld [vmem:[#allocation16_spill] sm:$0xff]  ;;  %vm11516_vm10 = vcmp.gt.f32.partialorder %v11434_v37, %v11433_v62  ;;  %vm11517_vm6 = vcmp.gt.f32.partialorder %v7883_v56, %v7702_v49 }
 0x43e   : > { %v5171_v31 = vcombine.low %v5094_v24, %v5122_v29  ;;  %v4127_v10 = vsel %vm11510_vm4, %v7879_v27, %v7697_v17  ;;  %v8182_v50 = vrot.slane %v5144_v41, %v11511_v38  ;;  %v8185_v20 = vrot.slane %v5153_v3, %v11511_v38 }
 0x43f   : > { %v8188_v42 = vrot.slane %v5162_v53, %v11511_v38  ;;  %v4134_v44 = vsel %vm11516_vm10, %v11434_v37, %v11433_v62  ;;  %v4135_v27 = vsel %vm11517_vm6, %v7883_v56, %v7702_v49  ;;  %vm11518_vm8 = vcmp.gt.f32.partialorder %v11436_v48, %v11435_v63 }
 0x440   : > { %11512 = vst [vmem:[#allocation78_spill] sm:$0xff] %v8182_v50  ;;  %11513 = vst [vmem:[#allocation79_spill] sm:$0xff] %v8185_v20  ;;  %v8191_v58 = vrot.slane %v5171_v31, %v11511_v38  ;;  %v4142_v17 = vsel %vm11518_vm8, %v11436_v48, %v11435_v63  ;;  %vm11519_vm3 = vcmp.gt.f32.partialorder %v7887_v0, %v7707_v7 }
 0x441   : > { %11514 = vst [vmem:[#allocation80_spill] sm:$0xff] %v8188_v42  ;;  %v4143_v4 = vsel %vm11519_vm3, %v7887_v0, %v7707_v7  ;;  %v5660_v62 = vcombine.high %v8182_v50, %v8185_v20  ;;  %vm11520_vm7 = vcmp.gt.f32.partialorder %v11438_v60, %v11437_v25  ;;  %vm11521_vm14 = vcmp.gt.f32.partialorder %v7891_v6, %v7712_v5 }
 0x442   : > { %11515 = vst [vmem:[#allocation121_spill] sm:$0xff] %v8191_v58  ;;  %v5661_v37 = vcombine.high %v8188_v42, %v8191_v58  ;;  %v4150_v49 = vsel %vm11520_vm7, %v11438_v60, %v11437_v25  ;;  %v4151_v56 = vsel %vm11521_vm14, %v7891_v6, %v7712_v5  ;;  %v4158_v7 = vsel %vm4094_vm11, %v11440_v14, %v11439_v30  ;;  %v11522_v6 = vld [vmem:[#allocation15_spill] sm:$0xff] }
 0x443   : > { %v4159_v0 = vsel %vm4095_vm12, %v7895_v18, %v7717_v51  ;;  %v4166_v63 = vsel %vm4102_vm2, %v11442_v21, %v11441_v22  ;;  %v4167_v5 = vsel %vm4103_vm13, %v7899_v28, %v7722_v61  ;;  %v5313_v48 = vrot.slane %v5660_v62, %v11522_v6 }
 0x444   : > { %v5320_v25 = vrot.slane %v5661_v37, %v11522_v6  ;;  %vm11523_vm12 = vcmp.gt.f32.partialorder %v11444_v8, %v11443_v45  ;;  %v4175_v18 = vsel %vm4111_vm5, %v11445_v13, %v7727_v39  ;;  %v4246_v60 = vrot.slane %v4118_v35, 1  ;;  %v11534_v37 = vld [vmem:[#allocation62_spill] sm:$0xff] }
 0x445   : > { %v4174_v51 = vsel %vm11523_vm12, %v11444_v8, %v11443_v45  ;;  %v4280_v30 = vrot.slane %v4126_v47, 1  ;;  %v4308_v14 = vrot.slane %v4134_v44, 1  ;;  %v4336_v61 = vrot.slane %v4142_v17, 1 }
 0x446   : > { %v5321_v28 = vcombine.low %v5313_v48, %v5320_v25  ;;  %v4364_v22 = vrot.slane %v4150_v49, 1  ;;  %v4392_v21 = vrot.slane %v4158_v7, 1  ;;  %v4420_v34 = vrot.slane %v4166_v63, 1  ;;  %v11538_v48 = vld [vmem:[#allocation64_spill] sm:$0xff] }
 0x447   : > { %v4252_v9 = vsel %vm10841_vm1, %v4119_v43, %v4246_v60  ;;  %v4283_v23 = vsel %vm10841_vm1, %v4127_v10, %v4280_v30  ;;  %v4311_v45 = vsel %vm10841_vm1, %v4135_v27, %v4308_v14  ;;  %v4339_v8 = vsel %vm10841_vm1, %v4143_v4, %v4336_v61  ;;  %v11540_v60 = vld [vmem:[#allocation102_spill] sm:$0xff]  ;;  %v11541_v14 = vld [vmem:[#allocation103_spill] sm:$0xff] }
 0x448   : > { %5322 = vrot.lane.b32.xlu0 %v5321_v28, %s5855_s12  ;;  %vm11524_vm2 = vcmask 1043459   ;;  %v4367_v15 = vsel %vm10841_vm1, %v4151_v56, %v4364_v22  ;;  %v4395_v12 = vsel %vm10841_vm1, %v4159_v0, %v4392_v21  ;;  %v4423_v11 = vsel %vm10841_vm1, %v4167_v5, %v4420_v34  ;;  %v11542_v28 = vld [vmem:[#allocation104_spill] sm:$0xff] }
 0x449   : > { %v4254_v39 = vsel %vm11524_vm2, %v4119_v43, %v4252_v9  ;;  %vm11525_vm13 = vmmov %vm11524_vm2  ;;  %v4448_v32 = vrot.slane %v4174_v51, 1  ;;  %v1728_v49 = vcombine.high %v11534_v37, %v11534_v37  ;;  %v1796_v25 = vcombine.high %v11538_v48, %v11538_v48  ;;  %v11539_v51 = vld [vmem:[#allocation101_spill] sm:$0xff]  ;;  %v11583_v48 = vld [vmem:[#allocation30_spill] sm:$0xff] }
 0x44a   : > { %v4284_v13 = vsel %vm11525_vm13, %v4127_v10, %v4283_v23  ;;  %vm11526_vm5 = vmmov %vm11524_vm2  ;;  %v4256_v59 = vsel %vm10839_vm0, %v4119_v43, %v4254_v39  ;;  %v1864_v30 = vcombine.high %v11540_v60, %v11540_v60  ;;  %v1898_v61 = vcombine.high %v11541_v14, %v11541_v14 }
 0x44b   : > { %v4312_v19 = vsel %vm11526_vm5, %v4135_v27, %v4311_v45  ;;  %vm11527_vm11 = vmmov %vm11524_vm2  ;;  %v4285_v36 = vsel %vm10839_vm0, %v4127_v10, %v4284_v13  ;;  %v4258_v16 = vsel %vm10837_vm15, %v4119_v43, %v4256_v59  ;;  %v4451_v3 = vsel %vm10841_vm1, %v4175_v18, %v4448_v32 }
 0x44c   : > { %v4340_v55 = vsel %vm11527_vm11, %v4143_v4, %v4339_v8  ;;  %v4313_v33 = vsel %vm10839_vm0, %v4135_v27, %v4312_v19  ;;  %v4286_v1 = vsel %vm10837_vm15, %v4127_v10, %v4285_v36  ;;  %vm11528_vm9 = vmmov %vm11524_vm2  ;;  %v1932_v22 = vcombine.high %v11542_v28, %v11542_v28 }
 0x44d   : > { %v4341_v40 = vsel %vm10839_vm0, %v4143_v4, %v4340_v55  ;;  %v4314_v57 = vsel %vm10837_vm15, %v4135_v27, %v4313_v33  ;;  %v4368_v52 = vsel %vm11528_vm9, %v4151_v56, %v4367_v15  ;;  %vm11529_vm4 = vmmov %vm11524_vm2  ;;  %v4508_v2 = vcombine.low %v4258_v16, %v4286_v1 }
 0x44e   : > { %v4342_v54 = vsel %vm10837_vm15, %v4143_v4, %v4341_v40  ;;  %v4396_v46 = vsel %vm11529_vm4, %v4159_v0, %v4395_v12  ;;  %vm11530_vm10 = vmmov %vm11524_vm2  ;;  %v4369_v24 = vsel %vm10839_vm0, %v4151_v56, %v4368_v52  ;;  %v11533_v4 = vld [vmem:[#allocation61_spill] sm:$0xff]  ;;  %v2025_v23 = vrot.slane %v1728_v49, 7 }
 0x44f   : > { %v4424_v26 = vsel %vm11530_vm10, %v4167_v5, %v4423_v11  ;;  %v4397_v29 = vsel %vm10839_vm0, %v4159_v0, %v4396_v46  ;;  %v4370_v53 = vsel %vm10837_vm15, %v4151_v56, %v4369_v24  ;;  %vm11531_vm6 = vmmov %vm11524_vm2  ;;  %v8292_v10 = vrot.slane %v4508_v2, %v11511_v38  ;;  %v11535_v56 = vld [vmem:[#allocation63_spill] sm:$0xff] }
 0x450   : > { %v4425_v41 = vsel %vm10839_vm0, %v4167_v5, %v4424_v26  ;;  %v4398_v31 = vsel %vm10837_vm15, %v4159_v0, %v4397_v29  ;;  %v4452_v43 = vsel %vm11531_vm6, %v4175_v18, %v4451_v3  ;;  %v4517_v44 = vcombine.low %v4314_v57, %v4342_v54 }
 0x451   : > { %v4426_v35 = vsel %vm10837_vm15, %v4167_v5, %v4425_v41  ;;  %v4453_v47 = vsel %vm10839_vm0, %v4175_v18, %v4452_v43  ;;  %11532 = vst [vmem:[#allocation122_spill] sm:$0xff] %v8292_v10  ;;  %v4526_v27 = vcombine.low %v4370_v53, %v4398_v31  ;;  %v1694_v62 = vcombine.high %v11533_v4, %v11533_v4  ;;  %v11568_v53 = vld [vmem:[#allocation22_spill] sm:$0xff]  ;;  %v11569_v31 = vld [vmem:[#allocation11_spill] sm:$0xff]  ;;  %v11571_v43 = vld [vmem:[#allocation12_spill] sm:$0xff] }
 0x452   : > { %v4454_v17 = vsel %vm10837_vm15, %v4175_v18, %v4453_v47  ;;  %v1762_v7 = vcombine.high %v11535_v56, %v11535_v56  ;;  %v8302_v0 = vrot.slane %v4517_v44, %v11511_v38  ;;  %v1830_v18 = vcombine.high %v11539_v51, %v11539_v51  ;;  %v11573_v44 = vld [vmem:[#allocation13_spill] sm:$0xff] }
 0x453   : > { %v8305_v63 = vrot.slane %v4526_v27, %v11511_v38  ;;  %v4535_v5 = vcombine.low %v4426_v35, %v4454_v17  ;;  %v2017_v9 = vrot.slane %v1694_v62, 7  ;;  %v2041_v8 = vrot.slane %v1796_v25, 7  ;;  %v11575_v17 = vld [vmem:[#allocation14_spill] sm:$0xff] }
 0x454   : > { %11536 = vst [vmem:[#allocation123_spill] sm:$0xff] %v8302_v0  ;;  %v5652_v34 = vcombine.high %v8292_v10, %v8302_v0  ;;  %v2033_v45 = vrot.slane %v1762_v7, 7  ;;  %v2049_v39 = vrot.slane %v1830_v18, 7  ;;  %v2057_v13 = vrot.slane %v1864_v30, 7  ;;  %v11599_v0 = vld [vmem:[#allocation21_spill] sm:$0xff] }
 0x455   : > { %11537 = vst [vmem:[#allocation124_spill] sm:$0xff] %v8305_v63  ;;  %v8318_v21 = vrot.slane %v4535_v5, %v11511_v38  ;;  %v2065_v59 = vrot.slane %v1898_v61, 7  ;;  %v2073_v36 = vrot.slane %v1932_v22, 7  ;;  %vm8325_vm8 = vcmp.gt.f32.partialorder %v1694_v62, %v2017_v9  ;;  %v11686_v38 = vld [vmem:[#allocation74_spill] sm:$0xff] }
 0x456   : > { %v4686_v55 = vrot.slane %v5652_v34, %v11522_v6  ;;  %v11544_v33 = vmov 0  ;;  %vm8329_vm3 = vcmp.gt.f32.partialorder %v1728_v49, %v2025_v23  ;;  %v11547_v40 = vmov 0  ;;  %v11585_v34 = vld [vmem:[#allocation7_spill] sm:$0xff] }
 0x457   : > { %11543 = vst [vmem:[#allocation18_spill] sm:$0xff] %v8318_v21  ;;  %v5653_v19 = vcombine.high %v8305_v63, %v8318_v21  ;;  %v11545_v33 = vsel %vm8325_vm8, 4294967295, %v11544_v33  ;;  %v11548_v40 = vsel %vm8329_vm3, 4294967295, %v11547_v40  ;;  %vm8333_vm7 = vcmp.gt.f32.partialorder %v1762_v7, %v2033_v45 }
 0x458   : > { %11546 = vst [vmem:[#allocation85_spill] sm:$0xff] %v11545_v33  ;;  %11549 = vst [vmem:[#allocation86_spill] sm:$0xff] %v11548_v40  ;;  %v11550_v16 = vmov 0  ;;  %vm8337_vm14 = vcmp.gt.f32.partialorder %v1796_v25, %v2041_v8  ;;  %v11553_v1 = vmov 0  ;;  %vm8342_vm12 = vcmp.gt.f32.partialorder %v1830_v18, %v2049_v39  ;;  %v11668_v33 = vld [vmem:[#allocation90_spill] sm:$0xff] }
 0x459   : > { %v11551_v16 = vsel %vm8333_vm7, 4294967295, %v11550_v16  ;;  %v11554_v1 = vsel %vm8337_vm14, 4294967295, %v11553_v1  ;;  %v4693_v57 = vrot.slane %v5653_v19, %v11522_v6  ;;  %v11556_v54 = vmov 0  ;;  %v11684_v6 = vld [vmem:[#allocation72_spill] sm:$0xff] }
 0x45a   : > { %11552 = vst [vmem:[#allocation87_spill] sm:$0xff] %v11551_v16  ;;  %11555 = vst [vmem:[#allocation88_spill] sm:$0xff] %v11554_v1  ;;  %v11557_v54 = vsel %vm8342_vm12, 4294967295, %v11556_v54  ;;  %vm8346_vm2 = vcmp.gt.f32.partialorder %v1864_v30, %v2057_v13  ;;  %v11559_v15 = vmov 0  ;;  %vm8350_vm13 = vcmp.gt.f32.partialorder %v1898_v61, %v2065_v59 }
 0x45b   : > { %11558 = vst [vmem:[#allocation129_spill] sm:$0xff] %v11557_v54  ;;  %v11560_v15 = vsel %vm8346_vm2, 4294967295, %v11559_v15  ;;  %v11562_v12 = vmov 0  ;;  %vm8354_vm5 = vcmp.gt.f32.partialorder %v1932_v22, %v2073_v36  ;;  %v11565_v11 = vmov 0 }
 0x45c   : > { %11561 = vst [vmem:[#allocation130_spill] sm:$0xff] %v11560_v15  ;;  %v11563_v12 = vsel %vm8350_vm13, 4294967295, %v11562_v12  ;;  %v11566_v11 = vsel %vm8354_vm5, 4294967295, %v11565_v11  ;;  %v8360_v32 = vsel %vm8325_vm8, %v1694_v62, %v2017_v9  ;;  %v8364_v52 = vsel %vm8329_vm3, %v1728_v49, %v2025_v23  ;;  %v11577_v62 = vld [vmem:[#allocation27_spill] sm:$0xff]  ;;  %v11579_v49 = vld [vmem:[#allocation28_spill] sm:$0xff]  ;;  %v11658_v15 = vld [vmem:[#allocation45_spill] sm:$0xff] }
 0x45d   : > { %11564 = vst [vmem:[#allocation131_spill] sm:$0xff] %v11563_v12  ;;  %11567 = vst [vmem:[#allocation132_spill] sm:$0xff] %v11566_v11  ;;  %v8368_v46 = vsel %vm8333_vm7, %v1762_v7, %v2033_v45  ;;  %v4694_v26 = vcombine.low %v4686_v55, %v4693_v57  ;;  %v8372_v2 = vsel %vm8337_vm14, %v1796_v25, %v2041_v8  ;;  %v11581_v7 = vld [vmem:[#allocation29_spill] sm:$0xff]  ;;  %v11587_v23 = vld [vmem:[#allocation8_spill] sm:$0xff] }
 0x45e   : > { %v8376_v24 = vsel %vm8342_vm12, %v1830_v18, %v2049_v39  ;;  %v8380_v29 = vsel %vm8346_vm2, %v1864_v30, %v2057_v13  ;;  %v8384_v41 = vsel %vm8350_vm13, %v1898_v61, %v2065_v59  ;;  %v8388_v3 = vsel %vm8354_vm5, %v1932_v22, %v2073_v36  ;;  %v11589_v8 = vld [vmem:[#allocation9_spill] sm:$0xff]  ;;  %v11591_v13 = vld [vmem:[#allocation10_spill] sm:$0xff]  ;;  %v11595_v36 = vld [vmem:[#allocation19_spill] sm:$0xff] }
 0x45f   : > { %v8392_v35 = vrot.slane %v11569_v31, %v11568_v53  ;;  %v8396_v47 = vrot.slane %v11571_v43, %v11568_v53  ;;  %4695 = vrot.lane.b32.xlu1 %v4694_v26, %s5855_s12  ;;  %v8401_v27 = vrot.slane %v11573_v44, %v11568_v53  ;;  %v8405_v4 = vrot.slane %v11575_v17, %v11568_v53  ;;  %v11593_v55 = vld [vmem:[#allocation17_spill] sm:$0xff]  ;;  %v11597_v26 = vld [vmem:[#allocation20_spill] sm:$0xff] }
 0x460   : > { %v8409_v37 = vrot.slane %v11577_v62, %v11568_v53  ;;  %v8413_v56 = vrot.slane %v11579_v49, %v11568_v53  ;;  %v8417_v5 = vrot.slane %v11581_v7, %v11568_v53  ;;  %v8421_v25 = vrot.slane %v11583_v48, %v11568_v53  ;;  %v11607_v7 = vld [vmem:[#allocation69_spill] sm:$0xff]  ;;  %v11632_v48 = vld [vmem:[#allocation128_spill] sm:$0xff] }
 0x461   : > { %11570 = vst [vmem:[#allocation67_spill] sm:$0xff] %v8392_v35  ;;  %11572 = vst [vmem:[#allocation91_spill] sm:$0xff] %v8396_v47  ;;  %v2503_v51 = vrot.slane %v8392_v35, 7  ;;  %v2507_v18 = vrot.slane %v8396_v47, 7  ;;  %v2511_v60 = vrot.slane %v8401_v27, 7  ;;  %v2515_v30 = vrot.slane %v8405_v4, 7 }
 0x462   : > { %11574 = vst [vmem:[#allocation68_spill] sm:$0xff] %v8401_v27  ;;  %11576 = vst [vmem:[#allocation92_spill] sm:$0xff] %v8405_v4  ;;  %v2519_v14 = vrot.slane %v8409_v37, 7  ;;  %v2523_v61 = vrot.slane %v8413_v56, 7  ;;  %v2527_v28 = vrot.slane %v8417_v5, 7  ;;  %v2531_v22 = vrot.slane %v8421_v25, 7 }
 0x463   : > { %11578 = vst [vmem:[#allocation73_spill] sm:$0xff] %v8409_v37  ;;  %11580 = vst [vmem:[#allocation97_spill] sm:$0xff] %v8413_v56  ;;  %v8433_v9 = vrot.slane %v11585_v34, %v11568_v53  ;;  %v8437_v45 = vrot.slane %v11587_v23, %v11568_v53  ;;  %v8441_v39 = vrot.slane %v11589_v8, %v11568_v53  ;;  %v11604_v23 = vld [vmem:[#allocation66_spill] sm:$0xff]  ;;  %vm11608_vm4 = vnez %v11607_v7  ;;  %v11660_v37 = vld [vmem:[#allocation47_spill] sm:$0xff] }
 0x464   : > { %11582 = vst [vmem:[#allocation75_spill] sm:$0xff] %v8417_v5  ;;  %11584 = vst [vmem:[#allocation99_spill] sm:$0xff] %v8421_v25  ;;  %v8445_v19 = vrot.slane %v11591_v13, %v11568_v53  ;;  %v8449_v59 = vrot.slane %v11593_v55, %v11568_v53  ;;  %v8453_v57 = vrot.slane %v11595_v36, %v11568_v53  ;;  %v11601_v13 = vld [vmem:[#allocation65_spill] sm:$0xff]  ;;  %vm11605_vm9 = vnez %v11604_v23  ;;  %v11616_v7 = vld [vmem:[#allocation110_spill] sm:$0xff] }
 0x465   : > { %11586 = vst [vmem:[#allocation111_spill] sm:$0xff] %v8433_v9  ;;  %11588 = vst [vmem:[#allocation135_spill] sm:$0xff] %v8437_v45  ;;  %v8457_v10 = vrot.slane %v11597_v26, %v11568_v53  ;;  %v8461_v63 = vrot.slane %v11599_v0, %v11568_v53  ;;  %v2759_v21 = vrot.slane %v8433_v9, 7  ;;  %v2763_v50 = vrot.slane %v8437_v45, 7  ;;  %v11662_v4 = vld [vmem:[#allocation49_spill] sm:$0xff]  ;;  %v11664_v27 = vld [vmem:[#allocation51_spill] sm:$0xff] }
 0x466   : > { %11590 = vst [vmem:[#allocation112_spill] sm:$0xff] %v8441_v39  ;;  %11592 = vst [vmem:[#allocation136_spill] sm:$0xff] %v8445_v19  ;;  %v2767_v20 = vrot.slane %v8441_v39, 7  ;;  %v2771_v42 = vrot.slane %v8445_v19, 7  ;;  %v2775_v58 = vrot.slane %v8449_v59, 7  ;;  %v2779_v36 = vrot.slane %v8453_v57, 7 }
 0x467   : > { %11594 = vst [vmem:[#allocation117_spill] sm:$0xff] %v8449_v59  ;;  %11596 = vst [vmem:[#allocation141_spill] sm:$0xff] %v8453_v57  ;;  %v2783_v55 = vrot.slane %v8457_v10, 7  ;;  %v2787_v26 = vrot.slane %v8461_v63, 7  ;;  %vm11602_vm11 = vnez %v11601_v13  ;;  %v8481_v34 = vsel %vm11605_vm9, %v2507_v18, %v2763_v50  ;;  %v11613_v18 = vld [vmem:[#allocation109_spill] sm:$0xff] }
 0x468   : > { %11598 = vst [vmem:[#allocation119_spill] sm:$0xff] %v8457_v10  ;;  %11600 = vst [vmem:[#allocation143_spill] sm:$0xff] %v8461_v63  ;;  %v8473_v0 = vsel %vm11602_vm11, %v2503_v51, %v2759_v21  ;;  %v8489_v49 = vsel %vm11608_vm4, %v2511_v60, %v2767_v20  ;;  %v11610_v51 = vld [vmem:[#allocation70_spill] sm:$0xff]  ;;  %vm11614_vm6 = vnez %v11613_v18  ;;  %vm11617_vm11 = vnez %v11616_v7  ;;  %v11628_v20 = vld [vmem:[#allocation84_spill] sm:$0xff] }
 0x469   : > { %11603 = vst [vmem:[#allocation77_spill] sm:$0xff] %v8473_v0  ;;  %11606 = vst [vmem:[#allocation249_spill] sm:$0xff] %v8481_v34  ;;  %vm11611_vm10 = vnez %v11610_v51  ;;  %v8505_v23 = vsel %vm11614_vm6, %v2519_v14, %v2775_v58  ;;  %v8513_v60 = vsel %vm11617_vm11, %v2523_v61, %v2779_v36  ;;  %v11622_v14 = vld [vmem:[#allocation114_spill] sm:$0xff]  ;;  %v11625_v36 = vld [vmem:[#allocation81_spill] sm:$0xff]  ;;  %v2988_v58 = vcombine.high %v11628_v20, %v11628_v20 }
 0x46a   : > { %11609 = vst [vmem:[#allocation241_spill] sm:$0xff] %v8489_v49  ;;  %v8497_v13 = vsel %vm11611_vm10, %v2515_v30, %v2771_v42  ;;  %11615 = vst [vmem:[#allocation37_spill] sm:$0xff] %v8505_v23  ;;  %v11619_v30 = vld [vmem:[#allocation113_spill] sm:$0xff]  ;;  %vm11623_vm4 = vnez %v11622_v14  ;;  %v2886_v7 = vcombine.high %v11625_v36, %v11625_v36  ;;  %v11631_v21 = vld [vmem:[#allocation127_spill] sm:$0xff]  ;;  %v3124_v36 = vcombine.high %v11632_v48, %v11632_v48 }
 0x46b   : > { %11612 = vst [vmem:[#allocation23_spill] sm:$0xff] %v8497_v13  ;;  %11618 = vst [vmem:[#allocation250_spill] sm:$0xff] %v8513_v60  ;;  %vm11620_vm9 = vnez %v11619_v30  ;;  %v8529_v18 = vsel %vm11623_vm4, %v2531_v22, %v2787_v26  ;;  %v11626_v30 = vld [vmem:[#allocation82_spill] sm:$0xff]  ;;  %v11629_v14 = vld [vmem:[#allocation125_spill] sm:$0xff]  ;;  %v3090_v61 = vcombine.high %v11631_v21, %v11631_v21  ;;  %v3241_v17 = vrot.slane %v2988_v58, 7 }
 0x46c   : > { %v8521_v51 = vsel %vm11620_vm9, %v2527_v28, %v2783_v55  ;;  %11624 = vst [vmem:[#allocation24_spill] sm:$0xff] %v8529_v18  ;;  %v2920_v28 = vcombine.high %v11626_v30, %v11626_v30  ;;  %v11627_v55 = vld [vmem:[#allocation83_spill] sm:$0xff]  ;;  %v3022_v22 = vcombine.high %v11629_v14, %v11629_v14  ;;  %v11630_v26 = vld [vmem:[#allocation126_spill] sm:$0xff]  ;;  %v3217_v8 = vrot.slane %v2886_v7, 7  ;;  %v11661_v23 = vld [vmem:[#allocation48_spill] sm:$0xff] }
 0x46d   : > { %11621 = vst [vmem:[#allocation242_spill] sm:$0xff] %v8521_v51  ;;  %v2954_v42 = vcombine.high %v11627_v55, %v11627_v55  ;;  %v3056_v50 = vcombine.high %v11630_v26, %v11630_v26  ;;  %v3265_v43 = vrot.slane %v3090_v61, 7  ;;  %v3273_v20 = vrot.slane %v3124_v36, 7  ;;  %v11659_v60 = vld [vmem:[#allocation46_spill] sm:$0xff]  ;;  %v11666_v35 = vld [vmem:[#allocation89_spill] sm:$0xff]  ;;  %v11688_v63 = vld [vmem:[#allocation76_spill] sm:$0xff] }
 0x46e   : > { %v3225_v30 = vrot.slane %v2920_v28, 7  ;;  %v3249_v55 = vrot.slane %v3022_v22, 7  ;;  %vm8551_vm10 = vcmp.gt.f32.partialorder %v2886_v7, %v3217_v8  ;;  %vm8563_vm9 = vcmp.gt.f32.partialorder %v2988_v58, %v3241_v17  ;;  %v11663_v13 = vld [vmem:[#allocation50_spill] sm:$0xff]  ;;  %v11693_v14 = vld [vmem:[#allocation140_spill] sm:$0xff] }
 0x46f   : > { %v3233_v62 = vrot.slane %v2954_v42, 7  ;;  %v3257_v44 = vrot.slane %v3056_v50, 7  ;;  %vm8575_vm0 = vcmp.gt.f32.partialorder %v3090_v61, %v3265_v43  ;;  %vm8579_vm1 = vcmp.gt.f32.partialorder %v3124_v36, %v3273_v20  ;;  %v11694_v21 = vld [vmem:[#allocation118_spill] sm:$0xff]  ;;  %v11696_v26 = vld [vmem:[#allocation120_spill] sm:$0xff] }
 0x470   : > { %vm8555_vm6 = vcmp.gt.f32.partialorder %v2920_v28, %v3225_v30  ;;  %vm8567_vm4 = vcmp.gt.f32.partialorder %v3022_v22, %v3249_v55  ;;  %v8585_v25 = vsel %vm8551_vm10, %v2886_v7, %v3217_v8  ;;  %v8597_v10 = vsel %vm8563_vm9, %v2988_v58, %v3241_v17  ;;  %v11651_v58 = vld [vmem:[#allocation54_spill] sm:$0xff] }
 0x471   : > { %vm8559_vm11 = vcmp.gt.f32.partialorder %v2954_v42, %v3233_v62  ;;  %vm8571_vm15 = vcmp.gt.f32.partialorder %v3056_v50, %v3257_v44  ;;  %v8589_v11 = vsel %vm8555_vm6, %v2920_v28, %v3225_v30  ;;  %v8601_v5 = vsel %vm8567_vm4, %v3022_v22, %v3249_v55  ;;  %v11652_v22 = vld [vmem:[#allocation55_spill] sm:$0xff]  ;;  %v11655_v30 = vld [vmem:[#allocation58_spill] sm:$0xff] }
 0x472   : > { %v8593_v18 = vsel %vm8559_vm11, %v2954_v42, %v3233_v62  ;;  %v8605_v8 = vsel %vm8571_vm15, %v3056_v50, %v3257_v44  ;;  %v8609_v7 = vsel %vm8575_vm0, %v3090_v61, %v3265_v43  ;;  %v8613_v62 = vsel %vm8579_vm1, %v3124_v36, %v3273_v20  ;;  %v11650_v42 = vld [vmem:[#allocation53_spill] sm:$0xff]  ;;  %v11653_v50 = vld [vmem:[#allocation56_spill] sm:$0xff]  ;;  %v11656_v20 = vld [vmem:[#allocation59_spill] sm:$0xff] }
 0x473   : > { %11649 = vst [vmem:[#allocation38_spill] sm:$0xff] %v8613_v62  ;;  %v8617_v17 = vrot.slane %v11650_v42, %v11568_v53  ;;  %v8621_v28 = vrot.slane %v11651_v58, %v11568_v53  ;;  %v8625_v44 = vrot.slane %v11652_v22, %v11568_v53  ;;  %v8629_v43 = vrot.slane %v11653_v50, %v11568_v53  ;;  %v11654_v61 = vld [vmem:[#allocation57_spill] sm:$0xff]  ;;  %v11657_v42 = vld [vmem:[#allocation60_spill] sm:$0xff]  ;;  %v11695_v48 = vld [vmem:[#allocation142_spill] sm:$0xff] }
 0x474   : > { %v8633_v36 = vrot.slane %v11654_v61, %v11568_v53  ;;  %v8637_v55 = vrot.slane %v11655_v30, %v11568_v53  ;;  %v8641_v58 = vrot.slane %v11656_v20, %v11568_v53  ;;  %v8645_v22 = vrot.slane %v11657_v42, %v11568_v53 }
 0x475   : > { %v3703_v12 = vrot.slane %v8617_v17, 7  ;;  %v3707_v50 = vrot.slane %v8621_v28, 7  ;;  %v3711_v51 = vrot.slane %v8625_v44, 7  ;;  %v3715_v61 = vrot.slane %v8629_v43, 7 }
 0x476   : > { %v3719_v57 = vrot.slane %v8633_v36, 7  ;;  %v3723_v30 = vrot.slane %v8637_v55, 7  ;;  %v3727_v56 = vrot.slane %v8641_v58, 7  ;;  %v3731_v20 = vrot.slane %v8645_v22, 7 }
 0x477   : > { %v3747_v42 = vrot.slane %v11658_v15, %v11568_v53  ;;  %v3775_v59 = vrot.slane %v11659_v60, %v11568_v53  ;;  %v3803_v54 = vrot.slane %v11660_v37, %v11568_v53  ;;  %v3831_v19 = vrot.slane %v11661_v23, %v11568_v53  ;;  %v11665_v15 = vld [vmem:[#allocation52_spill] sm:$0xff] }
 0x478   : > { %v3859_v1 = vrot.slane %v11662_v4, %v11568_v53  ;;  %v3887_v39 = vrot.slane %v11663_v13, %v11568_v53  ;;  %v3915_v16 = vrot.slane %v11664_v27, %v11568_v53  ;;  %v3943_v49 = vrot.slane %v11665_v15, %v11568_v53  ;;  %v11670_v15 = vld [vmem:[#allocation93_spill] sm:$0xff] }
 0x479   : > { %v3959_v45 = vrot.slane %v3747_v42, 7  ;;  %v3963_v60 = vrot.slane %v3775_v59, 7  ;;  %v3967_v47 = vrot.slane %v3803_v54, 7  ;;  %v3971_v40 = vrot.slane %v3831_v19, 7 }
 0x47a   : > { %v3975_v37 = vrot.slane %v3859_v1, 7  ;;  %v3979_v34 = vrot.slane %v3887_v39, 7  ;;  %v3983_v9 = vrot.slane %v3915_v16, 7  ;;  %v3987_v23 = vrot.slane %v3943_v49, 7 }
 0x47b   : > { %vm11667_vm5 = vnez %v11666_v35  ;;  %v3993_v13 = vsel %vm8551_vm10, %v8617_v17, %v3747_v42  ;;  %vm11669_vm13 = vnez %v11668_v33  ;;  %v4001_v53 = vsel %vm8555_vm6, %v8621_v28, %v3775_v59  ;;  %v11672_v35 = vld [vmem:[#allocation94_spill] sm:$0xff]  ;;  %v11674_v33 = vld [vmem:[#allocation133_spill] sm:$0xff]  ;;  %v11697_v42 = vld [vmem:[#allocation144_spill] sm:$0xff] }
 0x47c   : > { %v3992_v4 = vsel %vm11667_vm5, %v3703_v12, %v3959_v45  ;;  %v4000_v27 = vsel %vm11669_vm13, %v3707_v50, %v3963_v60  ;;  %vm11671_vm2 = vnez %v11670_v15  ;;  %v4009_v62 = vsel %vm8559_vm11, %v8625_v44, %v3803_v54  ;;  %v11676_v15 = vld [vmem:[#allocation134_spill] sm:$0xff]  ;;  %v11678_v60 = vld [vmem:[#allocation137_spill] sm:$0xff]  ;;  %v11701_v44 = vld [vmem:[#allocation67_spill] sm:$0xff] }
 0x47d   : > { %v4008_v0 = vsel %vm11671_vm2, %v3711_v51, %v3967_v47  ;;  %vm11673_vm5 = vnez %v11672_v35  ;;  %v4017_v31 = vsel %vm8563_vm9, %v8629_v43, %v3831_v19  ;;  %vm11675_vm13 = vnez %v11674_v33  ;;  %v11680_v51 = vld [vmem:[#allocation138_spill] sm:$0xff]  ;;  %v11702_v50 = vld [vmem:[#allocation111_spill] sm:$0xff] }
 0x47e   : > { %v4016_v12 = vsel %vm11673_vm5, %v3715_v61, %v3971_v40  ;;  %v4024_v45 = vsel %vm11675_vm13, %v3719_v57, %v3975_v37  ;;  %v4025_v59 = vsel %vm8567_vm4, %v8633_v36, %v3859_v1  ;;  %vm11677_vm2 = vnez %v11676_v15  ;;  %v11682_v57 = vld [vmem:[#allocation71_spill] sm:$0xff]  ;;  %v11698_v17 = vld [vmem:[#allocation38_spill] sm:$0xff]  ;;  %v11704_v36 = vld [vmem:[#allocation249_spill] sm:$0xff] }
 0x47f   : > { %v4032_v47 = vsel %vm11677_vm2, %v3723_v30, %v3979_v34  ;;  %v4033_v54 = vsel %vm8571_vm15, %v8637_v55, %v3887_v39  ;;  %vm11679_vm10 = vnez %v11678_v60  ;;  %v4041_v19 = vsel %vm8575_vm0, %v8641_v58, %v3915_v16  ;;  %v11683_v34 = vld [vmem:[#allocation95_spill] sm:$0xff]  ;;  %v11685_v39 = vld [vmem:[#allocation96_spill] sm:$0xff]  ;;  %v11687_v16 = vld [vmem:[#allocation98_spill] sm:$0xff] }
 0x480   : > { %v4040_v40 = vsel %vm11679_vm10, %v3727_v56, %v3983_v9  ;;  %vm11681_vm6 = vnez %v11680_v51  ;;  %v4049_v1 = vsel %vm8579_vm1, %v8645_v22, %v3943_v49  ;;  %vm4056_vm11 = vcmp.gt.f32.partialorder %v11683_v34, %v11682_v57  ;;  %v11689_v49 = vld [vmem:[#allocation100_spill] sm:$0xff]  ;;  %v11690_v56 = vld [vmem:[#allocation115_spill] sm:$0xff]  ;;  %v11699_v58 = vld [vmem:[#allocation77_spill] sm:$0xff] }
 0x481   : > { %v4048_v37 = vsel %vm11681_vm6, %v3731_v20, %v3987_v23  ;;  %vm4057_vm15 = vcmp.gt.f32.partialorder %v8585_v25, %v8360_v32  ;;  %vm10870_vm9 = vcmp.gt.f32.partialorder %v11685_v39, %v11684_v6  ;;  %vm4065_vm4 = vcmp.gt.f32.partialorder %v8589_v11, %v8364_v52  ;;  %v11691_v9 = vld [vmem:[#allocation139_spill] sm:$0xff]  ;;  %v11692_v23 = vld [vmem:[#allocation116_spill] sm:$0xff]  ;;  %v11709_v15 = vld [vmem:[#allocation241_spill] sm:$0xff] }
 0x482   : > { %vm4089_vm10 = vcmp.gt.f32.partialorder %v8601_v5, %v8376_v24  ;;  %vm4096_vm6 = vcmp.gt.f32.partialorder %v11693_v14, %v11692_v23  ;;  %vm10875_vm0 = vcmp.gt.f32.partialorder %v8605_v8, %v8380_v29  ;;  %vm10874_vm5 = vcmp.gt.f32.partialorder %v11695_v48, %v11694_v21  ;;  %v11706_v20 = vld [vmem:[#allocation91_spill] sm:$0xff]  ;;  %v11712_v51 = vld [vmem:[#allocation68_spill] sm:$0xff] }
 0x483   : > { %vm10873_vm1 = vcmp.gt.f32.partialorder %v8609_v7, %v8384_v41  ;;  %vm10872_vm13 = vcmp.gt.f32.partialorder %v11697_v42, %v11696_v26  ;;  %vm10871_vm2 = vcmp.gt.f32.partialorder %v11698_v17, %v8388_v3  ;;  %v4858_v28 = vsel %vm4056_vm11, %v3992_v4, %v11699_v58  ;;  %v11707_v35 = vld [vmem:[#allocation135_spill] sm:$0xff]  ;;  %v11713_v58 = vld [vmem:[#allocation112_spill] sm:$0xff] }
 0x484   : > { %v11703_v43 = vsel %vm8325_vm8, %v11701_v44, %v11702_v50  ;;  %v4866_v30 = vsel %vm10870_vm9, %v4000_v27, %v11704_v36  ;;  %v11708_v33 = vsel %vm8329_vm3, %v11706_v20, %v11707_v35  ;;  %vm11710_vm8 = vcmp.gt.f32.partialorder %v11687_v16, %v11686_v38  ;;  %v11716_v44 = vld [vmem:[#allocation23_spill] sm:$0xff]  ;;  %v11720_v36 = vld [vmem:[#allocation136_spill] sm:$0xff]  ;;  %v11723_v20 = vld [vmem:[#allocation37_spill] sm:$0xff] }
 0x485   : > { %v4859_v61 = vsel %vm4057_vm15, %v3993_v13, %v11703_v43  ;;  %v4867_v4 = vsel %vm4065_vm4, %v4001_v53, %v11708_v33  ;;  %v4874_v60 = vsel %vm11710_vm8, %v4008_v0, %v11709_v15  ;;  %v11714_v22 = vsel %vm8333_vm7, %v11712_v51, %v11713_v58  ;;  %v11719_v43 = vld [vmem:[#allocation92_spill] sm:$0xff]  ;;  %v11726_v33 = vld [vmem:[#allocation73_spill] sm:$0xff]  ;;  %v11729_v51 = vld [vmem:[#allocation250_spill] sm:$0xff] }
 0x486   : > { %vm11715_vm9 = vcmp.gt.f32.partialorder %v8593_v18, %v8368_v46  ;;  %vm11717_vm3 = vcmp.gt.f32.partialorder %v11689_v49, %v11688_v63  ;;  %v11721_v55 = vsel %vm8337_vm14, %v11719_v43, %v11720_v36  ;;  %vm11722_vm8 = vcmp.gt.f32.partialorder %v8597_v10, %v8372_v2  ;;  %v11727_v15 = vld [vmem:[#allocation117_spill] sm:$0xff]  ;;  %v11735_v43 = vld [vmem:[#allocation242_spill] sm:$0xff] }
 0x487   : > { %v4875_v27 = vsel %vm11715_vm9, %v4009_v62, %v11714_v22  ;;  %v4882_v50 = vsel %vm11717_vm3, %v4016_v12, %v11716_v44  ;;  %v4883_v0 = vsel %vm11722_vm8, %v4017_v31, %v11721_v55  ;;  %vm11724_vm7 = vcmp.gt.f32.partialorder %v11691_v9, %v11690_v56  ;;  %v11730_v31 = vld [vmem:[#allocation130_spill] sm:$0xff]  ;;  %v11732_v22 = vld [vmem:[#allocation97_spill] sm:$0xff]  ;;  %v11738_v55 = vld [vmem:[#allocation75_spill] sm:$0xff] }
 0x488   : > { %v4890_v35 = vsel %vm11724_vm7, %v4024_v45, %v11723_v20  ;;  %v11728_v13 = vsel %vm8342_vm12, %v11726_v33, %v11727_v15  ;;  %v4898_v58 = vsel %vm4096_vm6, %v4032_v47, %v11729_v51  ;;  %vm11731_vm14 = vnez %v11730_v31  ;;  %v11733_v44 = vld [vmem:[#allocation141_spill] sm:$0xff]  ;;  %v11739_v20 = vld [vmem:[#allocation119_spill] sm:$0xff]  ;;  %v11741_v33 = vld [vmem:[#allocation24_spill] sm:$0xff] }
 0x489   : > { %v4891_v12 = vsel %vm4089_vm10, %v4025_v59, %v11728_v13  ;;  %v11734_v53 = vsel %vm11731_vm14, %v11732_v22, %v11733_v44  ;;  %v4906_v36 = vsel %vm10874_vm5, %v4040_v40, %v11735_v43  ;;  %v11736_v59 = vld [vmem:[#allocation131_spill] sm:$0xff]  ;;  %v4914_v15 = vsel %vm10872_vm13, %v4048_v37, %v11741_v33 }
 0x48a   : > { %v4899_v45 = vsel %vm10875_vm0, %v4033_v54, %v11734_v53  ;;  %vm11737_vm12 = vnez %v11736_v59  ;;  %v11742_v54 = vld [vmem:[#allocation132_spill] sm:$0xff]  ;;  %v11744_v13 = vld [vmem:[#allocation99_spill] sm:$0xff]  ;;  %v4927_v22 = vrot.slane %v4858_v28, 1  ;;  %v4955_v44 = vrot.slane %v4866_v30, 1 }
 0x48b   : > { %v11740_v62 = vsel %vm11737_vm12, %v11738_v55, %v11739_v20  ;;  %vm11743_vm9 = vnez %v11742_v54  ;;  %v11745_v51 = vld [vmem:[#allocation143_spill] sm:$0xff]  ;;  %v4983_v53 = vrot.slane %v4874_v60, 1  ;;  %v5011_v43 = vrot.slane %v4882_v50, 1 }
 0x48c   : > { %v4907_v47 = vsel %vm10873_vm1, %v4041_v19, %v11740_v62  ;;  %v11746_v31 = vsel %vm11743_vm9, %v11744_v13, %v11745_v51  ;;  %v5039_v59 = vrot.slane %v4890_v35, 1  ;;  %v5067_v19 = vrot.slane %v4898_v58, 1 }
 0x48d   : > { %v4915_v40 = vsel %vm10871_vm2, %v4049_v1, %v11746_v31  ;;  %vm11747_vm3 = vcmask 1041409   ;;  %v5095_v37 = vrot.slane %v4906_v36, 1  ;;  %v5123_v62 = vrot.slane %v4914_v15, 1 }
 0x48e   : > { %v4930_v55 = vsel %vm11747_vm3, %v4859_v61, %v4927_v22  ;;  %vm11748_vm8 = vmmov %vm11747_vm3  ;;  %vm11749_vm7 = vcmask 1043459   ;;  %vm11753_vm2 = vcmask 1045509  }
 0x48f   : > { %v4958_v20 = vsel %vm11748_vm8, %v4867_v4, %v4955_v44  ;;  %v4931_v33 = vsel %vm11749_vm7, %v4859_v61, %v4930_v55  ;;  %vm11750_vm14 = vmmov %vm11749_vm7 }
 0x490   : > { %v4959_v54 = vsel %vm11750_vm14, %v4867_v4, %v4958_v20  ;;  %vm11751_vm12 = vmmov %vm11747_vm3  ;;  %v4932_v28 = vsel %vm11753_vm2, %v4859_v61, %v4931_v33 }
 0x491   : > { %v4986_v13 = vsel %vm11751_vm12, %v4875_v27, %v4983_v53  ;;  %vm11752_vm9 = vmmov %vm11747_vm3  ;;  %vm11757_vm3 = vcmask 1047559  }
 0x492   : > { %v5014_v1 = vsel %vm11752_vm9, %v4883_v0, %v5011_v43  ;;  %vm11754_vm13 = vmmov %vm11753_vm2  ;;  %v4933_v35 = vsel %vm11757_vm3, %v4859_v61, %v4932_v28  ;;  %v5042_v22 = vsel %vm11752_vm9, %v4891_v12, %v5039_v59 }
 0x493   : > { %v4960_v30 = vsel %vm11754_vm13, %v4867_v4, %v4959_v54  ;;  %vm11755_vm1 = vmmov %vm11749_vm7 }
 0x494   : > { %v4987_v60 = vsel %vm11755_vm1, %v4875_v27, %v4986_v13  ;;  %vm11756_vm5 = vmmov %vm11755_vm1 }
 0x495   : > { %v5015_v50 = vsel %vm11756_vm5, %v4883_v0, %v5014_v1  ;;  %vm11758_vm8 = vmmov %vm11757_vm3 }
 0x496   : > { %v4961_v58 = vsel %vm11758_vm8, %v4867_v4, %v4960_v30  ;;  %vm11759_vm0 = vmmov %vm11753_vm2 }
 0x497   : > { %v4988_v36 = vsel %vm11759_vm0, %v4875_v27, %v4987_v60  ;;  %vm11760_vm7 = vmmov %vm11759_vm0  ;;  %v5180_v13 = vcombine.low %v4933_v35, %v4961_v58  ;;  %v11775_v60 = vld [vmem:[#allocation16_spill] sm:$0xff] }
 0x498   : > { %v5016_v15 = vsel %vm11760_vm7, %v4883_v0, %v5015_v50  ;;  %vm11761_vm14 = vmmov %vm11757_vm3 }
 0x499   : > { %v4989_v51 = vsel %vm11761_vm14, %v4875_v27, %v4988_v36  ;;  %vm11762_vm12 = vmmov %vm11757_vm3 }
 0x49a   : > { %v5017_v31 = vsel %vm11762_vm12, %v4883_v0, %v5016_v15  ;;  %vm11763_vm2 = vmmov %vm11752_vm9 }
 0x49b   : > { %v5070_v44 = vsel %vm11763_vm2, %v4899_v45, %v5067_v19  ;;  %vm11764_vm13 = vmmov %vm11755_vm1  ;;  %v5189_v1 = vcombine.low %v4989_v51, %v5017_v31 }
 0x49c   : > { %v5043_v53 = vsel %vm11764_vm13, %v4891_v12, %v5042_v22  ;;  %v5071_v43 = vsel %vm11755_vm1, %v4899_v45, %v5070_v44  ;;  %vm11765_vm5 = vmmov %vm11763_vm2 }
 0x49d   : > { %v5098_v61 = vsel %vm11765_vm5, %v4907_v47, %v5095_v37  ;;  %vm11766_vm3 = vmmov %vm11763_vm2  ;;  %v5072_v20 = vsel %vm11759_vm0, %v4899_v45, %v5071_v43 }
 0x49e   : > { %v5126_v4 = vsel %vm11766_vm3, %v4915_v40, %v5123_v62  ;;  %vm11767_vm8 = vmmov %vm11759_vm0  ;;  %vm11776_vm3 = vcmp.gt.f32.partialorder %v11685_v39, %v11684_v6 }
 0x49f   : > { %v5044_v55 = vsel %vm11767_vm8, %v4891_v12, %v5043_v53  ;;  %vm11768_vm7 = vmmov %vm11755_vm1  ;;  %v4128_v50 = vsel %vm11776_vm3, %v11685_v39, %v11684_v6  ;;  %vm11780_vm8 = vcmp.gt.f32.partialorder %v8597_v10, %v8372_v2 }
 0x4a0   : > { %v5099_v27 = vsel %vm11768_vm7, %v4907_v47, %v5098_v61  ;;  %vm11769_vm14 = vmmov %vm11755_vm1  ;;  %v5045_v59 = vsel %vm11762_vm12, %v4891_v12, %v5044_v55  ;;  %v4120_v12 = vsel %vm4056_vm11, %v11683_v34, %v11682_v57  ;;  %v4129_v57 = vsel %vm4065_vm4, %v8589_v11, %v8364_v52 }
 0x4a1   : > { %v5127_v0 = vsel %vm11769_vm14, %v4915_v40, %v5126_v4  ;;  %vm11770_vm9 = vmmov %vm11762_vm12  ;;  %vm11777_vm11 = vcmp.gt.f32.partialorder %v11687_v16, %v11686_v38  ;;  %vm11779_vm4 = vcmp.gt.f32.partialorder %v11689_v49, %v11688_v63  ;;  %v4145_v39 = vsel %vm11780_vm8, %v8597_v10, %v8372_v2 }
 0x4a2   : > { %v5073_v19 = vsel %vm11770_vm9, %v4899_v45, %v5072_v20  ;;  %vm11771_vm2 = vmmov %vm11759_vm0  ;;  %v4121_v45 = vsel %vm4057_vm15, %v8585_v25, %v8360_v32  ;;  %v4136_v34 = vsel %vm11777_vm11, %v11687_v16, %v11686_v38  ;;  %vm11778_vm15 = vcmp.gt.f32.partialorder %v8593_v18, %v8368_v46  ;;  %v11783_v16 = vld [vmem:[#allocation15_spill] sm:$0xff] }
 0x4a3   : > { %v5100_v33 = vsel %vm11771_vm2, %v4907_v47, %v5099_v27  ;;  %vm11772_vm13 = vmmov %vm11759_vm0  ;;  %v5198_v28 = vcombine.low %v5045_v59, %v5073_v19  ;;  %v4137_v6 = vsel %vm11778_vm15, %v8593_v18, %v8368_v46  ;;  %v4144_v52 = vsel %vm11779_vm4, %v11689_v49, %v11688_v63 }
 0x4a4   : > { %v5128_v54 = vsel %vm11772_vm13, %v4915_v40, %v5127_v0  ;;  %vm11773_vm1 = vmmov %vm11770_vm9  ;;  %vm11781_vm0 = vcmp.gt.f32.partialorder %v11691_v9, %v11690_v56  ;;  %v4153_v38 = vsel %vm4089_vm10, %v8601_v5, %v8376_v24  ;;  %v4160_v10 = vsel %vm4096_vm6, %v11693_v14, %v11692_v23 }
 0x4a5   : > { %v5101_v37 = vsel %vm11773_vm1, %v4907_v47, %v5100_v33  ;;  %vm11774_vm5 = vmmov %vm11773_vm1  ;;  %v8882_v47 = vrot.slane %v5180_v13, %v11775_v60  ;;  %v8898_v32 = vrot.slane %v5198_v28, %v11775_v60  ;;  %v4152_v46 = vsel %vm11781_vm0, %v11691_v9, %v11690_v56 }
 0x4a6   : > { %v5129_v62 = vsel %vm11774_vm5, %v4915_v40, %v5128_v54  ;;  %v8885_v40 = vrot.slane %v5189_v1, %v11775_v60  ;;  %vm11782_vm7 = vcmp.gt.f32.partialorder %v8605_v8, %v8380_v29  ;;  %vm11784_vm14 = vcmp.gt.f32.partialorder %v11695_v48, %v11694_v21 }
 0x4a7   : > { %v5207_v30 = vcombine.low %v5101_v37, %v5129_v62  ;;  %v4161_v2 = vsel %vm11782_vm7, %v8605_v8, %v8380_v29  ;;  %v4168_v24 = vsel %vm11784_vm14, %v11695_v48, %v11694_v21  ;;  %vm11785_vm10 = vcmp.gt.f32.partialorder %v8609_v7, %v8384_v41 }
 0x4a8   : > { %v5324_v11 = vcombine.low %v8882_v47, %v8885_v40  ;;  %v4169_v5 = vsel %vm11785_vm10, %v8609_v7, %v8384_v41  ;;  %vm11786_vm6 = vcmp.gt.f32.partialorder %v11697_v42, %v11696_v26  ;;  %vm11787_vm12 = vcmp.gt.f32.partialorder %v11698_v17, %v8388_v3 }
 0x4a9   : > { %v8901_v25 = vrot.slane %v5207_v30, %v11775_v60  ;;  %v4176_v29 = vsel %vm11786_vm6, %v11697_v42, %v11696_v26  ;;  %v4177_v49 = vsel %vm11787_vm12, %v11698_v17, %v8388_v3  ;;  %v4259_v56 = vrot.slane %v4120_v12, 1 }
 0x4aa   : > { %v5332_v63 = vrot.slane %v5324_v11, %v11783_v16  ;;  %v4287_v9 = vrot.slane %v4128_v50, 1  ;;  %v4315_v23 = vrot.slane %v4136_v34, 1  ;;  %v4343_v14 = vrot.slane %v4144_v52, 1 }
 0x4ab   : > { %v5325_v18 = vcombine.low %v8898_v32, %v8901_v25  ;;  %v4371_v21 = vrot.slane %v4152_v46, 1  ;;  %v4399_v41 = vrot.slane %v4160_v10, 1  ;;  %vm11788_vm9 = vcmask 1041409   ;;  %v11819_v10 = vld [vmem:[#allocation146_spill] sm:$0xff] }
 0x4ac   : > { %v4262_v48 = vsel %vm11788_vm9, %v4121_v45, %v4259_v56  ;;  %vm11789_vm2 = vmmov %vm11788_vm9  ;;  %v4427_v26 = vrot.slane %v4168_v24, 1  ;;  %vm11790_vm13 = vcmask 1043459   ;;  %vm11794_vm11 = vcmask 1045509  }
 0x4ad   : > { %v5339_v8 = vrot.slane %v5325_v18, %v11783_v16  ;;  %v4290_v35 = vsel %vm11789_vm2, %v4129_v57, %v4287_v9  ;;  %v4263_v42 = vsel %vm11790_vm13, %v4121_v45, %v4262_v48  ;;  %vm11791_vm1 = vmmov %vm11790_vm13  ;;  %vm11798_vm0 = vcmask 1047559   ;;  %v11818_v18 = vld [vmem:[#allocation145_spill] sm:$0xff] }
 0x4ae   : > { %v4291_v58 = vsel %vm11791_vm1, %v4129_v57, %v4290_v35  ;;  %vm11792_vm5 = vmmov %vm11789_vm2  ;;  %v4264_v17 = vsel %vm11794_vm11, %v4121_v45, %v4263_v42  ;;  %v4402_v20 = vsel %vm11789_vm2, %v4161_v2, %v4399_v41  ;;  %v4455_v19 = vrot.slane %v4176_v29, 1  ;;  %v11824_v35 = vld [vmem:[#allocation195_spill] sm:$0xff]  ;;  %v11825_v42 = vld [vmem:[#allocation196_spill] sm:$0xff] }
 0x4af   : > { %v5340_v7 = vcombine.low %v5332_v63, %v5339_v8  ;;  %v4318_v36 = vsel %vm11792_vm5, %v4137_v6, %v4315_v23  ;;  %vm11793_vm3 = vmmov %vm11789_vm2  ;;  %v4265_v22 = vsel %vm11798_vm0, %v4121_v45, %v4264_v17  ;;  %v4403_v0 = vsel %vm11791_vm1, %v4161_v2, %v4402_v20  ;;  %v11821_v8 = vld [vmem:[#allocation148_spill] sm:$0xff]  ;;  %v11822_v23 = vld [vmem:[#allocation193_spill] sm:$0xff] }
 0x4b0   : > { %v4346_v3 = vsel %vm11793_vm3, %v4145_v39, %v4343_v14  ;;  %vm11795_vm15 = vmmov %vm11794_vm11  ;;  %v5662_v11 = vcombine.high %v8882_v47, %v8885_v40  ;;  %v5663_v52 = vcombine.high %v8898_v32, %v8901_v25  ;;  %v11820_v32 = vld [vmem:[#allocation147_spill] sm:$0xff]  ;;  %v1846_v14 = vcombine.high %v11822_v23, %v11822_v23 }
 0x4b1   : > { %5341 = vrot.lane.b32.xlu0 %v5340_v7, %s5869_s9  ;;  %v4292_v15 = vsel %vm11795_vm15, %v4129_v57, %v4291_v58  ;;  %vm11796_vm4 = vmmov %vm11791_vm1  ;;  %v1778_v25 = vcombine.high %v11820_v32, %v11820_v32  ;;  %v1948_v58 = vcombine.high %v11825_v42, %v11825_v42  ;;  %v11829_v20 = vmov 0 }
 0x4b2   : > { %v4319_v51 = vsel %vm11796_vm4, %v4137_v6, %v4318_v36  ;;  %vm11797_vm8 = vmmov %vm11791_vm1  ;;  %v5358_v47 = vrot.slane %v5663_v52, %v11783_v16  ;;  %v11853_v52 = vld [vmem:[#allocation12_spill] sm:$0xff] }
 0x4b3   : > { %v4347_v31 = vsel %vm11797_vm8, %v4145_v39, %v4346_v3  ;;  %vm11799_vm7 = vmmov %vm11798_vm0 }
 0x4b4   : > { %v4293_v44 = vsel %vm11799_vm7, %v4129_v57, %v4292_v15  ;;  %vm11800_vm14 = vmmov %vm11794_vm11 }
 0x4b5   : > { %v4320_v53 = vsel %vm11800_vm14, %v4137_v6, %v4319_v51  ;;  %vm11801_vm10 = vmmov %vm11794_vm11  ;;  %v4544_v62 = vcombine.low %v4265_v22, %v4293_v44  ;;  %v2035_v51 = vrot.slane %v1778_v25, 7  ;;  %v2051_v22 = vrot.slane %v1846_v14, 7 }
 0x4b6   : > { %v4348_v43 = vsel %vm11801_vm10, %v4145_v39, %v4347_v31  ;;  %vm11802_vm6 = vmmov %vm11798_vm0 }
 0x4b7   : > { %v4321_v61 = vsel %vm11802_vm6, %v4137_v6, %v4320_v53  ;;  %vm11803_vm12 = vmmov %vm11798_vm0  ;;  %v4551_v50 = vrot.slane %v4544_v62, %v11775_v60  ;;  %v11847_v62 = vmov 0 }
 0x4b8   : > { %v4349_v4 = vsel %vm11803_vm12, %v4145_v39, %v4348_v43  ;;  %vm11804_vm9 = vmmov %vm11789_vm2 }
 0x4b9   : > { %v4374_v55 = vsel %vm11804_vm9, %v4153_v38, %v4371_v21  ;;  %vm11805_vm13 = vmmov %vm11791_vm1  ;;  %v4553_v57 = vcombine.low %v4321_v61, %v4349_v4  ;;  %v11823_v21 = vld [vmem:[#allocation194_spill] sm:$0xff]  ;;  %v2075_v4 = vrot.slane %v1948_v58, 7 }
 0x4ba   : > { %v4375_v27 = vsel %vm11805_vm13, %v4153_v38, %v4374_v55  ;;  %vm11806_vm5 = vmmov %vm11789_vm2  ;;  %v1880_v41 = vcombine.high %v11823_v21, %v11823_v21  ;;  %v11826_v55 = vmov 0  ;;  %vm9041_vm13 = vcmp.gt.f32.partialorder %v1778_v25, %v2035_v51 }
 0x4bb   : > { %v4430_v59 = vsel %vm11806_vm5, %v4169_v5, %v4427_v26  ;;  %vm11807_vm3 = vmmov %vm11801_vm10  ;;  %v4560_v46 = vrot.slane %v4553_v57, %v11775_v60  ;;  %v1914_v26 = vcombine.high %v11824_v35, %v11824_v35  ;;  %vm9049_vm5 = vcmp.gt.f32.partialorder %v1846_v14, %v2051_v22 }
 0x4bc   : > { %v4376_v33 = vsel %vm11807_vm3, %v4153_v38, %v4375_v27  ;;  %vm11808_vm11 = vmmov %vm11807_vm3  ;;  %v2059_v44 = vrot.slane %v1880_v41, 7  ;;  %v11832_v27 = vmov 0 }
 0x4bd   : > { %v4404_v54 = vsel %vm11808_vm11, %v4161_v2, %v4403_v0  ;;  %vm11809_vm15 = vmmov %vm11791_vm1  ;;  %v4702_v40 = vcombine.low %v4551_v50, %v4560_v46  ;;  %v5654_v29 = vcombine.high %v4551_v50, %v4560_v46  ;;  %v2067_v61 = vrot.slane %v1914_v26, 7  ;;  %v11855_v46 = vld [vmem:[#allocation13_spill] sm:$0xff] }
 0x4be   : > { %v4431_v37 = vsel %vm11809_vm15, %v4169_v5, %v4430_v59  ;;  %vm11810_vm4 = vmmov %vm11798_vm0  ;;  %v11833_v27 = vsel %vm9041_vm13, 4294967295, %v11832_v27  ;;  %v11835_v0 = vmov 0  ;;  %vm9061_vm15 = vcmp.gt.f32.partialorder %v1948_v58, %v2075_v4 }
 0x4bf   : > { %v4377_v13 = vsel %vm11810_vm4, %v4153_v38, %v4376_v33  ;;  %vm11811_vm8 = vmmov %vm11798_vm0  ;;  %v1710_v38 = vcombine.high %v11818_v18, %v11818_v18  ;;  %v4710_v7 = vrot.slane %v4702_v40, %v11783_v16  ;;  %v4734_v48 = vrot.slane %v5654_v29, %v11783_v16  ;;  %11834 = vst [vmem:[#allocation25_spill] sm:$0xff] %v11833_v27  ;;  %v11865_v29 = vld [vmem:[#allocation30_spill] sm:$0xff] }
 0x4c0   : > { %v4405_v1 = vsel %vm11811_vm8, %v4161_v2, %v4404_v54  ;;  %vm11812_vm0 = vmmov %vm11807_vm3  ;;  %v1744_v2 = vcombine.high %v11819_v10, %v11819_v10  ;;  %v11838_v33 = vmov 0  ;;  %vm9053_vm3 = vcmp.gt.f32.partialorder %v1880_v41, %v2059_v44 }
 0x4c1   : > { %v4432_v28 = vsel %vm11812_vm0, %v4169_v5, %v4431_v37  ;;  %vm11813_vm7 = vmmov %vm11789_vm2  ;;  %v4562_v6 = vcombine.low %v4377_v13, %v4405_v1  ;;  %v2019_v17 = vrot.slane %v1710_v38, 7  ;;  %v11839_v33 = vsel %vm9049_vm5, 4294967295, %v11838_v33 }
 0x4c2   : > { %v4458_v30 = vsel %vm11813_vm7, %v4177_v49, %v4455_v19  ;;  %vm11814_vm14 = vmmov %vm11810_vm4  ;;  %v2027_v15 = vrot.slane %v1744_v2, 7  ;;  %11840 = vst [vmem:[#allocation252_spill] sm:$0xff] %v11839_v33  ;;  %v11841_v54 = vmov 0  ;;  %vm9057_vm11 = vcmp.gt.f32.partialorder %v1914_v26, %v2067_v61 }
 0x4c3   : > { %v4433_v12 = vsel %vm11814_vm14, %v4169_v5, %v4432_v28  ;;  %vm11815_vm10 = vmmov %vm11791_vm1  ;;  %v4569_v63 = vrot.slane %v4562_v6, %v11775_v60  ;;  %v5351_v5 = vrot.slane %v5662_v11, %v11783_v16  ;;  %vm9033_vm9 = vcmp.gt.f32.partialorder %v1710_v38, %v2019_v17  ;;  %v11851_v6 = vld [vmem:[#allocation11_spill] sm:$0xff] }
 0x4c4   : > { %v4459_v45 = vsel %vm11815_vm10, %v4177_v49, %v4458_v30  ;;  %vm11816_vm6 = vmmov %vm11812_vm0  ;;  %v11827_v55 = vsel %vm9033_vm9, 4294967295, %v11826_v55  ;;  %vm9037_vm2 = vcmp.gt.f32.partialorder %v1744_v2, %v2027_v15  ;;  %v11842_v54 = vsel %vm9053_vm3, 4294967295, %v11841_v54 }
 0x4c5   : > { %v4460_v34 = vsel %vm11816_vm6, %v4177_v49, %v4459_v45  ;;  %vm11817_vm12 = vmmov %vm11810_vm4  ;;  %v5359_v9 = vcombine.low %v5351_v5, %v5358_v47  ;;  %11828 = vst [vmem:[#allocation251_spill] sm:$0xff] %v11827_v55  ;;  %v11830_v20 = vsel %vm9037_vm2, 4294967295, %v11829_v20  ;;  %v11844_v37 = vmov 0  ;;  %v11863_v47 = vld [vmem:[#allocation29_spill] sm:$0xff]  ;;  %v11950_v55 = vld [vmem:[#allocation178_spill] sm:$0xff] }
 0x4c6   : > { %v4461_v39 = vsel %vm11817_vm12, %v4177_v49, %v4460_v34  ;;  %v1812_v49 = vcombine.high %v11821_v8, %v11821_v8  ;;  %11831 = vst [vmem:[#allocation243_spill] sm:$0xff] %v11830_v20  ;;  %11843 = vst [vmem:[#allocation244_spill] sm:$0xff] %v11842_v54  ;;  %v11845_v37 = vsel %vm9057_vm11, 4294967295, %v11844_v37  ;;  %v11848_v62 = vsel %vm9061_vm15, 4294967295, %v11847_v62  ;;  %v11850_v34 = vld [vmem:[#allocation35_spill] sm:$0xff]  ;;  %v11940_v54 = vld [vmem:[#allocation45_spill] sm:$0xff] }
 0x4c7   : > { %v4571_v24 = vcombine.low %v4433_v12, %v4461_v39  ;;  %5360 = vrot.lane.b32.xlu0 %v5359_v9, %s5868_s8  ;;  %11846 = vst [vmem:[#allocation26_spill] sm:$0xff] %v11845_v37  ;;  %11849 = vst [vmem:[#allocation40_spill] sm:$0xff] %v11848_v62  ;;  %v9067_v13 = vsel %vm9033_vm9, %v1710_v38, %v2019_v17  ;;  %v9071_v1 = vsel %vm9037_vm2, %v1744_v2, %v2027_v15  ;;  %v11857_v38 = vld [vmem:[#allocation14_spill] sm:$0xff]  ;;  %v11859_v2 = vld [vmem:[#allocation27_spill] sm:$0xff] }
 0x4c8   : > { %v2043_v31 = vrot.slane %v1812_v49, 7  ;;  %v9076_v28 = vsel %vm9041_vm13, %v1778_v25, %v2035_v51  ;;  %v9084_v12 = vsel %vm9049_vm5, %v1846_v14, %v2051_v22  ;;  %v9088_v45 = vsel %vm9053_vm3, %v1880_v41, %v2059_v44  ;;  %v11867_v41 = vld [vmem:[#allocation7_spill] sm:$0xff]  ;;  %v11881_v44 = vld [vmem:[#allocation21_spill] sm:$0xff] }
 0x4c9   : > { %v4578_v56 = vrot.slane %v4571_v24, %v11775_v60  ;;  %v9092_v50 = vsel %vm9057_vm11, %v1914_v26, %v2067_v61  ;;  %v9096_v57 = vsel %vm9061_vm15, %v1948_v58, %v2075_v4  ;;  %v9100_v11 = vrot.slane %v11851_v6, %v11850_v34  ;;  %v11861_v24 = vld [vmem:[#allocation28_spill] sm:$0xff]  ;;  %v11871_v26 = vld [vmem:[#allocation9_spill] sm:$0xff]  ;;  %v11873_v58 = vld [vmem:[#allocation10_spill] sm:$0xff] }
 0x4ca   : > { %vm9045_vm1 = vcmp.gt.f32.partialorder %v1812_v49, %v2043_v31  ;;  %v9104_v39 = vrot.slane %v11853_v52, %v11850_v34  ;;  %v9108_v18 = vrot.slane %v11855_v46, %v11850_v34  ;;  %v9112_v10 = vrot.slane %v11857_v38, %v11850_v34  ;;  %v11877_v15 = vld [vmem:[#allocation19_spill] sm:$0xff]  ;;  %v11968_v60 = vld [vmem:[#allocation165_spill] sm:$0xff] }
 0x4cb   : > { %v4703_v36 = vcombine.low %v4569_v63, %v4578_v56  ;;  %v5655_v3 = vcombine.high %v4569_v63, %v4578_v56  ;;  %v11836_v0 = vsel %vm9045_vm1, 4294967295, %v11835_v0  ;;  %v9080_v30 = vsel %vm9045_vm1, %v1812_v49, %v2043_v31  ;;  %11852 = vst [vmem:[#allocation105_spill] sm:$0xff] %v9100_v11  ;;  %v11879_v31 = vld [vmem:[#allocation20_spill] sm:$0xff] }
 0x4cc   : > { %11837 = vst [vmem:[#allocation39_spill] sm:$0xff] %v11836_v0  ;;  %11854 = vst [vmem:[#allocation245_spill] sm:$0xff] %v9104_v39  ;;  %v9116_v63 = vrot.slane %v11859_v2, %v11850_v34  ;;  %v9120_v5 = vrot.slane %v11861_v24, %v11850_v34  ;;  %v9124_v40 = vrot.slane %v11863_v47, %v11850_v34  ;;  %v2504_v25 = vrot.slane %v9100_v11, 7  ;;  %v11889_v47 = vld [vmem:[#allocation155_spill] sm:$0xff]  ;;  %v11948_v11 = vld [vmem:[#allocation177_spill] sm:$0xff] }
 0x4cd   : > { %v4717_v53 = vrot.slane %v4703_v36, %v11783_v16  ;;  %v4741_v43 = vrot.slane %v5655_v3, %v11783_v16  ;;  %11856 = vst [vmem:[#allocation31_spill] sm:$0xff] %v9108_v18  ;;  %11858 = vst [vmem:[#allocation41_spill] sm:$0xff] %v9112_v10  ;;  %v9128_v32 = vrot.slane %v11865_v29, %v11850_v34  ;;  %v2508_v8 = vrot.slane %v9104_v39, 7  ;;  %v11875_v3 = vld [vmem:[#allocation17_spill] sm:$0xff]  ;;  %v11914_v29 = vld [vmem:[#allocation220_spill] sm:$0xff] }
 0x4ce   : > { %11860 = vst [vmem:[#allocation106_spill] sm:$0xff] %v9116_v63  ;;  %11862 = vst [vmem:[#allocation246_spill] sm:$0xff] %v9120_v5  ;;  %v2512_v49 = vrot.slane %v9108_v18, 7  ;;  %v2516_v56 = vrot.slane %v9112_v10, 7  ;;  %v2520_v9 = vrot.slane %v9116_v63, 7  ;;  %v2524_v23 = vrot.slane %v9120_v5, 7 }
 0x4cf   : > { %v4718_v59 = vcombine.low %v4710_v7, %v4717_v53  ;;  %v4742_v19 = vcombine.low %v4734_v48, %v4741_v43  ;;  %11864 = vst [vmem:[#allocation32_spill] sm:$0xff] %v9124_v40  ;;  %11866 = vst [vmem:[#allocation42_spill] sm:$0xff] %v9128_v32  ;;  %v2528_v14 = vrot.slane %v9124_v40, 7  ;;  %v2532_v21 = vrot.slane %v9128_v32, 7  ;;  %v11869_v48 = vld [vmem:[#allocation8_spill] sm:$0xff]  ;;  %v11942_v63 = vld [vmem:[#allocation47_spill] sm:$0xff] }
 0x4d0   : > { %v9141_v7 = vrot.slane %v11867_v41, %v11850_v34  ;;  %v9145_v35 = vrot.slane %v11869_v48, %v11850_v34  ;;  %v9149_v42 = vrot.slane %v11871_v26, %v11850_v34  ;;  %v9153_v36 = vrot.slane %v11873_v58, %v11850_v34  ;;  %v11883_v58 = vld [vmem:[#allocation153_spill] sm:$0xff]  ;;  %v11886_v48 = vld [vmem:[#allocation154_spill] sm:$0xff]  ;;  %v11946_v18 = vld [vmem:[#allocation51_spill] sm:$0xff] }
 0x4d1   : > { %4719 = vrot.lane.b32.xlu1 %v4718_v59, %s5869_s9  ;;  %v9157_v17 = vrot.slane %v11875_v3, %v11850_v34  ;;  %v9161_v51 = vrot.slane %v11877_v15, %v11850_v34  ;;  %v9165_v22 = vrot.slane %v11879_v31, %v11850_v34  ;;  %v9169_v53 = vrot.slane %v11881_v44, %v11850_v34  ;;  %v11944_v10 = vld [vmem:[#allocation49_spill] sm:$0xff]  ;;  %v11966_v16 = vld [vmem:[#allocation160_spill] sm:$0xff] }
 0x4d2   : > { %11868 = vst [vmem:[#allocation107_spill] sm:$0xff] %v9141_v7  ;;  %11870 = vst [vmem:[#allocation247_spill] sm:$0xff] %v9145_v35  ;;  %v2760_v43 = vrot.slane %v9141_v7, 7  ;;  %v2764_v61 = vrot.slane %v9145_v35, 7  ;;  %v2768_v4 = vrot.slane %v9149_v42, 7  ;;  %v2772_v59 = vrot.slane %v9153_v36, 7 }
 0x4d3   : > { %11872 = vst [vmem:[#allocation33_spill] sm:$0xff] %v9149_v42  ;;  %11874 = vst [vmem:[#allocation43_spill] sm:$0xff] %v9153_v36  ;;  %v2780_v15 = vrot.slane %v9161_v51, 7  ;;  %v2784_v3 = vrot.slane %v9165_v22, 7  ;;  %v2788_v31 = vrot.slane %v9169_v53, 7  ;;  %vm11884_vm4 = vnez %v11883_v58  ;;  %v11892_v58 = vld [vmem:[#allocation156_spill] sm:$0xff] }
 0x4d4   : > { %11876 = vst [vmem:[#allocation108_spill] sm:$0xff] %v9157_v17  ;;  %11878 = vst [vmem:[#allocation248_spill] sm:$0xff] %v9161_v51  ;;  %v9181_v44 = vsel %vm11884_vm4, %v2504_v25, %v2760_v43  ;;  %vm11887_vm8 = vnez %v11886_v48  ;;  %vm11890_vm0 = vnez %v11889_v47  ;;  %vm11893_vm7 = vnez %v11892_v58  ;;  %v11895_v48 = vld [vmem:[#allocation201_spill] sm:$0xff]  ;;  %v11910_v47 = vld [vmem:[#allocation172_spill] sm:$0xff] }
 0x4d5   : > { %4743 = vrot.lane.b32.xlu1 %v4742_v19, %s5868_s8  ;;  %11880 = vst [vmem:[#allocation34_spill] sm:$0xff] %v9165_v22  ;;  %11882 = vst [vmem:[#allocation44_spill] sm:$0xff] %v9169_v53  ;;  %v2776_v19 = vrot.slane %v9157_v17, 7  ;;  %v9189_v41 = vsel %vm11887_vm8, %v2508_v8, %v2764_v61  ;;  %v9197_v24 = vsel %vm11890_vm0, %v2512_v49, %v2768_v4  ;;  %vm11896_vm14 = vnez %v11895_v48  ;;  %v11898_v49 = vld [vmem:[#allocation202_spill] sm:$0xff]  ;;  %v11913_v25 = vld [vmem:[#allocation219_spill] sm:$0xff] }
 0x4d6   : > { %11885 = vst [vmem:[#allocation61_spill] sm:$0xff] %v9181_v44  ;;  %11888 = vst [vmem:[#allocation62_spill] sm:$0xff] %v9189_v41  ;;  %v9205_v43 = vsel %vm11893_vm7, %v2516_v56, %v2772_v59  ;;  %vm11899_vm10 = vnez %v11898_v49  ;;  %v11901_v59 = vld [vmem:[#allocation203_spill] sm:$0xff]  ;;  %v3810_v33 = vrot.slane %v11942_v63, %v11850_v34  ;;  %v3866_v0 = vrot.slane %v11944_v10, %v11850_v34 }
 0x4d7   : > { %11891 = vst [vmem:[#allocation63_spill] sm:$0xff] %v9197_v24  ;;  %11894 = vst [vmem:[#allocation64_spill] sm:$0xff] %v9205_v43  ;;  %v9213_v61 = vsel %vm11896_vm14, %v2520_v9, %v2776_v19  ;;  %v9221_v4 = vsel %vm11899_vm10, %v2524_v23, %v2780_v15  ;;  %vm11902_vm6 = vnez %v11901_v59  ;;  %v11904_v19 = vld [vmem:[#allocation204_spill] sm:$0xff]  ;;  %v11907_v15 = vld [vmem:[#allocation169_spill] sm:$0xff]  ;;  %v3004_v9 = vcombine.high %v11910_v47, %v11910_v47 }
 0x4d8   : > { %11897 = vst [vmem:[#allocation101_spill] sm:$0xff] %v9213_v61  ;;  %11900 = vst [vmem:[#allocation102_spill] sm:$0xff] %v9221_v4  ;;  %v9229_v58 = vsel %vm11902_vm6, %v2528_v14, %v2784_v3  ;;  %vm11905_vm12 = vnez %v11904_v19  ;;  %v2902_v49 = vcombine.high %v11907_v15, %v11907_v15  ;;  %v11908_v59 = vld [vmem:[#allocation170_spill] sm:$0xff]  ;;  %v11909_v3 = vld [vmem:[#allocation171_spill] sm:$0xff]  ;;  %v3106_v23 = vcombine.high %v11913_v25, %v11913_v25 }
 0x4d9   : > { %11903 = vst [vmem:[#allocation103_spill] sm:$0xff] %v9229_v58  ;;  %v9237_v48 = vsel %vm11905_vm12, %v2532_v21, %v2788_v31  ;;  %v2936_v14 = vcombine.high %v11908_v59, %v11908_v59  ;;  %v2970_v56 = vcombine.high %v11909_v3, %v11909_v3  ;;  %v11911_v19 = vld [vmem:[#allocation217_spill] sm:$0xff]  ;;  %v11912_v31 = vld [vmem:[#allocation218_spill] sm:$0xff]  ;;  %v3140_v15 = vcombine.high %v11914_v29, %v11914_v29  ;;  %v11943_v61 = vld [vmem:[#allocation48_spill] sm:$0xff] }
 0x4da   : > { %11906 = vst [vmem:[#allocation104_spill] sm:$0xff] %v9237_v48  ;;  %v3038_v21 = vcombine.high %v11911_v19, %v11911_v19  ;;  %v3072_v8 = vcombine.high %v11912_v31, %v11912_v31  ;;  %v3219_v26 = vrot.slane %v2902_v49, 7  ;;  %v3243_v38 = vrot.slane %v3004_v9, 7  ;;  %v11941_v4 = vld [vmem:[#allocation46_spill] sm:$0xff]  ;;  %v11973_v53 = vld [vmem:[#allocation231_spill] sm:$0xff]  ;;  %v11975_v19 = vld [vmem:[#allocation232_spill] sm:$0xff] }
 0x4db   : > { %v3227_v59 = vrot.slane %v2936_v14, 7  ;;  %v3235_v2 = vrot.slane %v2970_v56, 7  ;;  %v3267_v52 = vrot.slane %v3106_v23, 7  ;;  %v3275_v47 = vrot.slane %v3140_v15, 7  ;;  %v11945_v43 = vld [vmem:[#allocation50_spill] sm:$0xff]  ;;  %v11976_v25 = vld [vmem:[#allocation213_spill] sm:$0xff] }
 0x4dc   : > { %v3251_v3 = vrot.slane %v3038_v21, 7  ;;  %v3259_v46 = vrot.slane %v3072_v8, 7  ;;  %vm9259_vm4 = vcmp.gt.f32.partialorder %v2902_v49, %v3219_v26  ;;  %vm9271_vm7 = vcmp.gt.f32.partialorder %v3004_v9, %v3243_v38  ;;  %v11977_v29 = vld [vmem:[#allocation237_spill] sm:$0xff]  ;;  %v11978_v31 = vld [vmem:[#allocation215_spill] sm:$0xff] }
 0x4dd   : > { %vm9263_vm8 = vcmp.gt.f32.partialorder %v2936_v14, %v3227_v59  ;;  %vm9267_vm0 = vcmp.gt.f32.partialorder %v2970_v56, %v3235_v2  ;;  %vm9283_vm6 = vcmp.gt.f32.partialorder %v3106_v23, %v3267_v52  ;;  %vm9287_vm12 = vcmp.gt.f32.partialorder %v3140_v15, %v3275_v47 }
 0x4de   : > { %vm9275_vm14 = vcmp.gt.f32.partialorder %v3038_v21, %v3251_v3  ;;  %vm9279_vm10 = vcmp.gt.f32.partialorder %v3072_v8, %v3259_v46  ;;  %v9293_v32 = vsel %vm9259_vm4, %v2902_v49, %v3219_v26  ;;  %v9297_v62 = vsel %vm9263_vm8, %v2936_v14, %v3227_v59  ;;  %v11937_v59 = vld [vmem:[#allocation58_spill] sm:$0xff] }
 0x4df   : > { %v9301_v48 = vsel %vm9267_vm0, %v2970_v56, %v3235_v2  ;;  %v9305_v22 = vsel %vm9271_vm7, %v3004_v9, %v3243_v38  ;;  %v9309_v40 = vsel %vm9275_vm14, %v3038_v21, %v3251_v3  ;;  %v9313_v26 = vsel %vm9279_vm10, %v3072_v8, %v3259_v46  ;;  %v11932_v56 = vld [vmem:[#allocation53_spill] sm:$0xff]  ;;  %v11933_v9 = vld [vmem:[#allocation54_spill] sm:$0xff]  ;;  %v11934_v21 = vld [vmem:[#allocation55_spill] sm:$0xff] }
 0x4e0   : > { %v9317_v49 = vsel %vm9283_vm6, %v3106_v23, %v3267_v52  ;;  %v9321_v2 = vsel %vm9287_vm12, %v3140_v15, %v3275_v47  ;;  %v9325_v38 = vrot.slane %v11932_v56, %v11850_v34  ;;  %v9329_v14 = vrot.slane %v11933_v9, %v11850_v34  ;;  %v11935_v8 = vld [vmem:[#allocation56_spill] sm:$0xff]  ;;  %v11936_v23 = vld [vmem:[#allocation57_spill] sm:$0xff]  ;;  %v11938_v47 = vld [vmem:[#allocation59_spill] sm:$0xff] }
 0x4e1   : > { %11931 = vst [vmem:[#allocation22_spill] sm:$0xff] %v9321_v2  ;;  %v9333_v46 = vrot.slane %v11934_v21, %v11850_v34  ;;  %v9337_v52 = vrot.slane %v11935_v8, %v11850_v34  ;;  %v9341_v15 = vrot.slane %v11936_v23, %v11850_v34  ;;  %v9345_v3 = vrot.slane %v11937_v59, %v11850_v34  ;;  %v11939_v56 = vld [vmem:[#allocation60_spill] sm:$0xff] }
 0x4e2   : > { %v9349_v9 = vrot.slane %v11938_v47, %v11850_v34  ;;  %v9353_v21 = vrot.slane %v11939_v56, %v11850_v34  ;;  %v3704_v37 = vrot.slane %v9325_v38, 7  ;;  %v3708_v8 = vrot.slane %v9329_v14, 7 }
 0x4e3   : > { %v3712_v58 = vrot.slane %v9333_v46, 7  ;;  %v3716_v23 = vrot.slane %v9337_v52, 7  ;;  %v3720_v51 = vrot.slane %v9341_v15, 7  ;;  %v3724_v59 = vrot.slane %v9345_v3, 7 }
 0x4e4   : > { %v3728_v5 = vrot.slane %v9349_v9, 7  ;;  %v3732_v47 = vrot.slane %v9353_v21, 7  ;;  %v3754_v56 = vrot.slane %v11940_v54, %v11850_v34  ;;  %v3782_v17 = vrot.slane %v11941_v4, %v11850_v34  ;;  %v11947_v54 = vld [vmem:[#allocation52_spill] sm:$0xff] }
 0x4e5   : > { %v3838_v36 = vrot.slane %v11943_v61, %v11850_v34  ;;  %v3894_v42 = vrot.slane %v11945_v43, %v11850_v34  ;;  %v3922_v27 = vrot.slane %v11946_v18, %v11850_v34  ;;  %v3950_v24 = vrot.slane %v11947_v54, %v11850_v34  ;;  %v11952_v54 = vld [vmem:[#allocation179_spill] sm:$0xff] }
 0x4e6   : > { %v3960_v35 = vrot.slane %v3754_v56, 7  ;;  %v3964_v4 = vrot.slane %v3782_v17, 7  ;;  %v3968_v39 = vrot.slane %v3810_v33, 7  ;;  %v3976_v63 = vrot.slane %v3866_v0, 7 }
 0x4e7   : > { %v3972_v20 = vrot.slane %v3838_v36, 7  ;;  %v3980_v41 = vrot.slane %v3894_v42, 7  ;;  %v3984_v7 = vrot.slane %v3922_v27, 7  ;;  %v3988_v61 = vrot.slane %v3950_v24, 7 }
 0x4e8   : > { %vm11949_vm15 = vnez %v11948_v11  ;;  %v3995_v43 = vsel %vm9259_vm4, %v9325_v38, %v3754_v56  ;;  %vm11951_vm11 = vnez %v11950_v55  ;;  %v4003_v34 = vsel %vm9263_vm8, %v9329_v14, %v3782_v17  ;;  %v11954_v11 = vld [vmem:[#allocation180_spill] sm:$0xff]  ;;  %v11956_v55 = vld [vmem:[#allocation225_spill] sm:$0xff]  ;;  %v11979_v56 = vld [vmem:[#allocation239_spill] sm:$0xff] }
 0x4e9   : > { %v3994_v10 = vsel %vm11949_vm15, %v3704_v37, %v3960_v35  ;;  %v4002_v18 = vsel %vm11951_vm11, %v3708_v8, %v3964_v4  ;;  %vm11953_vm3 = vnez %v11952_v54  ;;  %v4011_v2 = vsel %vm9267_vm0, %v9333_v46, %v3810_v33  ;;  %v11958_v54 = vld [vmem:[#allocation226_spill] sm:$0xff]  ;;  %v11960_v4 = vld [vmem:[#allocation227_spill] sm:$0xff]  ;;  %v11983_v46 = vld [vmem:[#allocation105_spill] sm:$0xff] }
 0x4ea   : > { %v4010_v44 = vsel %vm11953_vm3, %v3712_v58, %v3968_v39  ;;  %vm11955_vm15 = vnez %v11954_v11  ;;  %v4019_v6 = vsel %vm9271_vm7, %v9337_v52, %v3838_v36  ;;  %vm11957_vm11 = vnez %v11956_v55  ;;  %v11962_v58 = vld [vmem:[#allocation228_spill] sm:$0xff]  ;;  %v11980_v38 = vld [vmem:[#allocation22_spill] sm:$0xff]  ;;  %v11984_v8 = vld [vmem:[#allocation107_spill] sm:$0xff] }
 0x4eb   : > { %v4018_v37 = vsel %vm11955_vm15, %v3716_v23, %v3972_v20  ;;  %v4026_v35 = vsel %vm11957_vm11, %v3720_v51, %v3976_v63  ;;  %v4027_v17 = vsel %vm9275_vm14, %v9341_v15, %v3866_v0  ;;  %vm11959_vm3 = vnez %v11958_v54  ;;  %v11964_v51 = vld [vmem:[#allocation159_spill] sm:$0xff]  ;;  %v11986_v15 = vld [vmem:[#allocation62_spill] sm:$0xff] }
 0x4ec   : > { %v4034_v39 = vsel %vm11959_vm3, %v3724_v59, %v3980_v41  ;;  %v4035_v33 = vsel %vm9279_vm10, %v9345_v3, %v3894_v42  ;;  %vm11961_vm4 = vnez %v11960_v4  ;;  %v4043_v36 = vsel %vm9283_vm6, %v9349_v9, %v3922_v27  ;;  %v11965_v41 = vld [vmem:[#allocation183_spill] sm:$0xff]  ;;  %v11967_v42 = vld [vmem:[#allocation184_spill] sm:$0xff]  ;;  %v11969_v27 = vld [vmem:[#allocation189_spill] sm:$0xff] }
 0x4ed   : > { %v4042_v20 = vsel %vm11961_vm4, %v3728_v5, %v3984_v7  ;;  %vm11963_vm8 = vnez %v11962_v58  ;;  %v4051_v0 = vsel %vm9287_vm12, %v9353_v21, %v3950_v24  ;;  %vm4058_vm0 = vcmp.gt.f32.partialorder %v11965_v41, %v11964_v51  ;;  %v11970_v5 = vld [vmem:[#allocation167_spill] sm:$0xff]  ;;  %v11981_v9 = vld [vmem:[#allocation61_spill] sm:$0xff] }
 0x4ee   : > { %v4050_v63 = vsel %vm11963_vm8, %v3732_v47, %v3988_v61  ;;  %vm4059_vm7 = vcmp.gt.f32.partialorder %v9293_v32, %v9067_v13  ;;  %vm10906_vm14 = vcmp.gt.f32.partialorder %v11967_v42, %v11966_v16  ;;  %vm4067_vm10 = vcmp.gt.f32.partialorder %v9297_v62, %v9071_v1  ;;  %v11971_v24 = vld [vmem:[#allocation191_spill] sm:$0xff]  ;;  %v11974_v61 = vld [vmem:[#allocation208_spill] sm:$0xff]  ;;  %v11988_v47 = vld [vmem:[#allocation245_spill] sm:$0xff] }
 0x4ef   : > { %v11972_v7 = vld [vmem:[#allocation207_spill] sm:$0xff]  ;;  %vm4091_vm4 = vcmp.gt.f32.partialorder %v9309_v40, %v9084_v12  ;;  %vm4098_vm8 = vcmp.gt.f32.partialorder %v11975_v19, %v11974_v61  ;;  %vm10911_vm6 = vcmp.gt.f32.partialorder %v9313_v26, %v9088_v45  ;;  %vm10910_vm15 = vcmp.gt.f32.partialorder %v11977_v29, %v11976_v25 }
 0x4f0   : > { %vm10909_vm12 = vcmp.gt.f32.partialorder %v9317_v49, %v9092_v50  ;;  %vm10908_vm11 = vcmp.gt.f32.partialorder %v11979_v56, %v11978_v31  ;;  %vm10907_vm3 = vcmp.gt.f32.partialorder %v11980_v38, %v9096_v57  ;;  %v4860_v14 = vsel %vm4058_vm0, %v3994_v10, %v11981_v9  ;;  %v11989_v11 = vld [vmem:[#allocation247_spill] sm:$0xff]  ;;  %v11995_v9 = vld [vmem:[#allocation33_spill] sm:$0xff] }
 0x4f1   : > { %v11985_v52 = vsel %vm9033_vm9, %v11983_v46, %v11984_v8  ;;  %v4868_v59 = vsel %vm10906_vm14, %v4002_v18, %v11986_v15  ;;  %v11990_v55 = vsel %vm9037_vm2, %v11988_v47, %v11989_v11  ;;  %v11991_v54 = vld [vmem:[#allocation63_spill] sm:$0xff]  ;;  %vm11992_vm9 = vcmp.gt.f32.partialorder %v11969_v27, %v11968_v60  ;;  %v11998_v46 = vld [vmem:[#allocation64_spill] sm:$0xff]  ;;  %v12005_v47 = vld [vmem:[#allocation101_spill] sm:$0xff] }
 0x4f2   : > { %v4861_v23 = vsel %vm4059_vm7, %v3995_v43, %v11985_v52  ;;  %v4869_v10 = vsel %vm4067_vm10, %v4003_v34, %v11990_v55  ;;  %v4876_v4 = vsel %vm11992_vm9, %v4010_v44, %v11991_v54  ;;  %v11994_v58 = vld [vmem:[#allocation31_spill] sm:$0xff]  ;;  %vm11997_vm14 = vcmp.gt.f32.partialorder %v9301_v48, %v9076_v28  ;;  %v12001_v52 = vld [vmem:[#allocation41_spill] sm:$0xff]  ;;  %v12008_v55 = vld [vmem:[#allocation106_spill] sm:$0xff] }
 0x4f3   : > { %v11996_v21 = vsel %vm9041_vm13, %v11994_v58, %v11995_v9  ;;  %vm11999_vm2 = vcmp.gt.f32.partialorder %v11971_v24, %v11970_v5  ;;  %v12002_v15 = vld [vmem:[#allocation43_spill] sm:$0xff]  ;;  %vm12004_vm9 = vcmp.gt.f32.partialorder %v9305_v22, %v9080_v30  ;;  %vm12006_vm13 = vcmp.gt.f32.partialorder %v11973_v53, %v11972_v7  ;;  %v12009_v54 = vld [vmem:[#allocation108_spill] sm:$0xff]  ;;  %v12011_v58 = vld [vmem:[#allocation102_spill] sm:$0xff] }
 0x4f4   : > { %v4877_v18 = vsel %vm11997_vm14, %v4011_v2, %v11996_v21  ;;  %v4884_v8 = vsel %vm11999_vm2, %v4018_v37, %v11998_v46  ;;  %v12003_v3 = vsel %vm9045_vm1, %v12001_v52, %v12002_v15  ;;  %v4892_v11 = vsel %vm12006_vm13, %v4026_v35, %v12005_v47  ;;  %v12014_v21 = vld [vmem:[#allocation246_spill] sm:$0xff]  ;;  %v12015_v46 = vld [vmem:[#allocation248_spill] sm:$0xff]  ;;  %v12017_v52 = vld [vmem:[#allocation103_spill] sm:$0xff] }
 0x4f5   : > { %v4885_v44 = vsel %vm12004_vm9, %v4019_v6, %v12003_v3  ;;  %v12010_v43 = vsel %vm9049_vm5, %v12008_v55, %v12009_v54  ;;  %v4900_v9 = vsel %vm4098_vm8, %v4034_v39, %v12011_v58  ;;  %v12012_v6 = vld [vmem:[#allocation244_spill] sm:$0xff]  ;;  %v4908_v15 = vsel %vm10910_vm15, %v4042_v20, %v12017_v52  ;;  %v12021_v47 = vld [vmem:[#allocation34_spill] sm:$0xff] }
 0x4f6   : > { %v4893_v37 = vsel %vm4091_vm4, %v4027_v17, %v12010_v43  ;;  %vm12013_vm1 = vnez %v12012_v6  ;;  %v12018_v17 = vld [vmem:[#allocation26_spill] sm:$0xff]  ;;  %v12020_v3 = vld [vmem:[#allocation32_spill] sm:$0xff]  ;;  %v5018_v52 = vrot.slane %v4884_v8, 1  ;;  %vm12029_vm2 = vcmask 1041409  }
 0x4f7   : > { %v12016_v34 = vsel %vm12013_vm1, %v12014_v21, %v12015_v46  ;;  %vm12019_vm5 = vnez %v12018_v17  ;;  %v12023_v55 = vld [vmem:[#allocation104_spill] sm:$0xff]  ;;  %v12026_v43 = vld [vmem:[#allocation42_spill] sm:$0xff]  ;;  %v4934_v21 = vrot.slane %v4860_v14, 1  ;;  %v4962_v46 = vrot.slane %v4868_v59, 1  ;;  %vm12030_vm9 = vmmov %vm12029_vm2 }
 0x4f8   : > { %v4901_v35 = vsel %vm10911_vm6, %v4035_v33, %v12016_v34  ;;  %v12022_v2 = vsel %vm12019_vm5, %v12020_v3, %v12021_v47  ;;  %v4916_v54 = vsel %vm10908_vm11, %v4050_v63, %v12023_v55  ;;  %v12024_v33 = vld [vmem:[#allocation40_spill] sm:$0xff]  ;;  %v4990_v34 = vrot.slane %v4876_v4, 1  ;;  %vm12033_vm5 = vmmov %vm12029_vm2 }
 0x4f9   : > { %v4909_v39 = vsel %vm10909_vm12, %v4043_v36, %v12022_v2  ;;  %vm12025_vm14 = vnez %v12024_v33  ;;  %v12027_v58 = vld [vmem:[#allocation44_spill] sm:$0xff]  ;;  %v5046_v17 = vrot.slane %v4892_v11, 1  ;;  %v5074_v36 = vrot.slane %v4900_v9, 1 }
 0x4fa   : > { %v12028_v6 = vsel %vm12025_vm14, %v12026_v43, %v12027_v58  ;;  %v4937_v3 = vsel %vm12029_vm2, %v4861_v23, %v4934_v21  ;;  %v4965_v47 = vsel %vm12030_vm9, %v4869_v10, %v4962_v46  ;;  %v5102_v63 = vrot.slane %v4908_v15, 1  ;;  %vm12034_vm14 = vmmov %vm12029_vm2 }
 0x4fb   : > { %v4917_v20 = vsel %vm10907_vm3, %v4051_v0, %v12028_v6  ;;  %v5130_v2 = vrot.slane %v4916_v54, 1  ;;  %vm12031_vm13 = vcmask 1043459   ;;  %v4993_v43 = vsel %vm12033_vm5, %v4877_v18, %v4990_v34 }
 0x4fc   : > { %v4938_v55 = vsel %vm12031_vm13, %v4861_v23, %v4937_v3  ;;  %vm12032_vm1 = vmmov %vm12031_vm13  ;;  %v5021_v0 = vsel %vm12034_vm14, %v4885_v44, %v5018_v52  ;;  %vm12035_vm3 = vcmask 1045509   ;;  %vm12039_vm2 = vcmask 1047559  }
 0x4fd   : > { %v4966_v33 = vsel %vm12032_vm1, %v4869_v10, %v4965_v47  ;;  %v4939_v14 = vsel %vm12035_vm3, %v4861_v23, %v4938_v55  ;;  %vm12036_vm11 = vmmov %vm12035_vm3  ;;  %v5049_v21 = vsel %vm12034_vm14, %v4893_v37, %v5046_v17 }
 0x4fe   : > { %v4967_v59 = vsel %vm12036_vm11, %v4869_v10, %v4966_v33  ;;  %vm12037_vm12 = vmmov %vm12032_vm1  ;;  %v4940_v11 = vsel %vm12039_vm2, %v4861_v23, %v4939_v14 }
 0x4ff   : > { %v4994_v4 = vsel %vm12037_vm12, %v4877_v18, %v4993_v43  ;;  %vm12038_vm15 = vmmov %vm12032_vm1 }
 0x500   : > { %v5022_v8 = vsel %vm12038_vm15, %v4885_v44, %v5021_v0  ;;  %vm12040_vm9 = vmmov %vm12039_vm2 }
 0x501   : > { %v4968_v9 = vsel %vm12040_vm9, %v4869_v10, %v4967_v59  ;;  %vm12041_vm6 = vmmov %vm12035_vm3 }
 0x502   : > { %v4995_v15 = vsel %vm12041_vm6, %v4877_v18, %v4994_v4  ;;  %vm12042_vm13 = vmmov %vm12035_vm3  ;;  %v5216_v43 = vcombine.low %v4940_v11, %v4968_v9  ;;  %v12058_v4 = vld [vmem:[#allocation16_spill] sm:$0xff] }
 0x503   : > { %v5023_v54 = vsel %vm12042_vm13, %v4885_v44, %v5022_v8  ;;  %vm12043_vm1 = vmmov %vm12039_vm2 }
 0x504   : > { %v4996_v58 = vsel %vm12043_vm1, %v4877_v18, %v4995_v15  ;;  %vm12044_vm5 = vmmov %vm12043_vm1 }
 0x505   : > { %v5024_v6 = vsel %vm12044_vm5, %v4885_v44, %v5023_v54  ;;  %vm12045_vm3 = vmmov %vm12034_vm14 }
 0x506   : > { %v5077_v46 = vsel %vm12045_vm3, %v4901_v35, %v5074_v36  ;;  %vm12046_vm11 = vmmov %vm12037_vm12  ;;  %v5225_v0 = vcombine.low %v4996_v58, %v5024_v6 }
 0x507   : > { %v5050_v34 = vsel %vm12046_vm11, %v4893_v37, %v5049_v21  ;;  %vm12047_vm12 = vmmov %vm12046_vm11 }
 0x508   : > { %v5078_v52 = vsel %vm12047_vm12, %v4901_v35, %v5077_v46  ;;  %vm12048_vm15 = vmmov %vm12045_vm3 }
 0x509   : > { %v5105_v23 = vsel %vm12048_vm15, %v4909_v39, %v5102_v63  ;;  %vm12049_vm2 = vmmov %vm12045_vm3  ;;  %v5079_v47 = vsel %vm12041_vm6, %v4901_v35, %v5078_v52 }
 0x50a   : > { %v5133_v10 = vsel %vm12049_vm2, %v4917_v20, %v5130_v2  ;;  %vm12050_vm9 = vmmov %vm12041_vm6  ;;  %vm12059_vm2 = vcmp.gt.f32.partialorder %v11967_v42, %v11966_v16 }
 0x50b   : > { %v5051_v3 = vsel %vm12050_vm9, %v4893_v37, %v5050_v34  ;;  %vm12051_vm13 = vmmov %vm12046_vm11  ;;  %v4130_v8 = vsel %vm12059_vm2, %v11967_v42, %v11966_v16  ;;  %vm12063_vm9 = vcmp.gt.f32.partialorder %v9305_v22, %v9080_v30 }
 0x50c   : > { %v5106_v18 = vsel %vm12051_vm13, %v4909_v39, %v5105_v23  ;;  %vm12052_vm1 = vmmov %vm12046_vm11  ;;  %v5052_v17 = vsel %vm12044_vm5, %v4893_v37, %v5051_v3  ;;  %v4122_v37 = vsel %vm4058_vm0, %v11965_v41, %v11964_v51  ;;  %v4131_v51 = vsel %vm4067_vm10, %v9297_v62, %v9071_v1 }
 0x50d   : > { %v5134_v44 = vsel %vm12052_vm1, %v4917_v20, %v5133_v10  ;;  %vm12053_vm14 = vmmov %vm12044_vm5  ;;  %vm12060_vm0 = vcmp.gt.f32.partialorder %v11969_v27, %v11968_v60  ;;  %vm12062_vm10 = vcmp.gt.f32.partialorder %v11971_v24, %v11970_v5  ;;  %v4147_v42 = vsel %vm12063_vm9, %v9305_v22, %v9080_v30 }
 0x50e   : > { %v5080_v36 = vsel %vm12053_vm14, %v4901_v35, %v5079_v47  ;;  %vm12054_vm3 = vmmov %vm12041_vm6  ;;  %v4123_v35 = vsel %vm4059_vm7, %v9293_v32, %v9067_v13  ;;  %v4138_v41 = vsel %vm12060_vm0, %v11969_v27, %v11968_v60  ;;  %vm12061_vm7 = vcmp.gt.f32.partialorder %v9301_v48, %v9076_v28  ;;  %v12066_v27 = vld [vmem:[#allocation15_spill] sm:$0xff] }
 0x50f   : > { %v5107_v55 = vsel %vm12054_vm3, %v4909_v39, %v5106_v18  ;;  %vm12055_vm11 = vmmov %vm12054_vm3  ;;  %v5234_v14 = vcombine.low %v5052_v17, %v5080_v36  ;;  %v4139_v16 = vsel %vm12061_vm7, %v9301_v48, %v9076_v28  ;;  %v4146_v1 = vsel %vm12062_vm10, %v11971_v24, %v11970_v5 }
 0x510   : > { %v5135_v33 = vsel %vm12055_vm11, %v4917_v20, %v5134_v44  ;;  %vm12056_vm12 = vmmov %vm12044_vm5  ;;  %vm12064_vm6 = vcmp.gt.f32.partialorder %v11973_v53, %v11972_v7  ;;  %v4155_v60 = vsel %vm4091_vm4, %v9309_v40, %v9084_v12  ;;  %v4162_v30 = vsel %vm4098_vm8, %v11975_v19, %v11974_v61 }
 0x511   : > { %v5108_v63 = vsel %vm12056_vm12, %v4909_v39, %v5107_v55  ;;  %vm12057_vm15 = vmmov %vm12044_vm5  ;;  %v9590_v39 = vrot.slane %v5216_v43, %v12058_v4  ;;  %v9606_v13 = vrot.slane %v5234_v14, %v12058_v4  ;;  %v4154_v28 = vsel %vm12064_vm6, %v11973_v53, %v11972_v7 }
 0x512   : > { %v5136_v2 = vsel %vm12057_vm15, %v4917_v20, %v5135_v33  ;;  %v9593_v20 = vrot.slane %v5225_v0, %v12058_v4  ;;  %vm12065_vm13 = vcmp.gt.f32.partialorder %v9313_v26, %v9088_v45  ;;  %vm12067_vm1 = vcmp.gt.f32.partialorder %v11977_v29, %v11976_v25 }
 0x513   : > { %v5243_v59 = vcombine.low %v5108_v63, %v5136_v2  ;;  %v4163_v22 = vsel %vm12065_vm13, %v9313_v26, %v9088_v45  ;;  %v4170_v12 = vsel %vm12067_vm1, %v11977_v29, %v11976_v25  ;;  %vm12068_vm4 = vcmp.gt.f32.partialorder %v9317_v49, %v9092_v50 }
 0x514   : > { %v5362_v62 = vcombine.low %v9590_v39, %v9593_v20  ;;  %v4171_v40 = vsel %vm12068_vm4, %v9317_v49, %v9092_v50  ;;  %vm12069_vm8 = vcmp.gt.f32.partialorder %v11979_v56, %v11978_v31  ;;  %vm12070_vm5 = vcmp.gt.f32.partialorder %v11980_v38, %v9096_v57 }
 0x515   : > { %v9609_v32 = vrot.slane %v5243_v59, %v12058_v4  ;;  %v4178_v45 = vsel %vm12069_vm8, %v11979_v56, %v11978_v31  ;;  %v4179_v24 = vsel %vm12070_vm5, %v11980_v38, %v9096_v57  ;;  %v4266_v7 = vrot.slane %v4122_v37, 1 }
 0x516   : > { %v5370_v5 = vrot.slane %v5362_v62, %v12066_v27  ;;  %v4294_v53 = vrot.slane %v4130_v8, 1  ;;  %v4322_v61 = vrot.slane %v4138_v41, 1  ;;  %v4350_v19 = vrot.slane %v4146_v1, 1 }
 0x517   : > { %v5363_v48 = vcombine.low %v9606_v13, %v9609_v32  ;;  %v4378_v25 = vrot.slane %v4154_v28, 1  ;;  %v4406_v50 = vrot.slane %v4162_v30, 1  ;;  %vm12071_vm14 = vcmask 1041409   ;;  %v12103_v30 = vld [vmem:[#allocation150_spill] sm:$0xff] }
 0x518   : > { %v4269_v29 = vsel %vm12071_vm14, %v4123_v35, %v4266_v7  ;;  %vm12072_vm3 = vmmov %vm12071_vm14  ;;  %v4434_v31 = vrot.slane %v4170_v12, 1  ;;  %vm12073_vm11 = vcmask 1043459   ;;  %vm12077_vm0 = vcmask 1045509  }
 0x519   : > { %v5377_v26 = vrot.slane %v5363_v48, %v12066_v27  ;;  %v4297_v11 = vsel %vm12072_vm3, %v4131_v51, %v4294_v53  ;;  %v4270_v56 = vsel %vm12073_vm11, %v4123_v35, %v4269_v29  ;;  %vm12074_vm12 = vmmov %vm12073_vm11  ;;  %vm12081_vm6 = vcmask 1047559   ;;  %v12102_v48 = vld [vmem:[#allocation149_spill] sm:$0xff] }
 0x51a   : > { %v4298_v9 = vsel %vm12074_vm12, %v4131_v51, %v4297_v11  ;;  %vm12075_vm15 = vmmov %vm12072_vm3  ;;  %v4271_v38 = vsel %vm12077_vm0, %v4123_v35, %v4270_v56  ;;  %v4462_v36 = vrot.slane %v4178_v45, 1  ;;  %v5664_v62 = vcombine.high %v9590_v39, %v9593_v20  ;;  %v12108_v11 = vld [vmem:[#allocation199_spill] sm:$0xff]  ;;  %v12109_v56 = vld [vmem:[#allocation200_spill] sm:$0xff] }
 0x51b   : > { %v5378_v49 = vcombine.low %v5370_v5, %v5377_v26  ;;  %v4325_v15 = vsel %vm12075_vm15, %v4139_v16, %v4322_v61  ;;  %vm12076_vm2 = vmmov %vm12072_vm3  ;;  %v4272_v21 = vsel %vm12081_vm6, %v4123_v35, %v4271_v38  ;;  %v5665_v1 = vcombine.high %v9606_v13, %v9609_v32  ;;  %v12104_v13 = vld [vmem:[#allocation151_spill] sm:$0xff]  ;;  %v12105_v26 = vld [vmem:[#allocation152_spill] sm:$0xff] }
 0x51c   : > { %v4353_v57 = vsel %vm12076_vm2, %v4147_v42, %v4350_v19  ;;  %vm12078_vm7 = vmmov %vm12077_vm0  ;;  %v1779_v32 = vcombine.high %v12104_v13, %v12104_v13  ;;  %v12106_v61 = vld [vmem:[#allocation197_spill] sm:$0xff] }
 0x51d   : > { %5379 = vrot.lane.b32.xlu0 %v5378_v49, %s5867_s30  ;;  %v4299_v54 = vsel %vm12078_vm7, %v4131_v51, %v4298_v9  ;;  %vm12079_vm10 = vmmov %vm12073_vm11  ;;  %v5396_v39 = vrot.slane %v5665_v1, %v12066_v27  ;;  %v1847_v19 = vcombine.high %v12106_v61, %v12106_v61  ;;  %v1949_v9 = vcombine.high %v12109_v56, %v12109_v56  ;;  %v12137_v1 = vld [vmem:[#allocation12_spill] sm:$0xff] }
 0x51e   : > { %v4326_v58 = vsel %vm12079_vm10, %v4139_v16, %v4325_v15  ;;  %vm12080_vm9 = vmmov %vm12079_vm10 }
 0x51f   : > { %v4354_v6 = vsel %vm12080_vm9, %v4147_v42, %v4353_v57  ;;  %vm12082_vm13 = vmmov %vm12081_vm6 }
 0x520   : > { %v4300_v46 = vsel %vm12082_vm13, %v4131_v51, %v4299_v54  ;;  %vm12083_vm1 = vmmov %vm12077_vm0 }
 0x521   : > { %v4327_v34 = vsel %vm12083_vm1, %v4139_v16, %v4326_v58  ;;  %vm12084_vm4 = vmmov %vm12077_vm0  ;;  %v4580_v2 = vcombine.low %v4272_v21, %v4300_v46  ;;  %v2037_v58 = vrot.slane %v1779_v32, 7  ;;  %v2053_v21 = vrot.slane %v1847_v19, 7 }
 0x522   : > { %v4355_v52 = vsel %vm12084_vm4, %v4147_v42, %v4354_v6  ;;  %vm12085_vm8 = vmmov %vm12081_vm6 }
 0x523   : > { %v4328_v23 = vsel %vm12085_vm8, %v4139_v16, %v4327_v34  ;;  %vm12086_vm5 = vmmov %vm12081_vm6  ;;  %v4587_v8 = vrot.slane %v4580_v2, %v12058_v4  ;;  %v12131_v2 = vmov 0 }
 0x524   : > { %v4356_v10 = vsel %vm12086_vm5, %v4147_v42, %v4355_v52  ;;  %vm12087_vm14 = vmmov %vm12076_vm2 }
 0x525   : > { %v4381_v3 = vsel %vm12087_vm14, %v4155_v60, %v4378_v25  ;;  %vm12088_vm3 = vmmov %vm12076_vm2  ;;  %v4589_v51 = vcombine.low %v4328_v23, %v4356_v10  ;;  %v12107_v25 = vld [vmem:[#allocation198_spill] sm:$0xff]  ;;  %v2077_v10 = vrot.slane %v1949_v9, 7 }
 0x526   : > { %v4409_v47 = vsel %vm12088_vm3, %v4163_v22, %v4406_v50  ;;  %vm12089_vm11 = vmmov %vm12080_vm9  ;;  %v1881_v50 = vcombine.high %v12107_v25, %v12107_v25 }
 0x527   : > { %v4382_v18 = vsel %vm12089_vm11, %v4155_v60, %v4381_v3  ;;  %vm12090_vm12 = vmmov %vm12080_vm9  ;;  %v4596_v28 = vrot.slane %v4589_v51, %v12058_v4  ;;  %v12110_v3 = vmov 0  ;;  %vm9749_vm11 = vcmp.gt.f32.partialorder %v1779_v32, %v2037_v58 }
 0x528   : > { %v4410_v44 = vsel %vm12090_vm12, %v4163_v22, %v4409_v47  ;;  %vm12091_vm15 = vmmov %vm12076_vm2  ;;  %v2061_v46 = vrot.slane %v1881_v50, 7  ;;  %v12113_v47 = vmov 0 }
 0x529   : > { %v4437_v17 = vsel %vm12091_vm15, %v4171_v40, %v4434_v31  ;;  %vm12092_vm2 = vmmov %vm12077_vm0  ;;  %v4411_v33 = vsel %vm12077_vm0, %v4163_v22, %v4410_v44  ;;  %v4750_v20 = vcombine.low %v4587_v8, %v4596_v28  ;;  %v5656_v45 = vcombine.high %v4587_v8, %v4596_v28  ;;  %v12139_v28 = vld [vmem:[#allocation13_spill] sm:$0xff] }
 0x52a   : > { %v4383_v55 = vsel %vm12092_vm2, %v4155_v60, %v4382_v18  ;;  %vm12093_vm7 = vmmov %vm12080_vm9  ;;  %v1915_v31 = vcombine.high %v12108_v11, %v12108_v11  ;;  %v12116_v18 = vmov 0  ;;  %v12119_v44 = vmov 0 }
 0x52b   : > { %v4438_v63 = vsel %vm12093_vm7, %v4171_v40, %v4437_v17  ;;  %vm12094_vm10 = vmmov %vm12086_vm5  ;;  %v4758_v49 = vrot.slane %v4750_v20, %v12066_v27  ;;  %v4782_v29 = vrot.slane %v5656_v45, %v12066_v27  ;;  %v12117_v18 = vsel %vm9749_vm11, 4294967295, %v12116_v18  ;;  %v12149_v45 = vld [vmem:[#allocation30_spill] sm:$0xff] }
 0x52c   : > { %v4384_v43 = vsel %vm12094_vm10, %v4155_v60, %v4383_v55  ;;  %vm12095_vm9 = vmmov %vm12086_vm5  ;;  %v1711_v60 = vcombine.high %v12102_v48, %v12102_v48  ;;  %v2069_v23 = vrot.slane %v1915_v31, 7  ;;  %12118 = vst [vmem:[#allocation69_spill] sm:$0xff] %v12117_v18  ;;  %vm9757_vm15 = vcmp.gt.f32.partialorder %v1847_v19, %v2053_v21 }
 0x52d   : > { %v4412_v0 = vsel %vm12095_vm9, %v4163_v22, %v4411_v33  ;;  %vm12096_vm6 = vmmov %vm12077_vm0  ;;  %v1745_v22 = vcombine.high %v12103_v30, %v12103_v30  ;;  %v12122_v55 = vmov 0  ;;  %vm9761_vm2 = vcmp.gt.f32.partialorder %v1881_v50, %v2061_v46 }
 0x52e   : > { %v4439_v14 = vsel %vm12096_vm6, %v4171_v40, %v4438_v63  ;;  %vm12097_vm13 = vmmov %vm12088_vm3  ;;  %v4598_v16 = vcombine.low %v4384_v43, %v4412_v0  ;;  %v2021_v38 = vrot.slane %v1711_v60, 7  ;;  %v12123_v55 = vsel %vm9757_vm15, 4294967295, %v12122_v55 }
 0x52f   : > { %v4465_v59 = vsel %vm12097_vm13, %v4179_v24, %v4462_v36  ;;  %vm12098_vm1 = vmmov %vm12086_vm5  ;;  %v2029_v54 = vrot.slane %v1745_v22, 7  ;;  %12124 = vst [vmem:[#allocation109_spill] sm:$0xff] %v12123_v55  ;;  %v12125_v33 = vmov 0  ;;  %v12128_v63 = vmov 0 }
 0x530   : > { %v4440_v37 = vsel %vm12098_vm1, %v4171_v40, %v4439_v14  ;;  %vm12099_vm4 = vmmov %vm12093_vm7  ;;  %v4605_v5 = vrot.slane %v4598_v16, %v12058_v4  ;;  %v5389_v40 = vrot.slane %v5664_v62, %v12066_v27  ;;  %vm9741_vm14 = vcmp.gt.f32.partialorder %v1711_v60, %v2021_v38  ;;  %v12135_v16 = vld [vmem:[#allocation11_spill] sm:$0xff] }
 0x531   : > { %v4466_v35 = vsel %vm12099_vm4, %v4179_v24, %v4465_v59  ;;  %vm12100_vm8 = vmmov %vm12077_vm0  ;;  %v12111_v3 = vsel %vm9741_vm14, 4294967295, %v12110_v3  ;;  %vm9745_vm3 = vcmp.gt.f32.partialorder %v1745_v22, %v2029_v54  ;;  %v12126_v33 = vsel %vm9761_vm2, 4294967295, %v12125_v33 }
 0x532   : > { %v4467_v41 = vsel %vm12100_vm8, %v4179_v24, %v4466_v35  ;;  %vm12101_vm5 = vmmov %vm12098_vm1  ;;  %v5397_v53 = vcombine.low %v5389_v40, %v5396_v39  ;;  %12112 = vst [vmem:[#allocation65_spill] sm:$0xff] %v12111_v3  ;;  %v12114_v47 = vsel %vm9745_vm3, 4294967295, %v12113_v47  ;;  %vm9765_vm0 = vcmp.gt.f32.partialorder %v1915_v31, %v2069_v23  ;;  %v12147_v39 = vld [vmem:[#allocation29_spill] sm:$0xff]  ;;  %v12234_v3 = vld [vmem:[#allocation182_spill] sm:$0xff] }
 0x533   : > { %v4468_v42 = vsel %vm12101_vm5, %v4179_v24, %v4467_v41  ;;  %v1813_v24 = vcombine.high %v12105_v26, %v12105_v26  ;;  %12115 = vst [vmem:[#allocation66_spill] sm:$0xff] %v12114_v47  ;;  %12127 = vst [vmem:[#allocation110_spill] sm:$0xff] %v12126_v33  ;;  %v12129_v63 = vsel %vm9765_vm0, 4294967295, %v12128_v63  ;;  %vm9769_vm7 = vcmp.gt.f32.partialorder %v1949_v9, %v2077_v10  ;;  %v12134_v41 = vld [vmem:[#allocation36_spill] sm:$0xff]  ;;  %v12224_v33 = vld [vmem:[#allocation45_spill] sm:$0xff] }
 0x534   : > { %v4607_v12 = vcombine.low %v4440_v37, %v4468_v42  ;;  %5398 = vrot.lane.b32.xlu0 %v5397_v53, %s5866_s29  ;;  %12130 = vst [vmem:[#allocation113_spill] sm:$0xff] %v12129_v63  ;;  %v12132_v2 = vsel %vm9769_vm7, 4294967295, %v12131_v2  ;;  %v9775_v43 = vsel %vm9741_vm14, %v1711_v60, %v2021_v38  ;;  %v9779_v0 = vsel %vm9745_vm3, %v1745_v22, %v2029_v54  ;;  %v12141_v60 = vld [vmem:[#allocation14_spill] sm:$0xff]  ;;  %v12143_v22 = vld [vmem:[#allocation27_spill] sm:$0xff] }
 0x535   : > { %v2045_v6 = vrot.slane %v1813_v24, 7  ;;  %12133 = vst [vmem:[#allocation114_spill] sm:$0xff] %v12132_v2  ;;  %v9784_v14 = vsel %vm9749_vm11, %v1779_v32, %v2037_v58  ;;  %v9792_v37 = vsel %vm9757_vm15, %v1847_v19, %v2053_v21  ;;  %v9796_v35 = vsel %vm9761_vm2, %v1881_v50, %v2061_v46  ;;  %v12151_v50 = vld [vmem:[#allocation7_spill] sm:$0xff]  ;;  %v12165_v46 = vld [vmem:[#allocation21_spill] sm:$0xff] }
 0x536   : > { %v4614_v7 = vrot.slane %v4607_v12, %v12058_v4  ;;  %v9800_v8 = vsel %vm9765_vm0, %v1915_v31, %v2069_v23  ;;  %v9804_v51 = vsel %vm9769_vm7, %v1949_v9, %v2077_v10  ;;  %v9808_v62 = vrot.slane %v12135_v16, %v12134_v41  ;;  %v12145_v12 = vld [vmem:[#allocation28_spill] sm:$0xff]  ;;  %v12155_v31 = vld [vmem:[#allocation9_spill] sm:$0xff]  ;;  %v12157_v9 = vld [vmem:[#allocation10_spill] sm:$0xff] }
 0x537   : > { %vm9753_vm12 = vcmp.gt.f32.partialorder %v1813_v24, %v2045_v6  ;;  %v9812_v42 = vrot.slane %v12137_v1, %v12134_v41  ;;  %v9816_v48 = vrot.slane %v12139_v28, %v12134_v41  ;;  %v9820_v30 = vrot.slane %v12141_v60, %v12134_v41  ;;  %v12161_v54 = vld [vmem:[#allocation19_spill] sm:$0xff]  ;;  %v12167_v60 = vld [vmem:[#allocation157_spill] sm:$0xff]  ;;  %v12252_v4 = vld [vmem:[#allocation166_spill] sm:$0xff] }
 0x538   : > { %v4751_v15 = vcombine.low %v4605_v5, %v4614_v7  ;;  %v5657_v57 = vcombine.high %v4605_v5, %v4614_v7  ;;  %v12120_v44 = vsel %vm9753_vm12, 4294967295, %v12119_v44  ;;  %v9788_v59 = vsel %vm9753_vm12, %v1813_v24, %v2045_v6  ;;  %12136 = vst [vmem:[#allocation81_spill] sm:$0xff] %v9808_v62  ;;  %v12163_v6 = vld [vmem:[#allocation20_spill] sm:$0xff] }
 0x539   : > { %12121 = vst [vmem:[#allocation70_spill] sm:$0xff] %v12120_v44  ;;  %12138 = vst [vmem:[#allocation82_spill] sm:$0xff] %v9812_v42  ;;  %v9824_v5 = vrot.slane %v12143_v22, %v12134_v41  ;;  %v9828_v40 = vrot.slane %v12145_v12, %v12134_v41  ;;  %v9832_v20 = vrot.slane %v12147_v39, %v12134_v41  ;;  %v2505_v32 = vrot.slane %v9808_v62, 7  ;;  %v12170_v39 = vld [vmem:[#allocation158_spill] sm:$0xff]  ;;  %v12232_v62 = vld [vmem:[#allocation181_spill] sm:$0xff] }
 0x53a   : > { %v4765_v34 = vrot.slane %v4751_v15, %v12066_v27  ;;  %v4789_v52 = vrot.slane %v5657_v57, %v12066_v27  ;;  %12140 = vst [vmem:[#allocation83_spill] sm:$0xff] %v9816_v48  ;;  %12142 = vst [vmem:[#allocation84_spill] sm:$0xff] %v9820_v30  ;;  %v9836_v13 = vrot.slane %v12149_v45, %v12134_v41  ;;  %v2509_v26 = vrot.slane %v9812_v42, 7  ;;  %v12159_v57 = vld [vmem:[#allocation17_spill] sm:$0xff]  ;;  %v12250_v27 = vld [vmem:[#allocation164_spill] sm:$0xff] }
 0x53b   : > { %12144 = vst [vmem:[#allocation125_spill] sm:$0xff] %v9824_v5  ;;  %12146 = vst [vmem:[#allocation126_spill] sm:$0xff] %v9828_v40  ;;  %v2513_v24 = vrot.slane %v9816_v48, 7  ;;  %v2517_v7 = vrot.slane %v9820_v30, 7  ;;  %v2521_v53 = vrot.slane %v9824_v5, 7  ;;  %v2525_v61 = vrot.slane %v9828_v40, 7 }
 0x53c   : > { %v4766_v17 = vcombine.low %v4758_v49, %v4765_v34  ;;  %v4790_v36 = vcombine.low %v4782_v29, %v4789_v52  ;;  %12148 = vst [vmem:[#allocation127_spill] sm:$0xff] %v9832_v20  ;;  %12150 = vst [vmem:[#allocation128_spill] sm:$0xff] %v9836_v13  ;;  %v2529_v19 = vrot.slane %v9832_v20, 7  ;;  %v2533_v25 = vrot.slane %v9836_v13, 7  ;;  %v12153_v29 = vld [vmem:[#allocation8_spill] sm:$0xff]  ;;  %v12226_v5 = vld [vmem:[#allocation47_spill] sm:$0xff] }
 0x53d   : > { %v9849_v49 = vrot.slane %v12151_v50, %v12134_v41  ;;  %v9853_v11 = vrot.slane %v12153_v29, %v12134_v41  ;;  %v9857_v56 = vrot.slane %v12155_v31, %v12134_v41  ;;  %v9861_v15 = vrot.slane %v12157_v9, %v12134_v41  ;;  %v12173_v29 = vld [vmem:[#allocation161_spill] sm:$0xff]  ;;  %v12176_v9 = vld [vmem:[#allocation162_spill] sm:$0xff]  ;;  %v12230_v48 = vld [vmem:[#allocation51_spill] sm:$0xff] }
 0x53e   : > { %4767 = vrot.lane.b32.xlu1 %v4766_v17, %s5867_s30  ;;  %v9865_v38 = vrot.slane %v12159_v57, %v12134_v41  ;;  %v9869_v58 = vrot.slane %v12161_v54, %v12134_v41  ;;  %v9873_v21 = vrot.slane %v12163_v6, %v12134_v41  ;;  %v9877_v34 = vrot.slane %v12165_v46, %v12134_v41  ;;  %v12179_v54 = vld [vmem:[#allocation205_spill] sm:$0xff]  ;;  %v12182_v46 = vld [vmem:[#allocation206_spill] sm:$0xff] }
 0x53f   : > { %12152 = vst [vmem:[#allocation89_spill] sm:$0xff] %v9849_v49  ;;  %12154 = vst [vmem:[#allocation90_spill] sm:$0xff] %v9853_v11  ;;  %v2761_v52 = vrot.slane %v9849_v49, 7  ;;  %v2765_v23 = vrot.slane %v9853_v11, 7  ;;  %v2769_v10 = vrot.slane %v9857_v56, 7  ;;  %v2773_v17 = vrot.slane %v9861_v15, 7 }
 0x540   : > { %12156 = vst [vmem:[#allocation93_spill] sm:$0xff] %v9857_v56  ;;  %12158 = vst [vmem:[#allocation94_spill] sm:$0xff] %v9861_v15  ;;  %v2781_v16 = vrot.slane %v9869_v58, 7  ;;  %v2785_v1 = vrot.slane %v9873_v21, 7  ;;  %v2789_v28 = vrot.slane %v9877_v34, 7  ;;  %vm12168_vm10 = vnez %v12167_v60  ;;  %v12228_v30 = vld [vmem:[#allocation49_spill] sm:$0xff] }
 0x541   : > { %12160 = vst [vmem:[#allocation133_spill] sm:$0xff] %v9865_v38  ;;  %12162 = vst [vmem:[#allocation134_spill] sm:$0xff] %v9869_v58  ;;  %v9889_v22 = vsel %vm12168_vm10, %v2505_v32, %v2761_v52  ;;  %vm12171_vm9 = vnez %v12170_v39  ;;  %vm12174_vm6 = vnez %v12173_v29  ;;  %vm12177_vm13 = vnez %v12176_v9  ;;  %v12192_v39 = vld [vmem:[#allocation174_spill] sm:$0xff]  ;;  %v12194_v9 = vld [vmem:[#allocation176_spill] sm:$0xff] }
 0x542   : > { %4791 = vrot.lane.b32.xlu1 %v4790_v36, %s5866_s29  ;;  %12164 = vst [vmem:[#allocation137_spill] sm:$0xff] %v9873_v21  ;;  %12166 = vst [vmem:[#allocation138_spill] sm:$0xff] %v9877_v34  ;;  %v2777_v36 = vrot.slane %v9865_v38, 7  ;;  %v9897_v45 = vsel %vm12171_vm9, %v2509_v26, %v2765_v23  ;;  %v9905_v31 = vsel %vm12174_vm6, %v2513_v24, %v2769_v10  ;;  %vm12180_vm1 = vnez %v12179_v54  ;;  %v12185_v23 = vld [vmem:[#allocation209_spill] sm:$0xff]  ;;  %v12256_v34 = vld [vmem:[#allocation211_spill] sm:$0xff] }
 0x543   : > { %12169 = vst [vmem:[#allocation71_spill] sm:$0xff] %v9889_v22  ;;  %12172 = vst [vmem:[#allocation95_spill] sm:$0xff] %v9897_v45  ;;  %v9913_v57 = vsel %vm12177_vm13, %v2517_v7, %v2773_v17  ;;  %vm12183_vm4 = vnez %v12182_v46  ;;  %vm12186_vm8 = vnez %v12185_v23  ;;  %v12188_v17 = vld [vmem:[#allocation210_spill] sm:$0xff]  ;;  %v3005_v54 = vcombine.high %v12194_v9, %v12194_v9  ;;  %v12195_v46 = vld [vmem:[#allocation221_spill] sm:$0xff] }
 0x544   : > { %12175 = vst [vmem:[#allocation72_spill] sm:$0xff] %v9905_v31  ;;  %12178 = vst [vmem:[#allocation96_spill] sm:$0xff] %v9913_v57  ;;  %v9921_v6 = vsel %vm12180_vm1, %v2521_v53, %v2777_v36  ;;  %v9929_v52 = vsel %vm12183_vm4, %v2525_v61, %v2781_v16  ;;  %v9937_v10 = vsel %vm12186_vm8, %v2529_v19, %v2785_v1  ;;  %vm12189_vm5 = vnez %v12188_v17  ;;  %v12191_v16 = vld [vmem:[#allocation173_spill] sm:$0xff]  ;;  %v12193_v1 = vld [vmem:[#allocation175_spill] sm:$0xff] }
 0x545   : > { %12181 = vst [vmem:[#allocation74_spill] sm:$0xff] %v9921_v6  ;;  %12184 = vst [vmem:[#allocation98_spill] sm:$0xff] %v9929_v52  ;;  %v9945_v36 = vsel %vm12189_vm5, %v2533_v25, %v2789_v28  ;;  %v2903_v60 = vcombine.high %v12191_v16, %v12191_v16  ;;  %v2937_v19 = vcombine.high %v12192_v39, %v12192_v39  ;;  %v12196_v28 = vld [vmem:[#allocation222_spill] sm:$0xff]  ;;  %v12197_v17 = vld [vmem:[#allocation223_spill] sm:$0xff]  ;;  %v3245_v26 = vrot.slane %v3005_v54, 7 }
 0x546   : > { %12187 = vst [vmem:[#allocation76_spill] sm:$0xff] %v9937_v10  ;;  %12190 = vst [vmem:[#allocation100_spill] sm:$0xff] %v9945_v36  ;;  %v2971_v29 = vcombine.high %v12193_v1, %v12193_v1  ;;  %v3039_v25 = vcombine.high %v12195_v46, %v12195_v46  ;;  %v3073_v23 = vcombine.high %v12196_v28, %v12196_v28  ;;  %v12198_v53 = vld [vmem:[#allocation224_spill] sm:$0xff]  ;;  %v12225_v52 = vld [vmem:[#allocation46_spill] sm:$0xff]  ;;  %vm12233_vm7 = vnez %v12232_v62 }
 0x547   : > { %v3107_v61 = vcombine.high %v12197_v17, %v12197_v17  ;;  %v3141_v16 = vcombine.high %v12198_v53, %v12198_v53  ;;  %v3221_v7 = vrot.slane %v2903_v60, 7  ;;  %v3229_v39 = vrot.slane %v2937_v19, 7  ;;  %v12227_v6 = vld [vmem:[#allocation48_spill] sm:$0xff]  ;;  %v12229_v57 = vld [vmem:[#allocation50_spill] sm:$0xff]  ;;  %v12248_v53 = vld [vmem:[#allocation163_spill] sm:$0xff] }
 0x548   : > { %v3237_v24 = vrot.slane %v2971_v29, 7  ;;  %v3253_v1 = vrot.slane %v3039_v25, 7  ;;  %v3261_v32 = vrot.slane %v3073_v23, 7  ;;  %vm9979_vm13 = vcmp.gt.f32.partialorder %v3005_v54, %v3245_v26  ;;  %v12238_v62 = vld [vmem:[#allocation186_spill] sm:$0xff]  ;;  %v12258_v17 = vld [vmem:[#allocation212_spill] sm:$0xff] }
 0x549   : > { %v3269_v50 = vrot.slane %v3107_v61, 7  ;;  %v3277_v9 = vrot.slane %v3141_v16, 7  ;;  %vm9967_vm10 = vcmp.gt.f32.partialorder %v2903_v60, %v3221_v7  ;;  %vm9971_vm9 = vcmp.gt.f32.partialorder %v2937_v19, %v3229_v39  ;;  %v12242_v46 = vld [vmem:[#allocation230_spill] sm:$0xff] }
 0x54a   : > { %vm9975_vm6 = vcmp.gt.f32.partialorder %v2971_v29, %v3237_v24  ;;  %vm9983_vm1 = vcmp.gt.f32.partialorder %v3039_v25, %v3253_v1  ;;  %vm9987_vm4 = vcmp.gt.f32.partialorder %v3073_v23, %v3261_v32  ;;  %v10001_v13 = vsel %vm9967_vm10, %v2903_v60, %v3221_v7  ;;  %v12246_v28 = vld [vmem:[#allocation234_spill] sm:$0xff] }
 0x54b   : > { %vm9991_vm8 = vcmp.gt.f32.partialorder %v3107_v61, %v3269_v50  ;;  %vm9995_vm5 = vcmp.gt.f32.partialorder %v3141_v16, %v3277_v9  ;;  %v10005_v2 = vsel %vm9971_vm9, %v2937_v19, %v3229_v39  ;;  %v10009_v36 = vsel %vm9975_vm6, %v2971_v29, %v3237_v24  ;;  %v12216_v19 = vld [vmem:[#allocation53_spill] sm:$0xff]  ;;  %v12217_v29 = vld [vmem:[#allocation54_spill] sm:$0xff] }
 0x54c   : > { %v10013_v21 = vsel %vm9979_vm13, %v3005_v54, %v3245_v26  ;;  %v10017_v20 = vsel %vm9983_vm1, %v3039_v25, %v3253_v1  ;;  %v10021_v7 = vsel %vm9987_vm4, %v3073_v23, %v3261_v32  ;;  %v10025_v60 = vsel %vm9991_vm8, %v3107_v61, %v3269_v50  ;;  %v12218_v25 = vld [vmem:[#allocation55_spill] sm:$0xff]  ;;  %v12219_v23 = vld [vmem:[#allocation56_spill] sm:$0xff]  ;;  %v12220_v61 = vld [vmem:[#allocation57_spill] sm:$0xff] }
 0x54d   : > { %v10029_v24 = vsel %vm9995_vm5, %v3141_v16, %v3277_v9  ;;  %v10033_v26 = vrot.slane %v12216_v19, %v12134_v41  ;;  %v10037_v54 = vrot.slane %v12217_v29, %v12134_v41  ;;  %v10041_v32 = vrot.slane %v12218_v25, %v12134_v41  ;;  %v12221_v39 = vld [vmem:[#allocation58_spill] sm:$0xff]  ;;  %v12222_v9 = vld [vmem:[#allocation59_spill] sm:$0xff]  ;;  %v12223_v29 = vld [vmem:[#allocation60_spill] sm:$0xff] }
 0x54e   : > { %12215 = vst [vmem:[#allocation115_spill] sm:$0xff] %v10029_v24  ;;  %v10045_v50 = vrot.slane %v12219_v23, %v12134_v41  ;;  %v10049_v16 = vrot.slane %v12220_v61, %v12134_v41  ;;  %v10053_v1 = vrot.slane %v12221_v39, %v12134_v41  ;;  %v10057_v19 = vrot.slane %v12222_v9, %v12134_v41 }
 0x54f   : > { %v10061_v25 = vrot.slane %v12223_v29, %v12134_v41  ;;  %v3705_v63 = vrot.slane %v10033_v26, 7  ;;  %v3709_v23 = vrot.slane %v10037_v54, 7  ;;  %v3713_v10 = vrot.slane %v10041_v32, 7 }
 0x550   : > { %v3717_v61 = vrot.slane %v10045_v50, 7  ;;  %v3721_v58 = vrot.slane %v10049_v16, 7  ;;  %v3725_v39 = vrot.slane %v10053_v1, 7  ;;  %v3729_v40 = vrot.slane %v10057_v19, 7 }
 0x551   : > { %v3733_v9 = vrot.slane %v10061_v25, 7  ;;  %v3761_v29 = vrot.slane %v12224_v33, %v12134_v41  ;;  %v3789_v38 = vrot.slane %v12225_v52, %v12134_v41  ;;  %v3817_v55 = vrot.slane %v12226_v5, %v12134_v41  ;;  %v12231_v33 = vld [vmem:[#allocation52_spill] sm:$0xff] }
 0x552   : > { %v3845_v15 = vrot.slane %v12227_v6, %v12134_v41  ;;  %v3873_v44 = vrot.slane %v12228_v30, %v12134_v41  ;;  %v3901_v56 = vrot.slane %v12229_v57, %v12134_v41  ;;  %v3929_v18 = vrot.slane %v12230_v48, %v12134_v41 }
 0x553   : > { %v3957_v31 = vrot.slane %v12231_v33, %v12134_v41  ;;  %v3961_v11 = vrot.slane %v3761_v29, 7  ;;  %v3965_v52 = vrot.slane %v3789_v38, 7  ;;  %v3969_v42 = vrot.slane %v3817_v55, 7  ;;  %v12236_v33 = vld [vmem:[#allocation185_spill] sm:$0xff] }
 0x554   : > { %v3973_v47 = vrot.slane %v3845_v15, 7  ;;  %v3977_v5 = vrot.slane %v3873_v44, 7  ;;  %v3981_v45 = vrot.slane %v3901_v56, 7  ;;  %v3985_v49 = vrot.slane %v3929_v18, 7 }
 0x555   : > { %v3989_v6 = vrot.slane %v3957_v31, 7  ;;  %v3996_v30 = vsel %vm12233_vm7, %v3705_v63, %v3961_v11  ;;  %v3997_v57 = vsel %vm9967_vm10, %v10033_v26, %v3761_v29  ;;  %vm12235_vm0 = vnez %v12234_v3  ;;  %v12240_v3 = vld [vmem:[#allocation229_spill] sm:$0xff]  ;;  %v12259_v26 = vld [vmem:[#allocation236_spill] sm:$0xff] }
 0x556   : > { %v4004_v48 = vsel %vm12235_vm0, %v3709_v23, %v3965_v52  ;;  %v4005_v41 = vsel %vm9971_vm9, %v10037_v54, %v3789_v38  ;;  %vm12237_vm2 = vnez %v12236_v33  ;;  %v4013_v24 = vsel %vm9975_vm6, %v10041_v32, %v3817_v55  ;;  %v12260_v54 = vld [vmem:[#allocation214_spill] sm:$0xff]  ;;  %v12270_v52 = vld [vmem:[#allocation95_spill] sm:$0xff] }
 0x557   : > { %v4012_v22 = vsel %vm12237_vm2, %v3713_v10, %v3969_v42  ;;  %vm12239_vm7 = vnez %v12238_v62  ;;  %v4021_v11 = vsel %vm9979_vm13, %v10045_v50, %v3845_v15  ;;  %vm12241_vm0 = vnez %v12240_v3  ;;  %v12244_v10 = vld [vmem:[#allocation233_spill] sm:$0xff]  ;;  %v12261_v32 = vld [vmem:[#allocation238_spill] sm:$0xff]  ;;  %v12262_v50 = vld [vmem:[#allocation216_spill] sm:$0xff] }
 0x558   : > { %v4020_v63 = vsel %vm12239_vm7, %v3717_v61, %v3973_v47  ;;  %v4028_v12 = vsel %vm12241_vm0, %v3721_v58, %v3977_v5  ;;  %v4029_v38 = vsel %vm9983_vm1, %v10049_v16, %v3873_v44  ;;  %vm12243_vm2 = vnez %v12242_v46  ;;  %v12263_v16 = vld [vmem:[#allocation240_spill] sm:$0xff]  ;;  %v12267_v61 = vld [vmem:[#allocation81_spill] sm:$0xff]  ;;  %v12272_v33 = vld [vmem:[#allocation82_spill] sm:$0xff] }
 0x559   : > { %v4036_v42 = vsel %vm12243_vm2, %v3725_v39, %v3981_v45  ;;  %v4037_v55 = vsel %vm9987_vm4, %v10053_v1, %v3901_v56  ;;  %vm12245_vm10 = vnez %v12244_v10  ;;  %v4045_v15 = vsel %vm9991_vm8, %v10057_v19, %v3929_v18  ;;  %v12249_v45 = vld [vmem:[#allocation187_spill] sm:$0xff]  ;;  %v12251_v56 = vld [vmem:[#allocation188_spill] sm:$0xff]  ;;  %v12253_v18 = vld [vmem:[#allocation190_spill] sm:$0xff] }
 0x55a   : > { %v4044_v47 = vsel %vm12245_vm10, %v3729_v40, %v3985_v49  ;;  %vm12247_vm9 = vnez %v12246_v28  ;;  %v4053_v44 = vsel %vm9995_vm5, %v10061_v25, %v3957_v31  ;;  %vm4060_vm6 = vcmp.gt.f32.partialorder %v12249_v45, %v12248_v53  ;;  %v12254_v40 = vld [vmem:[#allocation168_spill] sm:$0xff]  ;;  %v12257_v31 = vld [vmem:[#allocation235_spill] sm:$0xff]  ;;  %v12268_v39 = vld [vmem:[#allocation89_spill] sm:$0xff] }
 0x55b   : > { %v4052_v58 = vsel %vm12247_vm9, %v3733_v9, %v3989_v6  ;;  %vm4061_vm13 = vcmp.gt.f32.partialorder %v10001_v13, %v9775_v43  ;;  %vm10942_vm1 = vcmp.gt.f32.partialorder %v12251_v56, %v12250_v27  ;;  %vm4069_vm4 = vcmp.gt.f32.partialorder %v10005_v2, %v9779_v0  ;;  %v12255_v49 = vld [vmem:[#allocation192_spill] sm:$0xff]  ;;  %v12264_v1 = vld [vmem:[#allocation115_spill] sm:$0xff]  ;;  %v12273_v62 = vld [vmem:[#allocation90_spill] sm:$0xff] }
 0x55c   : > { %vm4093_vm10 = vcmp.gt.f32.partialorder %v10017_v20, %v9792_v37  ;;  %vm4100_vm9 = vcmp.gt.f32.partialorder %v12259_v26, %v12258_v17  ;;  %vm10947_vm8 = vcmp.gt.f32.partialorder %v10021_v7, %v9796_v35  ;;  %vm10946_vm7 = vcmp.gt.f32.partialorder %v12261_v32, %v12260_v54  ;;  %v12265_v19 = vld [vmem:[#allocation71_spill] sm:$0xff]  ;;  %v12275_v46 = vld [vmem:[#allocation72_spill] sm:$0xff] }
 0x55d   : > { %vm10945_vm5 = vcmp.gt.f32.partialorder %v10025_v60, %v9800_v8  ;;  %vm10944_vm0 = vcmp.gt.f32.partialorder %v12263_v16, %v12262_v50  ;;  %vm10943_vm2 = vcmp.gt.f32.partialorder %v12264_v1, %v9804_v51  ;;  %v4862_v25 = vsel %vm4060_vm6, %v3996_v30, %v12265_v19  ;;  %v12278_v28 = vld [vmem:[#allocation83_spill] sm:$0xff]  ;;  %v12279_v19 = vld [vmem:[#allocation93_spill] sm:$0xff] }
 0x55e   : > { %v12269_v9 = vsel %vm9741_vm14, %v12267_v61, %v12268_v39  ;;  %v4870_v5 = vsel %vm10942_vm1, %v4004_v48, %v12270_v52  ;;  %v12274_v3 = vsel %vm9745_vm3, %v12272_v33, %v12273_v62  ;;  %vm12276_vm14 = vcmp.gt.f32.partialorder %v12253_v18, %v12252_v4  ;;  %v12282_v61 = vld [vmem:[#allocation96_spill] sm:$0xff]  ;;  %v12286_v52 = vld [vmem:[#allocation94_spill] sm:$0xff] }
 0x55f   : > { %v4863_v29 = vsel %vm4061_vm13, %v3997_v57, %v12269_v9  ;;  %v4871_v30 = vsel %vm4069_vm4, %v4005_v41, %v12274_v3  ;;  %v4878_v10 = vsel %vm12276_vm14, %v4012_v22, %v12275_v46  ;;  %v12280_v23 = vsel %vm9749_vm11, %v12278_v28, %v12279_v19  ;;  %v12285_v9 = vld [vmem:[#allocation84_spill] sm:$0xff]  ;;  %v12289_v33 = vld [vmem:[#allocation74_spill] sm:$0xff]  ;;  %v12292_v3 = vld [vmem:[#allocation125_spill] sm:$0xff] }
 0x560   : > { %vm12281_vm1 = vcmp.gt.f32.partialorder %v10009_v36, %v9784_v14  ;;  %vm12283_vm3 = vcmp.gt.f32.partialorder %v12255_v49, %v12254_v40  ;;  %v12287_v6 = vsel %vm9753_vm12, %v12285_v9, %v12286_v52  ;;  %vm12288_vm14 = vcmp.gt.f32.partialorder %v10013_v21, %v9788_v59  ;;  %v12293_v46 = vld [vmem:[#allocation133_spill] sm:$0xff]  ;;  %v12295_v28 = vld [vmem:[#allocation98_spill] sm:$0xff]  ;;  %v12301_v9 = vld [vmem:[#allocation76_spill] sm:$0xff] }
 0x561   : > { %v4879_v48 = vsel %vm12281_vm1, %v4013_v24, %v12280_v23  ;;  %v4886_v39 = vsel %vm12283_vm3, %v4020_v63, %v12282_v61  ;;  %v4887_v22 = vsel %vm12288_vm14, %v4021_v11, %v12287_v6  ;;  %vm12290_vm11 = vcmp.gt.f32.partialorder %v12257_v31, %v12256_v34  ;;  %v12296_v11 = vld [vmem:[#allocation110_spill] sm:$0xff]  ;;  %v12304_v6 = vld [vmem:[#allocation127_spill] sm:$0xff] }
 0x562   : > { %v4894_v62 = vsel %vm12290_vm11, %v4028_v12, %v12289_v33  ;;  %v12294_v57 = vsel %vm9757_vm15, %v12292_v3, %v12293_v46  ;;  %v4902_v19 = vsel %vm4100_vm9, %v4036_v42, %v12295_v28  ;;  %vm12297_vm12 = vnez %v12296_v11  ;;  %v12298_v23 = vld [vmem:[#allocation126_spill] sm:$0xff]  ;;  %v12305_v33 = vld [vmem:[#allocation137_spill] sm:$0xff]  ;;  %v12307_v3 = vld [vmem:[#allocation100_spill] sm:$0xff] }
 0x563   : > { %v4895_v63 = vsel %vm4093_vm10, %v4029_v38, %v12294_v57  ;;  %v12299_v61 = vld [vmem:[#allocation134_spill] sm:$0xff]  ;;  %v4910_v52 = vsel %vm10946_vm7, %v4044_v47, %v12301_v9  ;;  %v12302_v38 = vld [vmem:[#allocation113_spill] sm:$0xff]  ;;  %v4918_v46 = vsel %vm10944_vm0, %v4052_v58, %v12307_v3  ;;  %v12310_v57 = vld [vmem:[#allocation128_spill] sm:$0xff]  ;;  %v5025_v9 = vrot.slane %v4886_v39, 1 }
 0x564   : > { %v12300_v41 = vsel %vm12297_vm12, %v12298_v23, %v12299_v61  ;;  %vm12303_vm15 = vnez %v12302_v38  ;;  %v12311_v28 = vld [vmem:[#allocation138_spill] sm:$0xff]  ;;  %v4941_v23 = vrot.slane %v4862_v25, 1  ;;  %v4969_v61 = vrot.slane %v4870_v5, 1 }
 0x565   : > { %v4903_v12 = vsel %vm10947_vm8, %v4037_v55, %v12300_v41  ;;  %v12306_v24 = vsel %vm12303_vm15, %v12304_v6, %v12305_v33  ;;  %v12308_v55 = vld [vmem:[#allocation114_spill] sm:$0xff]  ;;  %v4997_v41 = vrot.slane %v4878_v10, 1  ;;  %v5053_v38 = vrot.slane %v4894_v62, 1 }
 0x566   : > { %v4911_v42 = vsel %vm10945_vm5, %v4045_v15, %v12306_v24  ;;  %vm12309_vm1 = vnez %v12308_v55  ;;  %v5081_v15 = vrot.slane %v4902_v19, 1  ;;  %vm12313_vm3 = vcmask 1041409  }
 0x567   : > { %v12312_v11 = vsel %vm12309_vm1, %v12310_v57, %v12311_v28  ;;  %v4944_v6 = vsel %vm12313_vm3, %v4863_v29, %v4941_v23  ;;  %vm12314_vm14 = vmmov %vm12313_vm3  ;;  %v5109_v58 = vrot.slane %v4910_v52, 1  ;;  %v5137_v24 = vrot.slane %v4918_v46, 1 }
 0x568   : > { %v4919_v47 = vsel %vm10943_vm2, %v4053_v44, %v12312_v11  ;;  %v4972_v33 = vsel %vm12314_vm14, %v4871_v30, %v4969_v61  ;;  %vm12315_vm11 = vcmask 1043459   ;;  %vm12317_vm15 = vmmov %vm12313_vm3  ;;  %vm12319_vm2 = vcmask 1045509  }
 0x569   : > { %v4945_v3 = vsel %vm12315_vm11, %v4863_v29, %v4944_v6  ;;  %vm12316_vm12 = vmmov %vm12315_vm11  ;;  %v5000_v57 = vsel %vm12317_vm15, %v4879_v48, %v4997_v41 }
 0x56a   : > { %v4973_v55 = vsel %vm12316_vm12, %v4871_v30, %v4972_v33  ;;  %vm12318_vm1 = vmmov %vm12313_vm3  ;;  %v4946_v25 = vsel %vm12319_vm2, %v4863_v29, %v4945_v3  ;;  %vm12323_vm3 = vcmask 1047559  }
 0x56b   : > { %v5028_v44 = vsel %vm12318_vm1, %v4887_v22, %v5025_v9  ;;  %vm12320_vm0 = vmmov %vm12319_vm2  ;;  %v4947_v62 = vsel %vm12323_vm3, %v4863_v29, %v4946_v25  ;;  %v5056_v23 = vsel %vm12318_vm1, %v4895_v63, %v5053_v38 }
 0x56c   : > { %v4974_v5 = vsel %vm12320_vm0, %v4871_v30, %v4973_v55  ;;  %vm12321_vm5 = vmmov %vm12315_vm11 }
 0x56d   : > { %v5001_v10 = vsel %vm12321_vm5, %v4879_v48, %v5000_v57  ;;  %vm12322_vm7 = vmmov %vm12321_vm5 }
 0x56e   : > { %v5029_v39 = vsel %vm12322_vm7, %v4887_v22, %v5028_v44  ;;  %vm12324_vm14 = vmmov %vm12323_vm3 }
 0x56f   : > { %v4975_v19 = vsel %vm12324_vm14, %v4871_v30, %v4974_v5  ;;  %vm12325_vm8 = vmmov %vm12320_vm0 }
 0x570   : > { %v5002_v52 = vsel %vm12325_vm8, %v4879_v48, %v5001_v10  ;;  %vm12326_vm11 = vmmov %vm12320_vm0  ;;  %v5252_v57 = vcombine.low %v4947_v62, %v4975_v19  ;;  %v12342_v10 = vld [vmem:[#allocation16_spill] sm:$0xff] }
 0x571   : > { %v5030_v46 = vsel %vm12326_vm11, %v4887_v22, %v5029_v39  ;;  %vm12327_vm12 = vmmov %vm12323_vm3 }
 0x572   : > { %v5003_v28 = vsel %vm12327_vm12, %v4879_v48, %v5002_v52  ;;  %vm12328_vm15 = vmmov %vm12323_vm3 }
 0x573   : > { %v5031_v11 = vsel %vm12328_vm15, %v4887_v22, %v5030_v46  ;;  %vm12329_vm2 = vmmov %vm12318_vm1 }
 0x574   : > { %v5084_v61 = vsel %vm12329_vm2, %v4903_v12, %v5081_v15  ;;  %vm12330_vm0 = vmmov %vm12321_vm5  ;;  %v5261_v44 = vcombine.low %v5003_v28, %v5031_v11 }
 0x575   : > { %v5057_v41 = vsel %vm12330_vm0, %v4895_v63, %v5056_v23  ;;  %vm12331_vm5 = vmmov %vm12330_vm0 }
 0x576   : > { %v5085_v9 = vsel %vm12331_vm5, %v4903_v12, %v5084_v61  ;;  %vm12332_vm7 = vmmov %vm12318_vm1 }
 0x577   : > { %v5112_v29 = vsel %vm12332_vm7, %v4911_v42, %v5109_v58  ;;  %vm12333_vm3 = vmmov %vm12318_vm1  ;;  %v5086_v33 = vsel %vm12325_vm8, %v4903_v12, %v5085_v9 }
 0x578   : > { %v5140_v30 = vsel %vm12333_vm3, %v4919_v47, %v5137_v24  ;;  %vm12334_vm14 = vmmov %vm12325_vm8  ;;  %vm12343_vm3 = vcmp.gt.f32.partialorder %v12251_v56, %v12250_v27 }
 0x579   : > { %v5058_v6 = vsel %vm12334_vm14, %v4895_v63, %v5057_v41  ;;  %vm12335_vm11 = vmmov %vm12330_vm0  ;;  %v4132_v39 = vsel %vm12343_vm3, %v12251_v56, %v12250_v27  ;;  %vm12347_vm14 = vcmp.gt.f32.partialorder %v10013_v21, %v9788_v59 }
 0x57a   : > { %v5113_v48 = vsel %vm12335_vm11, %v4911_v42, %v5112_v29  ;;  %vm12336_vm12 = vmmov %vm12330_vm0  ;;  %v5059_v38 = vsel %vm12328_vm15, %v4895_v63, %v5058_v6  ;;  %v4124_v63 = vsel %vm4060_vm6, %v12249_v45, %v12248_v53  ;;  %v4133_v53 = vsel %vm4069_vm4, %v10005_v2, %v9779_v0 }
 0x57b   : > { %v5141_v22 = vsel %vm12336_vm12, %v4919_v47, %v5140_v30  ;;  %vm12337_vm1 = vmmov %vm12328_vm15  ;;  %vm12344_vm6 = vcmp.gt.f32.partialorder %v12253_v18, %v12252_v4  ;;  %vm12346_vm4 = vcmp.gt.f32.partialorder %v12255_v49, %v12254_v40  ;;  %v4149_v56 = vsel %vm12347_vm14, %v10013_v21, %v9788_v59 }
 0x57c   : > { %v5087_v15 = vsel %vm12337_vm1, %v4903_v12, %v5086_v33  ;;  %vm12338_vm2 = vmmov %vm12325_vm8  ;;  %v4125_v12 = vsel %vm4061_vm13, %v10001_v13, %v9775_v43  ;;  %v4140_v45 = vsel %vm12344_vm6, %v12253_v18, %v12252_v4  ;;  %vm12345_vm13 = vcmp.gt.f32.partialorder %v10009_v36, %v9784_v14  ;;  %v12350_v18 = vld [vmem:[#allocation15_spill] sm:$0xff] }
 0x57d   : > { %v5114_v3 = vsel %vm12338_vm2, %v4911_v42, %v5113_v48  ;;  %vm12339_vm0 = vmmov %vm12338_vm2  ;;  %v5270_v25 = vcombine.low %v5059_v38, %v5087_v15  ;;  %v4141_v27 = vsel %vm12345_vm13, %v10009_v36, %v9784_v14  ;;  %v4148_v0 = vsel %vm12346_vm4, %v12255_v49, %v12254_v40 }
 0x57e   : > { %v5142_v55 = vsel %vm12339_vm0, %v4919_v47, %v5141_v22  ;;  %vm12340_vm5 = vmmov %vm12337_vm1  ;;  %vm12348_vm8 = vcmp.gt.f32.partialorder %v12257_v31, %v12256_v34  ;;  %v4157_v4 = vsel %vm4093_vm10, %v10017_v20, %v9792_v37  ;;  %v4164_v59 = vsel %vm4100_vm9, %v12259_v26, %v12258_v17 }
 0x57f   : > { %v5115_v58 = vsel %vm12340_vm5, %v4911_v42, %v5114_v3  ;;  %vm12341_vm7 = vmmov %vm12337_vm1  ;;  %v10298_v42 = vrot.slane %v5252_v57, %v12342_v10  ;;  %v10314_v43 = vrot.slane %v5270_v25, %v12342_v10  ;;  %v4156_v14 = vsel %vm12348_vm8, %v12257_v31, %v12256_v34 }
 0x580   : > { %v5143_v24 = vsel %vm12341_vm7, %v4919_v47, %v5142_v55  ;;  %v10301_v47 = vrot.slane %v5261_v44, %v12342_v10  ;;  %vm12349_vm11 = vcmp.gt.f32.partialorder %v10021_v7, %v9796_v35  ;;  %vm12351_vm12 = vcmp.gt.f32.partialorder %v12261_v32, %v12260_v54 }
 0x581   : > { %v5279_v5 = vcombine.low %v5115_v58, %v5143_v24  ;;  %v4165_v21 = vsel %vm12349_vm11, %v10021_v7, %v9796_v35  ;;  %v4172_v37 = vsel %vm12351_vm12, %v12261_v32, %v12260_v54  ;;  %vm12352_vm10 = vcmp.gt.f32.partialorder %v10025_v60, %v9800_v8 }
 0x582   : > { %v5400_v2 = vcombine.low %v10298_v42, %v10301_v47  ;;  %v4173_v20 = vsel %vm12352_vm10, %v10025_v60, %v9800_v8  ;;  %vm12353_vm9 = vcmp.gt.f32.partialorder %v12263_v16, %v12262_v50  ;;  %vm12354_vm15 = vcmp.gt.f32.partialorder %v12264_v1, %v9804_v51 }
 0x583   : > { %v10317_v13 = vrot.slane %v5279_v5, %v12342_v10  ;;  %v4180_v35 = vsel %vm12353_vm9, %v12263_v16, %v12262_v50  ;;  %v4181_v49 = vsel %vm12354_vm15, %v12264_v1, %v9804_v51  ;;  %v4273_v34 = vrot.slane %v4124_v63, 1 }
 0x584   : > { %v5408_v40 = vrot.slane %v5400_v2, %v12350_v18  ;;  %v4301_v31 = vrot.slane %v4132_v39, 1  ;;  %v4329_v17 = vrot.slane %v4140_v45, 1  ;;  %v4357_v26 = vrot.slane %v4148_v0, 1 }
 0x585   : > { %v5401_v36 = vcombine.low %v10314_v43, %v10317_v13  ;;  %v4385_v54 = vrot.slane %v4156_v14, 1  ;;  %v4413_v8 = vrot.slane %v4164_v59, 1  ;;  %vm12355_vm1 = vcmask 1041409  }
 0x586   : > { %v4276_v32 = vsel %vm12355_vm1, %v4125_v12, %v4273_v34  ;;  %vm12356_vm2 = vmmov %vm12355_vm1  ;;  %v4441_v50 = vrot.slane %v4172_v37, 1  ;;  %vm12357_vm0 = vcmask 1043459   ;;  %vm12361_vm6 = vcmask 1045509  }
 0x587   : > { %v5415_v7 = vrot.slane %v5401_v36, %v12350_v18  ;;  %v4304_v62 = vsel %vm12356_vm2, %v4133_v53, %v4301_v31  ;;  %v4277_v16 = vsel %vm12357_vm0, %v4125_v12, %v4276_v32  ;;  %vm12358_vm5 = vmmov %vm12357_vm0  ;;  %vm12365_vm8 = vcmask 1047559   ;;  %v12385_v32 = vld [vmem:[#allocation121_spill] sm:$0xff] }
 0x588   : > { %v4305_v19 = vsel %vm12358_vm5, %v4133_v53, %v4304_v62  ;;  %vm12359_vm7 = vmmov %vm12355_vm1  ;;  %v4278_v1 = vsel %vm12361_vm6, %v4125_v12, %v4277_v16  ;;  %v4388_v6 = vsel %vm12355_vm1, %v4157_v4, %v4385_v54  ;;  %v4469_v15 = vrot.slane %v4180_v35, 1  ;;  %v12386_v62 = vld [vmem:[#allocation80_spill] sm:$0xff]  ;;  %v12387_v16 = vld [vmem:[#allocation79_spill] sm:$0xff] }
 0x589   : > { %v5416_v60 = vcombine.low %v5408_v40, %v5415_v7  ;;  %v4332_v52 = vsel %vm12359_vm7, %v4141_v27, %v4329_v17  ;;  %vm12360_vm3 = vmmov %vm12355_vm1  ;;  %v4279_v23 = vsel %vm12365_vm8, %v4125_v12, %v4278_v1  ;;  %v4389_v48 = vsel %vm12357_vm0, %v4157_v4, %v4388_v6 }
 0x58a   : > { %v4360_v51 = vsel %vm12360_vm3, %v4149_v56, %v4357_v26  ;;  %vm12362_vm13 = vmmov %vm12361_vm6  ;;  %v5666_v2 = vcombine.high %v10298_v42, %v10301_v47  ;;  %v5667_v0 = vcombine.high %v10314_v43, %v10317_v13  ;;  %v4696_v26 = vpop.permute.xlu1 %4695 }
 0x58b   : > { %5417 = vrot.lane.b32.xlu0 %v5416_v60, %s5865_s28  ;;  %v4306_v46 = vsel %vm12362_vm13, %v4133_v53, %v4305_v19  ;;  %vm12363_vm4 = vmmov %vm12357_vm0  ;;  %v12388_v19 = vld [vmem:[#allocation78_spill] sm:$0xff] }
 0x58c   : > { %v4333_v28 = vsel %vm12363_vm4, %v4141_v27, %v4332_v52  ;;  %vm12364_vm14 = vmmov %vm12357_vm0  ;;  %v5427_v59 = vrot.slane %v5666_v2, %v12350_v18  ;;  %v5288_v52 = vcombine.low %v12388_v19, %v12387_v16 }
 0x58d   : > { %v4361_v11 = vsel %vm12364_vm14, %v4149_v56, %v4360_v51  ;;  %vm12366_vm11 = vmmov %vm12365_vm8 }
 0x58e   : > { %v4307_v61 = vsel %vm12366_vm11, %v4133_v53, %v4306_v46  ;;  %vm12367_vm12 = vmmov %vm12361_vm6  ;;  %v4720_v60 = vpop.permute.xlu1 %4719 }
 0x58f   : > { %v4334_v41 = vsel %vm12367_vm12, %v4141_v27, %v4333_v28  ;;  %vm12368_vm10 = vmmov %vm12361_vm6  ;;  %v4616_v24 = vcombine.low %v4279_v23, %v4307_v61  ;;  %v5296_v28 = vrot.slane %v5288_v52, %v12350_v18 }
 0x590   : > { %v4362_v9 = vsel %vm12368_vm10, %v4149_v56, %v4361_v11  ;;  %vm12369_vm9 = vmmov %vm12365_vm8 }
 0x591   : > { %v4335_v29 = vsel %vm12369_vm9, %v4141_v27, %v4334_v41  ;;  %vm12370_vm15 = vmmov %vm12365_vm8  ;;  %v4623_v39 = vrot.slane %v4616_v24, %v12342_v10  ;;  %v12389_v41 = vld [vmem:[#allocation18_spill] sm:$0xff] }
 0x592   : > { %v4363_v30 = vsel %vm12370_vm15, %v4149_v56, %v4362_v9  ;;  %vm12371_vm2 = vmmov %vm12355_vm1  ;;  %v4744_v46 = vpop.permute.xlu1 %4743  ;;  %v12390_v9 = vld [vmem:[#allocation124_spill] sm:$0xff] }
 0x593   : > { %v4416_v33 = vsel %vm12371_vm2, %v4165_v21, %v4413_v8  ;;  %vm12372_vm5 = vmmov %vm12357_vm0  ;;  %v4625_v53 = vcombine.low %v4335_v29, %v4363_v30  ;;  %v4657_v29 = vcombine.low %v12390_v9, %v12389_v41  ;;  %vm12391_vm2 = vcmask 64512  }
 0x594   : > { %v4417_v22 = vsel %vm12372_vm5, %v4165_v21, %v4416_v33  ;;  %vm12373_vm7 = vmmov %vm12355_vm1  ;;  %vm12392_vm5 = vcmask 130048   ;;  %v12393_v33 = vld [vmem:[#allocation123_spill] sm:$0xff] }
 0x595   : > { %v4444_v38 = vsel %vm12373_vm7, %v4173_v20, %v4441_v50  ;;  %vm12374_vm3 = vmmov %vm12361_vm6  ;;  %v4632_v14 = vrot.slane %v4625_v53, %v12342_v10  ;;  %v5289_v50 = vcombine.low %v12386_v62, %v12385_v32  ;;  %vm4848_vm7 = vcmask 326656  }
 0x596   : > { %v4390_v3 = vsel %vm12374_vm3, %v4157_v4, %v4389_v48  ;;  %vm12375_vm6 = vmmov %vm12374_vm3  ;;  %v12394_v48 = vld [vmem:[#allocation122_spill] sm:$0xff] }
 0x597   : > { %v4418_v55 = vsel %vm12375_vm6, %v4165_v21, %v4417_v22  ;;  %vm12376_vm13 = vmmov %vm12357_vm0  ;;  %v4798_v40 = vcombine.low %v4623_v39, %v4632_v14  ;;  %v5658_v37 = vcombine.high %v4623_v39, %v4632_v14  ;;  %v5303_v1 = vrot.slane %v5289_v50, %v12350_v18 }
 0x598   : > { %v4445_v58 = vsel %vm12376_vm13, %v4173_v20, %v4444_v38  ;;  %vm12377_vm4 = vmmov %vm12365_vm8  ;;  %v4656_v22 = vcombine.low %v12394_v48, %v12393_v33  ;;  %vm4852_vm6 = vcmask 457728   ;;  %vm4854_vm13 = vcmask 523264  }
 0x599   : > { %v4391_v57 = vsel %vm12377_vm4, %v4157_v4, %v4390_v3  ;;  %vm12378_vm14 = vmmov %vm12377_vm4  ;;  %v4806_v43 = vrot.slane %v4798_v40, %v12350_v18  ;;  %v4830_v7 = vrot.slane %v5658_v37, %v12350_v18  ;;  %v5304_v11 = vcombine.low %v5296_v28, %v5303_v1 }
 0x59a   : > { %v4419_v44 = vsel %vm12378_vm14, %v4165_v21, %v4418_v55  ;;  %vm12379_vm8 = vmmov %vm12374_vm3  ;;  %v5434_v21 = vrot.slane %v5667_v0, %v12350_v18  ;;  %v4671_v3 = vrot.slane %v4657_v29, %v12350_v18 }
 0x59b   : > { %v4446_v25 = vsel %vm12379_vm8, %v4173_v20, %v4445_v58  ;;  %vm12380_vm11 = vmmov %vm12355_vm1  ;;  %v4634_v27 = vcombine.low %v4391_v57, %v4419_v44  ;;  %vm4844_vm1 = vcmask 195584   ;;  %v4664_v44 = vrot.slane %v4656_v22, %v12350_v18 }
 0x59c   : > { %v4472_v5 = vsel %vm12380_vm11, %v4181_v49, %v4469_v15  ;;  %vm12381_vm12 = vmmov %vm12377_vm4  ;;  %v5435_v35 = vcombine.low %v5427_v59, %v5434_v21 }
 0x59d   : > { %v4447_v63 = vsel %vm12381_vm12, %v4173_v20, %v4446_v25  ;;  %vm12382_vm10 = vmmov %vm12357_vm0  ;;  %v4641_v36 = vrot.slane %v4634_v27, %v12342_v10  ;;  %vm4846_vm0 = vcmask 261120  }
 0x59e   : > { %v4473_v12 = vsel %vm12382_vm10, %v4181_v49, %v4472_v5  ;;  %vm12383_vm9 = vmmov %vm12374_vm3  ;;  %5436 = vrot.lane.b32.xlu0 %v5435_v35, %s5864_s27  ;;  %vm4850_vm3 = vcmask 392192   ;;  %v4672_v5 = vcombine.low %v4664_v44, %v4671_v3 }
 0x59f   : > { %v4474_v45 = vsel %vm12383_vm9, %v4181_v49, %v4473_v12  ;;  %vm12384_vm15 = vmmov %vm12377_vm4 }
 0x5a0   : > { %v4475_v56 = vsel %vm12384_vm15, %v4181_v49, %v4474_v45  ;;  %vm12395_vm4 = vmmov %vm12391_vm2 }
 0x5a1   : > { %v4643_v4 = vcombine.low %v4447_v63, %v4475_v56  ;;  %v4842_v63 = vsel %vm12395_vm4, %v4672_v5, %v4696_v26  ;;  %vm12396_vm14 = vmmov %vm12392_vm5 }
 0x5a2   : > { %v4843_v12 = vsel %vm12396_vm14, %v4842_v63, %v4720_v60 }
 0x5a3   : > { %v4650_v20 = vrot.slane %v4643_v4, %v12342_v10  ;;  %v5323_v10 = vpop.permute.xlu0 %5322  ;;  %v4845_v53 = vsel %vm4844_vm1, %v4843_v12, %v4744_v46 }
 0x5a4   : > { %v5438_v30 = vsel %vm12391_vm2, %v5304_v11, %v5323_v10 }
 0x5a5   : > { %v4799_v42 = vcombine.low %v4641_v36, %v4650_v20  ;;  %v5659_v47 = vcombine.high %v4641_v36, %v4650_v20 }
 0x5a7   : > { %v4813_v13 = vrot.slane %v4799_v42, %v12350_v18  ;;  %v4837_v49 = vrot.slane %v5659_v47, %v12350_v18  ;;  %v5342_v17 = vpop.permute.xlu0 %5341 }
 0x5a8   : > { %v5439_v6 = vsel %vm12392_vm5, %v5438_v30, %v5342_v17 }
 0x5a9   : > { %v4814_v34 = vcombine.low %v4806_v43, %v4813_v13  ;;  %v4838_v31 = vcombine.low %v4830_v7, %v4837_v49 }
 0x5ab   : > { %4815 = vrot.lane.b32.xlu1 %v4814_v34, %s5865_s28  ;;  %v5361_v54 = vpop.permute.xlu0 %5360 }
 0x5ac   : > { %v5440_v38 = vsel %vm4844_vm1, %v5439_v6, %v5361_v54 }
 0x5af   : > { %4839 = vrot.lane.b32.xlu1 %v4838_v31, %s5864_s27  ;;  %v5380_v8 = vpop.permute.xlu0 %5379 }
 0x5b0   : > { %v4768_v23 = vpop.permute.xlu1 %4767  ;;  %v5441_v15 = vsel %vm4846_vm0, %v5440_v38, %v5380_v8 }
 0x5b1   : > { %v4847_v45 = vsel %vm4846_vm0, %v4845_v53, %v4768_v23 }
 0x5b3   : > { %v5399_v51 = vpop.permute.xlu0 %5398 }
 0x5b4   : > { %v5442_v55 = vsel %vm4848_vm7, %v5441_v15, %v5399_v51  ;;  %v4792_v58 = vpop.permute.xlu1 %4791 }
 0x5b5   : > { %v4849_v18 = vsel %vm4848_vm7, %v4847_v45, %v4792_v58 }
 0x5fd   : > { %v5418_v61 = vpop.permute.xlu0 %5417 }
 0x5fe   : > { %v5443_v24 = vsel %vm4850_vm3, %v5442_v55, %v5418_v61 }
 0x610   : > { %v5437_v57 = vpop.permute.xlu0 %5436 }
 0x611   : > { %v5444_v25 = vsel %vm4852_vm6, %v5443_v24, %v5437_v57 }
 0x612   : > { %5445 = vst.msk [vmem:[%s314_s14] sm:$0xff] %vm4854_vm13, %v5444_v25 }
 0x61d   : > { %v4816_v39 = vpop.permute.xlu1 %4815 }
 0x61e   : > { %v4851_v27 = vsel %vm4850_vm3, %v4849_v18, %v4816_v39 }
 0x621   : > { %v4840_v2 = vpop.permute.xlu1 %4839 }
 0x622   : > { %v4853_v0 = vsel %vm4852_vm6, %v4851_v27, %v4840_v2 }
 0x623   : > { %4855 = vst.msk [vmem:[%s310_s16] sm:$0xff] %vm4854_vm13, %v4853_v0 }
 0x624 PF: > { %s19_s24 = sadd.s32 1, %s5848_s24  }
 0x625   : > { %p16_p1 = scmp.ge.s32.totalorder %s19_s24, 4  }
 0x627   :  { %18 = sbr.rel (!%p16_p1) target bundleno = 1 (0x1), region = 103 }
 0x62c   :  { %5495 = vsyncpa [#allocation5], 1 }
 0x62d   :  { %5497 = vsyncpa [#allocation5 + $0x1], 1 }

</bundles_post_ra>
